<compile_context>
chip_gen: v5e
topology: v5e:2x2
jax: 0.10.0
libtpu: 0.0.40
codegen_flags: <defaults>
</compile_context>

<pallas_src>
import functools

import jax
import jax.numpy as jnp
import numpy as np
from jax.experimental import pallas as pl
from jax.experimental.pallas import tpu as pltpu


# ------------------------------- utilities --------------------------------- #

def _round_up(x, m):
    return (x + m - 1) // m * m


def _fold_bn(gamma, beta, mean, var, eps=1e-5):
    """Fold eval-mode BatchNorm into a per-channel (scale, bias)."""
    scale = gamma / jnp.sqrt(var + eps)
    bias = beta - mean * scale
    return scale, bias


# ------------------------------ Pallas kernels ----------------------------- #
#
# In-kernel layout (one image per grid step):
#   xp_ref : (Mp, Cin)  spatially padded image, flattened row-major as
#            flat = y * Wp + x, with Wp = W + 2 (one pad column each side),
#            one pad row on top and TWO at the bottom (keeps the largest tap
#            offset in range).
#   The dense 3x3 / pad=1 / stride=1 conv at flat position m is
#       out[m] = sum_{dy,dx} xp[m + dy*Wp + dx] @ W[dy, dx]
#   for m in [0, H*Wp).  Flat positions whose column index is >= W are junk
#   (their window wraps to the next row) and are sliced away by the caller.
#   Strided convs are computed densely and subsampled in glue.

def _make_conv3x3_kernel(*, wp, m_out, mode):
    """Build a fused conv3x3(+BN)(+shortcut)+ReLU kernel body.

    mode: "plain" -> relu(conv + bias)                      (conv1)
          "add"   -> relu(conv + bias + residual)           (conv2, identity)
          "proj"  -> relu(conv + xs @ wsc + bias)           (conv2, projection)
    """

    def _taps(xp_ref, w_ref):
        acc = None
        for dy in range(3):
            for dx in range(3):
                off = dy * wp + dx                       # static Python int
                tap = xp_ref[off:off + m_out, :]         # shifted VMEM window
                part = jnp.dot(tap, w_ref[dy * 3 + dx],
                               preferred_element_type=jnp.float32)
                acc = part if acc is None else acc + part
        return acc

    if mode == "plain":
        def kernel(xp_ref, w_ref, b_ref, out_ref):
            out = _taps(xp_ref, w_ref) + b_ref[...]
            out_ref[...] = jnp.maximum(out, 0.0).astype(out_ref.dtype)
    elif mode == "add":
        def kernel(xp_ref, w_ref, b_ref, res_ref, out_ref):
            out = (_taps(xp_ref, w_ref) + b_ref[...]
                   + res_ref[...].astype(jnp.float32))
            out_ref[...] = jnp.maximum(out, 0.0).astype(out_ref.dtype)
    elif mode == "proj":
        def kernel(xp_ref, w_ref, b_ref, xs_ref, wsc_ref, out_ref):
            acc = _taps(xp_ref, w_ref)
            acc = acc + jnp.dot(xs_ref[...], wsc_ref[...],
                                preferred_element_type=jnp.float32)
            out_ref[...] = jnp.maximum(acc + b_ref[...], 0.0).astype(out_ref.dtype)
    else:
        raise ValueError(mode)
    return kernel


def _conv3x3_call(xp_flat, w_taps, bias, *, m_out, wp, mode, extras=(),
                  out_dtype):
    """Run the per-image dense-conv kernel over a batch ("parallel") grid."""
    n, mp, cin = xp_flat.shape
    cpad = w_taps.shape[-1]
    kernel = _make_conv3x3_kernel(wp=wp, m_out=m_out, mode=mode)

    in_specs = [
        pl.BlockSpec((None, mp, cin), lambda b: (b, 0, 0)),   # per-image input
        pl.BlockSpec(w_taps.shape, lambda b: (0, 0, 0)),      # pinned weights
        pl.BlockSpec(bias.shape, lambda b: (0, 0)),           # pinned bias (f32)
    ]
    args = [xp_flat, w_taps, bias]

    # rough double-buffered VMEM working set for the vmem limit below
    est = (2 * mp * cin * xp_flat.dtype.itemsize
           + 2 * w_taps.size * w_taps.dtype.itemsize
           + 2 * bias.size * bias.dtype.itemsize
           + 2 * m_out * cpad * np.dtype(out_dtype).itemsize
           + m_out * cpad * 4)                                # f32 accumulator

    for arr, kind in extras:
        if kind == "row":        # per-image operand, shape (N, rows, cols)
            in_specs.append(
                pl.BlockSpec((None,) + arr.shape[1:], lambda b: (b, 0, 0)))
            est += 2 * arr.shape[1] * arr.shape[2] * arr.dtype.itemsize
        else:                    # "pin": grid-invariant operand
            in_specs.append(
                pl.BlockSpec(arr.shape, lambda b, _nd=arr.ndim: (0,) * _nd))
            est += 2 * arr.size * arr.dtype.itemsize
        args.append(arr)

    vmem_limit = int(min(64 * 1024 * 1024, max(32 * 1024 * 1024, 2 * est)))

    return pl.pallas_call(
        kernel,
        out_shape=jax.ShapeDtypeStruct((n, m_out, cpad), out_dtype),
        grid=(n,),
        in_specs=in_specs,
        out_specs=pl.BlockSpec((None, m_out, cpad), lambda b: (b, 0, 0)),
        compiler_params=pltpu.CompilerParams(
            dimension_semantics=("parallel",),
            vmem_limit_bytes=vmem_limit),
    )(*args)


# --------------------------------- forward --------------------------------- #

def residual_block18_forward(x_nchw, params, stride, *,
                             compute_dtype=jnp.bfloat16):
    """Forward pass of ResidualBlock18 (eval-mode BN).  NCHW in, NCHW f32 out."""
    x = jnp.transpose(x_nchw, (0, 2, 3, 1)).astype(compute_dtype)     # NHWC
    n, h, w, cin = x.shape
    cout = params["w1"].shape[0]
    cpad = _round_up(cout, 128)                  # lane-dense output channels
    ho = (h - 1) // stride + 1
    wo = (w - 1) // stride + 1

    def fold_taps(w_oihw, scale):
        # PyTorch OIHW -> (9, Cin, Cpad) taps with the BN scale folded in.
        t = jnp.transpose(w_oihw, (2, 3, 1, 0)).reshape(9, w_oihw.shape[1], cout)
        t = t * scale                                           # scale over Cout
        return jnp.pad(t, ((0, 0), (0, 0), (0, cpad - cout))).astype(compute_dtype)

    def fold_bias(b):
        return jnp.pad(b, (0, cpad - cout)).reshape(1, cpad).astype(jnp.float32)

    # ---- conv1 (3x3, pad=1) + bn1 + relu (dense compute, stride in glue) ----
    s1, b1 = _fold_bn(*params["bn1"])
    wp1 = w + 2
    xp1 = jnp.pad(x, ((0, 0), (1, 2), (1, 1), (0, 0)))
    xp1 = xp1.reshape(n, (h + 3) * wp1, cin)
    y1_flat = _conv3x3_call(xp1, fold_taps(params["w1"], s1), fold_bias(b1),
                            m_out=h * wp1, wp=wp1, mode="plain",
                            out_dtype=compute_dtype)
    # keep valid columns / channels and apply the conv1 stride
    y1 = y1_flat.reshape(n, h, wp1, cpad)[:, ::stride, ::stride, :cout]
    y1 = y1[:, :ho, :wo, :]

    # ---- conv2 (3x3, stride=1, pad=1) + bn2 + shortcut + relu ---------------
    s2, b2 = _fold_bn(*params["bn2"])
    wp2 = wo + 2
    m2 = ho * wp2
    yp2 = jnp.pad(y1, ((0, 0), (1, 2), (1, 1), (0, 0)))
    yp2 = yp2.reshape(n, (ho + 3) * wp2, cout)
    w2t = fold_taps(params["w2"], s2)

    if stride != 1 or cin != cout:
        # Projection shortcut: 1x1-conv matmul fused into the conv2 kernel.
        ssc, bsc = _fold_bn(*params["bnsc"])
        wsc = jnp.transpose(params["wsc"][:, :, 0, 0], (1, 0)) * ssc   # (cin, cout)
        wsc = jnp.pad(wsc, ((0, 0), (0, cpad - cout))).astype(compute_dtype)
        xs = x[:, ::stride, ::stride, :][:, :ho, :wo, :]
        xs = jnp.pad(xs, ((0, 0), (0, 0), (0, 2), (0, 0))).reshape(n, m2, cin)
        y2_flat = _conv3x3_call(yp2, w2t, fold_bias(b2 + bsc),
                                m_out=m2, wp=wp2, mode="proj",
                                extras=[(xs, "row"), (wsc, "pin")],
                                out_dtype=compute_dtype)
    else:
        # Identity shortcut: residual streamed in compute_dtype, added in f32.
        res = jnp.pad(x, ((0, 0), (0, 0), (0, 2), (0, cpad - cin)))
        res = res.reshape(n, m2, cpad)
        y2_flat = _conv3x3_call(yp2, w2t, fold_bias(b2),
                                m_out=m2, wp=wp2, mode="add",
                                extras=[(res, "row")],
                                out_dtype=compute_dtype)

    out = y2_flat.reshape(n, ho, wp2, cpad)[:, :, :wo, :cout]
    return jnp.transpose(out, (0, 3, 1, 2)).astype(jnp.float32)        # NCHW


# --------------------------- pure-JAX reference ----------------------------- #

def reference_forward(x, params, stride):
    eps = 1e-5

    def conv(x, w, s, pad):
        return jax.lax.conv_general_dilated(
            x, w, (s, s), ((pad, pad), (pad, pad)),
            dimension_numbers=("NCHW", "OIHW", "NCHW"))

    def bn(x, p):
        g, b, m, v = p
        sh = (1, -1, 1, 1)
        return ((x - m.reshape(sh)) / jnp.sqrt(v.reshape(sh) + eps)
                * g.reshape(sh) + b.reshape(sh))

    out = jax.nn.relu(bn(conv(x, params["w1"], stride, 1), params["bn1"]))
    out = bn(conv(out, params["w2"], 1, 1), params["bn2"])
    cin, cout = x.shape[1], params["w1"].shape[0]
    if stride != 1 or cin != cout:
        sc = bn(conv(x, params["wsc"], stride, 0), params["bnsc"])
    else:
        sc = x
    return jax.nn.relu(out + sc)


# --------------------------------- main ------------------------------------- #

if __name__ == "__main__":
    def bn_params(key, c):
        k1, k2, k3, k4 = jax.random.split(key, 4)
        gamma = jax.random.uniform(k1, (c,), jnp.float32, 0.5, 1.5)
        beta = 0.1 * jax.random.normal(k2, (c,), jnp.float32)
        mean = 0.1 * jax.random.normal(k3, (c,), jnp.float32)
        var = jax.random.uniform(k4, (c,), jnp.float32, 0.5, 1.5)
        return (gamma, beta, mean, var)

    # --- Case 1: projection shortcut (stride=2, Cin != Cout) -----------------
    key = jax.random.PRNGKey(0)
    n, cin, h, w = 2, 4, 16, 16
    cout, stride = 8, 2
    ks = jax.random.split(key, 7)
    x = jax.random.normal(ks[0], (n, cin, h, w), jnp.float32)
    params = {
        "w1": 0.2 * jax.random.normal(ks[1], (cout, cin, 3, 3), jnp.float32),
        "w2": 0.2 * jax.random.normal(ks[2], (cout, cout, 3, 3), jnp.float32),
        "wsc": 0.2 * jax.random.normal(ks[3], (cout, cin, 1, 1), jnp.float32),
        "bn1": bn_params(ks[4], cout),
        "bn2": bn_params(ks[5], cout),
        "bnsc": bn_params(ks[6], cout),
    }
    ref = reference_forward(x, params, stride)

    # f32 compute path: tight check of kernel math / flat-tap layout plumbing.
    fwd_f32 = jax.jit(functools.partial(residual_block18_forward, stride=stride,
                                        compute_dtype=jnp.float32))
    out_f32 = jax.block_until_ready(fwd_f32(x, params))
    assert out_f32.shape == (n, cout, h // stride, w // stride), out_f32.shape
    err = float(jnp.max(jnp.abs(out_f32 - ref)))
    assert jnp.allclose(out_f32, ref, rtol=1e-3, atol=1e-3), err

    # bf16 matmul path (f32 accumulation): looser tolerance.
    fwd_bf16 = jax.jit(functools.partial(residual_block18_forward, stride=stride,
                                         compute_dtype=jnp.bfloat16))
    out_bf16 = jax.block_until_ready(fwd_bf16(x, params))
    err = float(jnp.max(jnp.abs(out_bf16 - ref)))
    tol = 5e-2 * max(1.0, float(jnp.max(jnp.abs(ref))))
    assert err < tol, (err, tol)

    # --- Case 2: identity shortcut (stride=1, Cin == Cout) -------------------
    ks2 = jax.random.split(jax.random.PRNGKey(1), 5)
    n2, c2, h2, w2 = 2, 8, 16, 16
    x2 = jax.random.normal(ks2[0], (n2, c2, h2, w2), jnp.float32)
    params2 = {
        "w1": 0.2 * jax.random.normal(ks2[1], (c2, c2, 3, 3), jnp.float32),
        "w2": 0.2 * jax.random.normal(ks2[2], (c2, c2, 3, 3), jnp.float32),
        "bn1": bn_params(ks2[3], c2),
        "bn2": bn_params(ks2[4], c2),
    }
    ref2 = reference_forward(x2, params2, 1)

    fwd2_f32 = jax.jit(functools.partial(residual_block18_forward, stride=1,
                                         compute_dtype=jnp.float32))
    out2 = jax.block_until_ready(fwd2_f32(x2, params2))
    assert out2.shape == (n2, c2, h2, w2), out2.shape
    err2 = float(jnp.max(jnp.abs(out2 - ref2)))
    assert jnp.allclose(out2, ref2, rtol=1e-3, atol=1e-3), err2

    # identity path also in bf16 (exercises the bf16 residual stream)
    fwd2_bf16 = jax.jit(functools.partial(residual_block18_forward, stride=1,
                                          compute_dtype=jnp.bfloat16))
    out2_bf16 = jax.block_until_ready(fwd2_bf16(x2, params2))
    err2b = float(jnp.max(jnp.abs(out2_bf16 - ref2)))
    tol2 = 5e-2 * max(1.0, float(jnp.max(jnp.abs(ref2))))
    assert err2b < tol2, (err2b, tol2)

    print("KERNEL_OK")
</pallas_src>

<mosaic_0001>
module attributes {stable_mosaic.version = 11 : i64} {
  func.func @kernel(%arg0: i32, %arg1: memref<1x342x4xf32, #tpu.memory_space<vmem>>, %arg2: memref<9x4x128xf32, #tpu.memory_space<vmem>>, %arg3: memref<1x128xf32, #tpu.memory_space<vmem>>, %arg4: memref<1x288x128xf32, #tpu.memory_space<vmem>>) attributes {dimension_semantics = [#tpu.dimension_semantics<parallel>], iteration_bounds = array<i64: 2>, scalar_prefetch = 0 : i64, scratch_operands = 0 : i64, tpu.core_type = #tpu.core_type<tc>, window_params = [{transform_indices = @transform_0, window_bounds = array<i64: 1, 342, 4>}, {pipeline_mode = #tpu.pipeline_mode<synchronous>, transform_indices = @transform_1, window_bounds = array<i64: 9, 4, 128>}, {pipeline_mode = #tpu.pipeline_mode<synchronous>, transform_indices = @transform_2, window_bounds = array<i64: 1, 128>}, {transform_indices = @transform_3, window_bounds = array<i64: 1, 288, 128>}]} {
    %c0 = arith.constant 0 : index
    %c0_0 = arith.constant 0 : index
    %c0_1 = arith.constant 0 : index
    %0 = vector.load %arg1[%c0, %c0_0, %c0_1] : memref<1x342x4xf32, #tpu.memory_space<vmem>>, vector<1x288x4xf32>
    %1 = vector.shape_cast %0 : vector<1x288x4xf32> to vector<288x4xf32>
    %c0_2 = arith.constant 0 : index
    %c0_3 = arith.constant 0 : index
    %c0_4 = arith.constant 0 : index
    %2 = vector.load %arg2[%c0_2, %c0_3, %c0_4] : memref<9x4x128xf32, #tpu.memory_space<vmem>>, vector<1x4x128xf32>
    %3 = vector.shape_cast %2 : vector<1x4x128xf32> to vector<4x128xf32>
    %cst = arith.constant dense<0.000000e+00> : vector<288x128xf32>
    %4 = tpu.matmul %1, %3, %cst {dimension_numbers = #tpu.dot_dimension_numbers<[1], [0], [0], [1], [0, 0, 1, 1], [], []>} : vector<288x4xf32>, vector<4x128xf32>, vector<288x128xf32> -> vector<288x128xf32>
    %c0_5 = arith.constant 0 : index
    %c1 = arith.constant 1 : index
    %c0_6 = arith.constant 0 : index
    %5 = vector.load %arg1[%c0_5, %c1, %c0_6] : memref<1x342x4xf32, #tpu.memory_space<vmem>>, vector<1x288x4xf32>
    %6 = vector.shape_cast %5 : vector<1x288x4xf32> to vector<288x4xf32>
    %c1_7 = arith.constant 1 : index
    %c0_8 = arith.constant 0 : index
    %c0_9 = arith.constant 0 : index
    %7 = vector.load %arg2[%c1_7, %c0_8, %c0_9] : memref<9x4x128xf32, #tpu.memory_space<vmem>>, vector<1x4x128xf32>
    %8 = vector.shape_cast %7 : vector<1x4x128xf32> to vector<4x128xf32>
    %cst_10 = arith.constant dense<0.000000e+00> : vector<288x128xf32>
    %9 = tpu.matmul %6, %8, %cst_10 {dimension_numbers = #tpu.dot_dimension_numbers<[1], [0], [0], [1], [0, 0, 1, 1], [], []>} : vector<288x4xf32>, vector<4x128xf32>, vector<288x128xf32> -> vector<288x128xf32>
    %10 = arith.addf %4, %9 : vector<288x128xf32>
    %c0_11 = arith.constant 0 : index
    %c2 = arith.constant 2 : index
    %c0_12 = arith.constant 0 : index
    %11 = vector.load %arg1[%c0_11, %c2, %c0_12] : memref<1x342x4xf32, #tpu.memory_space<vmem>>, vector<1x288x4xf32>
    %12 = vector.shape_cast %11 : vector<1x288x4xf32> to vector<288x4xf32>
    %c2_13 = arith.constant 2 : index
    %c0_14 = arith.constant 0 : index
    %c0_15 = arith.constant 0 : index
    %13 = vector.load %arg2[%c2_13, %c0_14, %c0_15] : memref<9x4x128xf32, #tpu.memory_space<vmem>>, vector<1x4x128xf32>
    %14 = vector.shape_cast %13 : vector<1x4x128xf32> to vector<4x128xf32>
    %cst_16 = arith.constant dense<0.000000e+00> : vector<288x128xf32>
    %15 = tpu.matmul %12, %14, %cst_16 {dimension_numbers = #tpu.dot_dimension_numbers<[1], [0], [0], [1], [0, 0, 1, 1], [], []>} : vector<288x4xf32>, vector<4x128xf32>, vector<288x128xf32> -> vector<288x128xf32>
    %16 = arith.addf %10, %15 : vector<288x128xf32>
    %c0_17 = arith.constant 0 : index
    %c18 = arith.constant 18 : index
    %c0_18 = arith.constant 0 : index
    %17 = vector.load %arg1[%c0_17, %c18, %c0_18] : memref<1x342x4xf32, #tpu.memory_space<vmem>>, vector<1x288x4xf32>
    %18 = vector.shape_cast %17 : vector<1x288x4xf32> to vector<288x4xf32>
    %c3 = arith.constant 3 : index
    %c0_19 = arith.constant 0 : index
    %c0_20 = arith.constant 0 : index
    %19 = vector.load %arg2[%c3, %c0_19, %c0_20] : memref<9x4x128xf32, #tpu.memory_space<vmem>>, vector<1x4x128xf32>
    %20 = vector.shape_cast %19 : vector<1x4x128xf32> to vector<4x128xf32>
    %cst_21 = arith.constant dense<0.000000e+00> : vector<288x128xf32>
    %21 = tpu.matmul %18, %20, %cst_21 {dimension_numbers = #tpu.dot_dimension_numbers<[1], [0], [0], [1], [0, 0, 1, 1], [], []>} : vector<288x4xf32>, vector<4x128xf32>, vector<288x128xf32> -> vector<288x128xf32>
    %22 = arith.addf %16, %21 : vector<288x128xf32>
    %c0_22 = arith.constant 0 : index
    %c19 = arith.constant 19 : index
    %c0_23 = arith.constant 0 : index
    %23 = vector.load %arg1[%c0_22, %c19, %c0_23] : memref<1x342x4xf32, #tpu.memory_space<vmem>>, vector<1x288x4xf32>
    %24 = vector.shape_cast %23 : vector<1x288x4xf32> to vector<288x4xf32>
    %c4 = arith.constant 4 : index
    %c0_24 = arith.constant 0 : index
    %c0_25 = arith.constant 0 : index
    %25 = vector.load %arg2[%c4, %c0_24, %c0_25] : memref<9x4x128xf32, #tpu.memory_space<vmem>>, vector<1x4x128xf32>
    %26 = vector.shape_cast %25 : vector<1x4x128xf32> to vector<4x128xf32>
    %cst_26 = arith.constant dense<0.000000e+00> : vector<288x128xf32>
    %27 = tpu.matmul %24, %26, %cst_26 {dimension_numbers = #tpu.dot_dimension_numbers<[1], [0], [0], [1], [0, 0, 1, 1], [], []>} : vector<288x4xf32>, vector<4x128xf32>, vector<288x128xf32> -> vector<288x128xf32>
    %28 = arith.addf %22, %27 : vector<288x128xf32>
    %c0_27 = arith.constant 0 : index
    %c20 = arith.constant 20 : index
    %c0_28 = arith.constant 0 : index
    %29 = vector.load %arg1[%c0_27, %c20, %c0_28] : memref<1x342x4xf32, #tpu.memory_space<vmem>>, vector<1x288x4xf32>
    %30 = vector.shape_cast %29 : vector<1x288x4xf32> to vector<288x4xf32>
    %c5 = arith.constant 5 : index
    %c0_29 = arith.constant 0 : index
    %c0_30 = arith.constant 0 : index
    %31 = vector.load %arg2[%c5, %c0_29, %c0_30] : memref<9x4x128xf32, #tpu.memory_space<vmem>>, vector<1x4x128xf32>
    %32 = vector.shape_cast %31 : vector<1x4x128xf32> to vector<4x128xf32>
    %cst_31 = arith.constant dense<0.000000e+00> : vector<288x128xf32>
    %33 = tpu.matmul %30, %32, %cst_31 {dimension_numbers = #tpu.dot_dimension_numbers<[1], [0], [0], [1], [0, 0, 1, 1], [], []>} : vector<288x4xf32>, vector<4x128xf32>, vector<288x128xf32> -> vector<288x128xf32>
    %34 = arith.addf %28, %33 : vector<288x128xf32>
    %c0_32 = arith.constant 0 : index
    %c36 = arith.constant 36 : index
    %c0_33 = arith.constant 0 : index
    %35 = vector.load %arg1[%c0_32, %c36, %c0_33] : memref<1x342x4xf32, #tpu.memory_space<vmem>>, vector<1x288x4xf32>
    %36 = vector.shape_cast %35 : vector<1x288x4xf32> to vector<288x4xf32>
    %c6 = arith.constant 6 : index
    %c0_34 = arith.constant 0 : index
    %c0_35 = arith.constant 0 : index
    %37 = vector.load %arg2[%c6, %c0_34, %c0_35] : memref<9x4x128xf32, #tpu.memory_space<vmem>>, vector<1x4x128xf32>
    %38 = vector.shape_cast %37 : vector<1x4x128xf32> to vector<4x128xf32>
    %cst_36 = arith.constant dense<0.000000e+00> : vector<288x128xf32>
    %39 = tpu.matmul %36, %38, %cst_36 {dimension_numbers = #tpu.dot_dimension_numbers<[1], [0], [0], [1], [0, 0, 1, 1], [], []>} : vector<288x4xf32>, vector<4x128xf32>, vector<288x128xf32> -> vector<288x128xf32>
    %40 = arith.addf %34, %39 : vector<288x128xf32>
    %c0_37 = arith.constant 0 : index
    %c37 = arith.constant 37 : index
    %c0_38 = arith.constant 0 : index
    %41 = vector.load %arg1[%c0_37, %c37, %c0_38] : memref<1x342x4xf32, #tpu.memory_space<vmem>>, vector<1x288x4xf32>
    %42 = vector.shape_cast %41 : vector<1x288x4xf32> to vector<288x4xf32>
    %c7 = arith.constant 7 : index
    %c0_39 = arith.constant 0 : index
    %c0_40 = arith.constant 0 : index
    %43 = vector.load %arg2[%c7, %c0_39, %c0_40] : memref<9x4x128xf32, #tpu.memory_space<vmem>>, vector<1x4x128xf32>
    %44 = vector.shape_cast %43 : vector<1x4x128xf32> to vector<4x128xf32>
    %cst_41 = arith.constant dense<0.000000e+00> : vector<288x128xf32>
    %45 = tpu.matmul %42, %44, %cst_41 {dimension_numbers = #tpu.dot_dimension_numbers<[1], [0], [0], [1], [0, 0, 1, 1], [], []>} : vector<288x4xf32>, vector<4x128xf32>, vector<288x128xf32> -> vector<288x128xf32>
    %46 = arith.addf %40, %45 : vector<288x128xf32>
    %c0_42 = arith.constant 0 : index
    %c38 = arith.constant 38 : index
    %c0_43 = arith.constant 0 : index
    %47 = vector.load %arg1[%c0_42, %c38, %c0_43] : memref<1x342x4xf32, #tpu.memory_space<vmem>>, vector<1x288x4xf32>
    %48 = vector.shape_cast %47 : vector<1x288x4xf32> to vector<288x4xf32>
    %c8 = arith.constant 8 : index
    %c0_44 = arith.constant 0 : index
    %c0_45 = arith.constant 0 : index
    %49 = vector.load %arg2[%c8, %c0_44, %c0_45] : memref<9x4x128xf32, #tpu.memory_space<vmem>>, vector<1x4x128xf32>
    %50 = vector.shape_cast %49 : vector<1x4x128xf32> to vector<4x128xf32>
    %cst_46 = arith.constant dense<0.000000e+00> : vector<288x128xf32>
    %51 = tpu.matmul %48, %50, %cst_46 {dimension_numbers = #tpu.dot_dimension_numbers<[1], [0], [0], [1], [0, 0, 1, 1], [], []>} : vector<288x4xf32>, vector<4x128xf32>, vector<288x128xf32> -> vector<288x128xf32>
    %52 = arith.addf %46, %51 : vector<288x128xf32>
    %c0_47 = arith.constant 0 : index
    %c0_48 = arith.constant 0 : index
    %53 = vector.load %arg3[%c0_47, %c0_48] : memref<1x128xf32, #tpu.memory_space<vmem>>, vector<1x128xf32>
    %54 = vector.broadcast %53 : vector<1x128xf32> to vector<288x128xf32>
    %55 = arith.addf %52, %54 : vector<288x128xf32>
    %cst_49 = arith.constant 0.000000e+00 : f32
    %56 = vector.broadcast %cst_49 : f32 to vector<288x128xf32>
    %57 = arith.maximumf %55, %56 : vector<288x128xf32>
    %c0_50 = arith.constant 0 : index
    %c0_51 = arith.constant 0 : index
    %c0_52 = arith.constant 0 : index
    %58 = vector.load %arg4[%c0_50, %c0_51, %c0_52] : memref<1x288x128xf32, #tpu.memory_space<vmem>>, vector<1x288x128xf32>
    %59 = vector.shape_cast %58 : vector<1x288x128xf32> to vector<288x128xf32>
    %60 = vector.shape_cast %57 : vector<288x128xf32> to vector<1x288x128xf32>
    tpu.vector_store %arg4[%c0_50, %c0_51, %c0_52], %60 {strides = array<i32>} : memref<1x288x128xf32, #tpu.memory_space<vmem>>, vector<1x288x128xf32>,
    return
  }
  func.func @transform_0(%arg0: i32) -> (i32, i32, i32) {
    %c0_i32 = arith.constant 0 : i32
    %c0_i32_0 = arith.constant 0 : i32
    %c0_i32_1 = arith.constant 0 : i32
    return %arg0, %c0_i32, %c0_i32_0 : i32, i32, i32
  }
  func.func @transform_1(%arg0: i32) -> (i32, i32, i32) {
    %c0_i32 = arith.constant 0 : i32
    %c0_i32_0 = arith.constant 0 : i32
    %c0_i32_1 = arith.constant 0 : i32
    %c0_i32_2 = arith.constant 0 : i32
    return %c0_i32, %c0_i32_0, %c0_i32_1 : i32, i32, i32
  }
  func.func @transform_2(%arg0: i32) -> (i32, i32) {
    %c0_i32 = arith.constant 0 : i32
    %c0_i32_0 = arith.constant 0 : i32
    %c0_i32_1 = arith.constant 0 : i32
    return %c0_i32, %c0_i32_0 : i32, i32
  }
  func.func @transform_3(%arg0: i32) -> (i32, i32, i32) {
    %c0_i32 = arith.constant 0 : i32
    %c0_i32_0 = arith.constant 0 : i32
    %c0_i32_1 = arith.constant 0 : i32
    return %arg0, %c0_i32, %c0_i32_0 : i32, i32, i32
  }
}

module attributes {stable_mosaic.version = 11 : i64} {
  func.func @kernel(%arg0: i32, %arg1: memref<1x110x8xf32, #tpu.memory_space<vmem>>, %arg2: memref<9x8x128xf32, #tpu.memory_space<vmem>>, %arg3: memref<1x128xf32, #tpu.memory_space<vmem>>, %arg4: memref<1x80x4xf32, #tpu.memory_space<vmem>>, %arg5: memref<4x128xf32, #tpu.memory_space<vmem>>, %arg6: memref<1x80x128xf32, #tpu.memory_space<vmem>>) attributes {dimension_semantics = [#tpu.dimension_semantics<parallel>], iteration_bounds = array<i64: 2>, scalar_prefetch = 0 : i64, scratch_operands = 0 : i64, tpu.core_type = #tpu.core_type<tc>, window_params = [{transform_indices = @transform_0, window_bounds = array<i64: 1, 110, 8>}, {pipeline_mode = #tpu.pipeline_mode<synchronous>, transform_indices = @transform_1, window_bounds = array<i64: 9, 8, 128>}, {pipeline_mode = #tpu.pipeline_mode<synchronous>, transform_indices = @transform_2, window_bounds = array<i64: 1, 128>}, {transform_indices = @transform_3, window_bounds = array<i64: 1, 80, 4>}, {pipeline_mode = #tpu.pipeline_mode<synchronous>, transform_indices = @transform_4, window_bounds = array<i64: 4, 128>}, {transform_indices = @transform_5, window_bounds = array<i64: 1, 80, 128>}]} {
    %c0 = arith.constant 0 : index
    %c0_0 = arith.constant 0 : index
    %c0_1 = arith.constant 0 : index
    %0 = vector.load %arg1[%c0, %c0_0, %c0_1] : memref<1x110x8xf32, #tpu.memory_space<vmem>>, vector<1x80x8xf32>
    %1 = vector.shape_cast %0 : vector<1x80x8xf32> to vector<80x8xf32>
    %c0_2 = arith.constant 0 : index
    %c0_3 = arith.constant 0 : index
    %c0_4 = arith.constant 0 : index
    %2 = vector.load %arg2[%c0_2, %c0_3, %c0_4] : memref<9x8x128xf32, #tpu.memory_space<vmem>>, vector<1x8x128xf32>
    %3 = vector.shape_cast %2 : vector<1x8x128xf32> to vector<8x128xf32>
    %cst = arith.constant dense<0.000000e+00> : vector<80x128xf32>
    %4 = tpu.matmul %1, %3, %cst {dimension_numbers = #tpu.dot_dimension_numbers<[1], [0], [0], [1], [0, 0, 1, 1], [], []>} : vector<80x8xf32>, vector<8x128xf32>, vector<80x128xf32> -> vector<80x128xf32>
    %c0_5 = arith.constant 0 : index
    %c1 = arith.constant 1 : index
    %c0_6 = arith.constant 0 : index
    %5 = vector.load %arg1[%c0_5, %c1, %c0_6] : memref<1x110x8xf32, #tpu.memory_space<vmem>>, vector<1x80x8xf32>
    %6 = vector.shape_cast %5 : vector<1x80x8xf32> to vector<80x8xf32>
    %c1_7 = arith.constant 1 : index
    %c0_8 = arith.constant 0 : index
    %c0_9 = arith.constant 0 : index
    %7 = vector.load %arg2[%c1_7, %c0_8, %c0_9] : memref<9x8x128xf32, #tpu.memory_space<vmem>>, vector<1x8x128xf32>
    %8 = vector.shape_cast %7 : vector<1x8x128xf32> to vector<8x128xf32>
    %cst_10 = arith.constant dense<0.000000e+00> : vector<80x128xf32>
    %9 = tpu.matmul %6, %8, %cst_10 {dimension_numbers = #tpu.dot_dimension_numbers<[1], [0], [0], [1], [0, 0, 1, 1], [], []>} : vector<80x8xf32>, vector<8x128xf32>, vector<80x128xf32> -> vector<80x128xf32>
    %10 = arith.addf %4, %9 : vector<80x128xf32>
    %c0_11 = arith.constant 0 : index
    %c2 = arith.constant 2 : index
    %c0_12 = arith.constant 0 : index
    %11 = vector.load %arg1[%c0_11, %c2, %c0_12] : memref<1x110x8xf32, #tpu.memory_space<vmem>>, vector<1x80x8xf32>
    %12 = vector.shape_cast %11 : vector<1x80x8xf32> to vector<80x8xf32>
    %c2_13 = arith.constant 2 : index
    %c0_14 = arith.constant 0 : index
    %c0_15 = arith.constant 0 : index
    %13 = vector.load %arg2[%c2_13, %c0_14, %c0_15] : memref<9x8x128xf32, #tpu.memory_space<vmem>>, vector<1x8x128xf32>
    %14 = vector.shape_cast %13 : vector<1x8x128xf32> to vector<8x128xf32>
    %cst_16 = arith.constant dense<0.000000e+00> : vector<80x128xf32>
    %15 = tpu.matmul %12, %14, %cst_16 {dimension_numbers = #tpu.dot_dimension_numbers<[1], [0], [0], [1], [0, 0, 1, 1], [], []>} : vector<80x8xf32>, vector<8x128xf32>, vector<80x128xf32> -> vector<80x128xf32>
    %16 = arith.addf %10, %15 : vector<80x128xf32>
    %c0_17 = arith.constant 0 : index
    %c10 = arith.constant 10 : index
    %c0_18 = arith.constant 0 : index
    %17 = vector.load %arg1[%c0_17, %c10, %c0_18] : memref<1x110x8xf32, #tpu.memory_space<vmem>>, vector<1x80x8xf32>
    %18 = vector.shape_cast %17 : vector<1x80x8xf32> to vector<80x8xf32>
    %c3 = arith.constant 3 : index
    %c0_19 = arith.constant 0 : index
    %c0_20 = arith.constant 0 : index
    %19 = vector.load %arg2[%c3, %c0_19, %c0_20] : memref<9x8x128xf32, #tpu.memory_space<vmem>>, vector<1x8x128xf32>
    %20 = vector.shape_cast %19 : vector<1x8x128xf32> to vector<8x128xf32>
    %cst_21 = arith.constant dense<0.000000e+00> : vector<80x128xf32>
    %21 = tpu.matmul %18, %20, %cst_21 {dimension_numbers = #tpu.dot_dimension_numbers<[1], [0], [0], [1], [0, 0, 1, 1], [], []>} : vector<80x8xf32>, vector<8x128xf32>, vector<80x128xf32> -> vector<80x128xf32>
    %22 = arith.addf %16, %21 : vector<80x128xf32>
    %c0_22 = arith.constant 0 : index
    %c11 = arith.constant 11 : index
    %c0_23 = arith.constant 0 : index
    %23 = vector.load %arg1[%c0_22, %c11, %c0_23] : memref<1x110x8xf32, #tpu.memory_space<vmem>>, vector<1x80x8xf32>
    %24 = vector.shape_cast %23 : vector<1x80x8xf32> to vector<80x8xf32>
    %c4 = arith.constant 4 : index
    %c0_24 = arith.constant 0 : index
    %c0_25 = arith.constant 0 : index
    %25 = vector.load %arg2[%c4, %c0_24, %c0_25] : memref<9x8x128xf32, #tpu.memory_space<vmem>>, vector<1x8x128xf32>
    %26 = vector.shape_cast %25 : vector<1x8x128xf32> to vector<8x128xf32>
    %cst_26 = arith.constant dense<0.000000e+00> : vector<80x128xf32>
    %27 = tpu.matmul %24, %26, %cst_26 {dimension_numbers = #tpu.dot_dimension_numbers<[1], [0], [0], [1], [0, 0, 1, 1], [], []>} : vector<80x8xf32>, vector<8x128xf32>, vector<80x128xf32> -> vector<80x128xf32>
    %28 = arith.addf %22, %27 : vector<80x128xf32>
    %c0_27 = arith.constant 0 : index
    %c12 = arith.constant 12 : index
    %c0_28 = arith.constant 0 : index
    %29 = vector.load %arg1[%c0_27, %c12, %c0_28] : memref<1x110x8xf32, #tpu.memory_space<vmem>>, vector<1x80x8xf32>
    %30 = vector.shape_cast %29 : vector<1x80x8xf32> to vector<80x8xf32>
    %c5 = arith.constant 5 : index
    %c0_29 = arith.constant 0 : index
    %c0_30 = arith.constant 0 : index
    %31 = vector.load %arg2[%c5, %c0_29, %c0_30] : memref<9x8x128xf32, #tpu.memory_space<vmem>>, vector<1x8x128xf32>
    %32 = vector.shape_cast %31 : vector<1x8x128xf32> to vector<8x128xf32>
    %cst_31 = arith.constant dense<0.000000e+00> : vector<80x128xf32>
    %33 = tpu.matmul %30, %32, %cst_31 {dimension_numbers = #tpu.dot_dimension_numbers<[1], [0], [0], [1], [0, 0, 1, 1], [], []>} : vector<80x8xf32>, vector<8x128xf32>, vector<80x128xf32> -> vector<80x128xf32>
    %34 = arith.addf %28, %33 : vector<80x128xf32>
    %c0_32 = arith.constant 0 : index
    %c20 = arith.constant 20 : index
    %c0_33 = arith.constant 0 : index
    %35 = vector.load %arg1[%c0_32, %c20, %c0_33] : memref<1x110x8xf32, #tpu.memory_space<vmem>>, vector<1x80x8xf32>
    %36 = vector.shape_cast %35 : vector<1x80x8xf32> to vector<80x8xf32>
    %c6 = arith.constant 6 : index
    %c0_34 = arith.constant 0 : index
    %c0_35 = arith.constant 0 : index
    %37 = vector.load %arg2[%c6, %c0_34, %c0_35] : memref<9x8x128xf32, #tpu.memory_space<vmem>>, vector<1x8x128xf32>
    %38 = vector.shape_cast %37 : vector<1x8x128xf32> to vector<8x128xf32>
    %cst_36 = arith.constant dense<0.000000e+00> : vector<80x128xf32>
    %39 = tpu.matmul %36, %38, %cst_36 {dimension_numbers = #tpu.dot_dimension_numbers<[1], [0], [0], [1], [0, 0, 1, 1], [], []>} : vector<80x8xf32>, vector<8x128xf32>, vector<80x128xf32> -> vector<80x128xf32>
    %40 = arith.addf %34, %39 : vector<80x128xf32>
    %c0_37 = arith.constant 0 : index
    %c21 = arith.constant 21 : index
    %c0_38 = arith.constant 0 : index
    %41 = vector.load %arg1[%c0_37, %c21, %c0_38] : memref<1x110x8xf32, #tpu.memory_space<vmem>>, vector<1x80x8xf32>
    %42 = vector.shape_cast %41 : vector<1x80x8xf32> to vector<80x8xf32>
    %c7 = arith.constant 7 : index
    %c0_39 = arith.constant 0 : index
    %c0_40 = arith.constant 0 : index
    %43 = vector.load %arg2[%c7, %c0_39, %c0_40] : memref<9x8x128xf32, #tpu.memory_space<vmem>>, vector<1x8x128xf32>
    %44 = vector.shape_cast %43 : vector<1x8x128xf32> to vector<8x128xf32>
    %cst_41 = arith.constant dense<0.000000e+00> : vector<80x128xf32>
    %45 = tpu.matmul %42, %44, %cst_41 {dimension_numbers = #tpu.dot_dimension_numbers<[1], [0], [0], [1], [0, 0, 1, 1], [], []>} : vector<80x8xf32>, vector<8x128xf32>, vector<80x128xf32> -> vector<80x128xf32>
    %46 = arith.addf %40, %45 : vector<80x128xf32>
    %c0_42 = arith.constant 0 : index
    %c22 = arith.constant 22 : index
    %c0_43 = arith.constant 0 : index
    %47 = vector.load %arg1[%c0_42, %c22, %c0_43] : memref<1x110x8xf32, #tpu.memory_space<vmem>>, vector<1x80x8xf32>
    %48 = vector.shape_cast %47 : vector<1x80x8xf32> to vector<80x8xf32>
    %c8 = arith.constant 8 : index
    %c0_44 = arith.constant 0 : index
    %c0_45 = arith.constant 0 : index
    %49 = vector.load %arg2[%c8, %c0_44, %c0_45] : memref<9x8x128xf32, #tpu.memory_space<vmem>>, vector<1x8x128xf32>
    %50 = vector.shape_cast %49 : vector<1x8x128xf32> to vector<8x128xf32>
    %cst_46 = arith.constant dense<0.000000e+00> : vector<80x128xf32>
    %51 = tpu.matmul %48, %50, %cst_46 {dimension_numbers = #tpu.dot_dimension_numbers<[1], [0], [0], [1], [0, 0, 1, 1], [], []>} : vector<80x8xf32>, vector<8x128xf32>, vector<80x128xf32> -> vector<80x128xf32>
    %52 = arith.addf %46, %51 : vector<80x128xf32>
    %c0_47 = arith.constant 0 : index
    %c0_48 = arith.constant 0 : index
    %c0_49 = arith.constant 0 : index
    %53 = vector.load %arg4[%c0_47, %c0_48, %c0_49] : memref<1x80x4xf32, #tpu.memory_space<vmem>>, vector<1x80x4xf32>
    %54 = vector.shape_cast %53 : vector<1x80x4xf32> to vector<80x4xf32>
    %c0_50 = arith.constant 0 : index
    %c0_51 = arith.constant 0 : index
    %55 = vector.load %arg5[%c0_50, %c0_51] : memref<4x128xf32, #tpu.memory_space<vmem>>, vector<4x128xf32>
    %cst_52 = arith.constant dense<0.000000e+00> : vector<80x128xf32>
    %56 = tpu.matmul %54, %55, %cst_52 {dimension_numbers = #tpu.dot_dimension_numbers<[1], [0], [0], [1], [0, 0, 1, 1], [], []>} : vector<80x4xf32>, vector<4x128xf32>, vector<80x128xf32> -> vector<80x128xf32>
    %57 = arith.addf %52, %56 : vector<80x128xf32>
    %c0_53 = arith.constant 0 : index
    %c0_54 = arith.constant 0 : index
    %58 = vector.load %arg3[%c0_53, %c0_54] : memref<1x128xf32, #tpu.memory_space<vmem>>, vector<1x128xf32>
    %59 = vector.broadcast %58 : vector<1x128xf32> to vector<80x128xf32>
    %60 = arith.addf %57, %59 : vector<80x128xf32>
    %cst_55 = arith.constant 0.000000e+00 : f32
    %61 = vector.broadcast %cst_55 : f32 to vector<80x128xf32>
    %62 = arith.maximumf %60, %61 : vector<80x128xf32>
    %c0_56 = arith.constant 0 : index
    %c0_57 = arith.constant 0 : index
    %c0_58 = arith.constant 0 : index
    %63 = vector.load %arg6[%c0_56, %c0_57, %c0_58] : memref<1x80x128xf32, #tpu.memory_space<vmem>>, vector<1x80x128xf32>
    %64 = vector.shape_cast %63 : vector<1x80x128xf32> to vector<80x128xf32>
    %65 = vector.shape_cast %62 : vector<80x128xf32> to vector<1x80x128xf32>
    tpu.vector_store %arg6[%c0_56, %c0_57, %c0_58], %65 {strides = array<i32>} : memref<1x80x128xf32, #tpu.memory_space<vmem>>, vector<1x80x128xf32>,
    return
  }
  func.func @transform_0(%arg0: i32) -> (i32, i32, i32) {
    %c0_i32 = arith.constant 0 : i32
    %c0_i32_0 = arith.constant 0 : i32
    %c0_i32_1 = arith.constant 0 : i32
    return %arg0, %c0_i32, %c0_i32_0 : i32, i32, i32
  }
  func.func @transform_1(%arg0: i32) -> (i32, i32, i32) {
    %c0_i32 = arith.constant 0 : i32
    %c0_i32_0 = arith.constant 0 : i32
    %c0_i32_1 = arith.constant 0 : i32
    %c0_i32_2 = arith.constant 0 : i32
    return %c0_i32, %c0_i32_0, %c0_i32_1 : i32, i32, i32
  }
  func.func @transform_2(%arg0: i32) -> (i32, i32) {
    %c0_i32 = arith.constant 0 : i32
    %c0_i32_0 = arith.constant 0 : i32
    %c0_i32_1 = arith.constant 0 : i32
    return %c0_i32, %c0_i32_0 : i32, i32
  }
  func.func @transform_3(%arg0: i32) -> (i32, i32, i32) {
    %c0_i32 = arith.constant 0 : i32
    %c0_i32_0 = arith.constant 0 : i32
    %c0_i32_1 = arith.constant 0 : i32
    return %arg0, %c0_i32, %c0_i32_0 : i32, i32, i32
  }
  func.func @transform_4(%arg0: i32) -> (i32, i32) {
    %c0_i32 = arith.constant 0 : i32
    %c0_i32_0 = arith.constant 0 : i32
    %c0_i32_1 = arith.constant 0 : i32
    return %c0_i32, %c0_i32_0 : i32, i32
  }
  func.func @transform_5(%arg0: i32) -> (i32, i32, i32) {
    %c0_i32 = arith.constant 0 : i32
    %c0_i32_0 = arith.constant 0 : i32
    %c0_i32_1 = arith.constant 0 : i32
    return %arg0, %c0_i32, %c0_i32_0 : i32, i32, i32
  }
}

</mosaic_0001>

<bundles_post_ra>
// kernel: residual_block18_forward.3
= control target key start
LH: loop header
LB: loop body
LE: loop exit
PB: predicated region body
PF: predicated region fallthrough
CT: control target
= control target key end

     0   :  { %s1490_s18 = smov 0   ;;  %s1860_s0 = inlined_call_operand.vmem [shape: f32[2,110,8], index: 0, kind: input, shape index: {}]   ;;  %s1861_s1 = inlined_call_operand.vmem [shape: f32[9,8,128], index: 1, kind: input, shape index: {}]   ;;  %s1862_s2 = inlined_call_operand.vmem [shape: f32[1,128], index: 2, kind: input, shape index: {}]   ;;  %s1863_s3 = inlined_call_operand.vmem [shape: f32[2,80,4], index: 3, kind: input, shape index: {}]   ;;  %s1864_s4 = inlined_call_operand.vmem [shape: f32[4,128], index: 4, kind: input, shape index: {}]   ;;  %s1865_s5 = inlined_call_operand.vmem [shape: f32[2,80,128], index: 5, kind: output, shape index: {}]  }
   0x1 LB: > { %s1320_s19 = sadd.s32 4294967295, %s1458_s18   ;;  %p1324_p0 = scmp.ge.s32.totalorder %s1458_s18, 1  ;;  %s1458_s18 = sphi %s1490_s18, %s15_s18  }
   0x2   : > { %p197_p1 = scmp.lt.s32.totalorder %s1458_s18, 3 }
   0x4   : > { %p198_p2 = pnand %p1324_p0, %p197_p1 }
   0x5   : > { %p230_p3 = scmp.lt.s32.totalorder (!%p198_p2), %s1320_s19, 1 }
   0x6   : > { %201 = sbr.rel (%p198_p2) target bundleno = 353 (0x161), region = 40 }
   0xb   : > { %v1328_v0 = vld [vmem:[%s1861_s1 + $0x8] sm:$0xff]  ;;  %v255_v1 = vld [vmem:[%s1861_s1] sm:$0xff]  ;;  %v1349_v2 = vld [vmem:[%s1861_s1 + $0x10] sm:$0xff]  ;;  %s1867_s19 = smov (!%p230_p3, %s1320_s19), 1  ;;  %vm268_vm0 = vcmask 64512   ;;  %vm1158_vm1 = vcmask 1043456  }
   0xc   : > { %1439 = vmatpush.msra.mxu2 %v1328_v0  ;;  %1440 = vmatpush.msra.mxu3 %v255_v1  ;;  %v1360_v3 = vld [vmem:[%s1861_s1 + $0x18] sm:$0xff]  ;;  %v1371_v4 = vld [vmem:[%s1861_s1 + $0x20] sm:$0xff]  ;;  %v1382_v5 = vld [vmem:[%s1861_s1 + $0x28] sm:$0xff]  ;;  %s1441_s7 = smul.u32 112, %s1867_s19  ;;  %vm1127_vm2 = vcmask 31744  }
   0xd   : > { %314 = vmatpush.msra.mxu0 %v1328_v0  ;;  %391 = vmatpush.msra.mxu1 %v255_v1  ;;  %v1393_v14 = vld [vmem:[%s1861_s1 + $0x30] sm:$0xff]  ;;  %v1404_v15 = vld [vmem:[%s1861_s1 + $0x38] sm:$0xff]  ;;  %v1415_v20 = vld [vmem:[%s1861_s1 + $0x40] sm:$0xff]  ;;  %s1442_s21 = smul.u32 80, %s1867_s19 }
   0xe   : > { %480 = vmatpush.msrb.mxu2 %v1349_v2  ;;  %579 = vmatpush.msrb.mxu3 %v1360_v3  ;;  %s1522_s10 = scalar_lea.vmem %s1860_s0, %s1441_s7  ;;  %v1126_v21 = vld [vmem:[%s1864_s4] sm:$0xf] }
   0xf   : > { %678 = vmatpush.msrb.mxu0 %v1371_v4  ;;  %777 = vmatpush.msrb.mxu1 %v1382_v5  ;;  %v261_v6 = vld [vmem:[%s1522_s10 + $0x29] sm:$0xff]  ;;  %v256_v8 = vld [vmem:[%s1522_s10 + $0x1] sm:$0xff]  ;;  %v262_v10 = vld [vmem:[%s1522_s10 + $0x31] sm:$0xff]  ;;  %s1680_s24 = scalar_lea.vmem %s1863_s3, %s1442_s21  ;;  %s1828_s29 = scalar_lea.vmem %s1865_s5, %s1442_s21 }
  0x10   : > { %v250_v7 = vld [vmem:[%s1522_s10 + $0x28] sm:$0xff]  ;;  %1334 = vmatmul.msk.f32.vlgmr.msra.gmra.mxu2 %vm268_vm0, %v261_v6  ;;  %v245_v9 = vld [vmem:[%s1522_s10] sm:$0xff]  ;;  %1329 = vmatmul.msk.f32.vlgmr.msra.gmra.mxu0 %vm268_vm0, %v256_v8  ;;  %v251_v11 = vld [vmem:[%s1522_s10 + $0x30] sm:$0xff] }
  0x11   : > { %1344 = vmatmul.msk.f32.vlgmr.msra.gmra.mxu3 %vm268_vm0, %v250_v7  ;;  %1339 = vmatmul.msk.f32.vlgmr.msra.gmra.mxu1 %vm268_vm0, %v245_v9  ;;  %v257_v12 = vld [vmem:[%s1522_s10 + $0x9] sm:$0xff]  ;;  %v263_v16 = vld [vmem:[%s1522_s10 + $0x39] sm:$0xff]  ;;  %v258_v18 = vld [vmem:[%s1522_s10 + $0x11] sm:$0xff] }
  0x12   : > { %v246_v13 = vld [vmem:[%s1522_s10 + $0x8] sm:$0xff]  ;;  %876 = vmatpush.msra.mxu2 %v1393_v14  ;;  %975 = vmatpush.msra.mxu3 %v1404_v15  ;;  %v252_v17 = vld [vmem:[%s1522_s10 + $0x38] sm:$0xff]  ;;  %v247_v19 = vld [vmem:[%s1522_s10 + $0x10] sm:$0xff] }
  0x13   : > { %1074 = vmatpush.msra.mxu0 %v1415_v20  ;;  %1426 = vmatpush.msk.msra.mxu1 %vm1158_vm1, %v1126_v21  ;;  %v264_v22 = vld [vmem:[%s1522_s10 + $0x41] sm:$0xff]  ;;  %v259_v24 = vld [vmem:[%s1522_s10 + $0x19] sm:$0xff]  ;;  %v265_v26 = vld [vmem:[%s1522_s10 + $0x49] sm:$0xff] }
  0x14   : > { %v253_v23 = vld [vmem:[%s1522_s10 + $0x40] sm:$0xff]  ;;  %v248_v25 = vld [vmem:[%s1522_s10 + $0x18] sm:$0xff]  ;;  %v254_v27 = vld [vmem:[%s1522_s10 + $0x48] sm:$0xff] }
  0x15   : > { %v260_v28 = vld [vmem:[%s1522_s10 + $0x21] sm:$0xff]  ;;  %v522_v31 = vld [vmem:[%s1522_s10 + $0xa] sm:$0xff]  ;;  %v523_v34 = vld [vmem:[%s1522_s10 + $0x12] sm:$0xff] }
  0x16   : > { %v249_v29 = vld [vmem:[%s1522_s10 + $0x20] sm:$0xff]  ;;  %v621_v32 = vld [vmem:[%s1522_s10 + $0xb] sm:$0xff]  ;;  %v622_v35 = vld [vmem:[%s1522_s10 + $0x13] sm:$0xff] }
  0x17   : > { %v423_v30 = vld [vmem:[%s1522_s10 + $0x2] sm:$0xff]  ;;  %v720_v33 = vld [vmem:[%s1522_s10 + $0xc] sm:$0xff]  ;;  %v1587_v36 = vld [vmem:[%s1522_s10 + $0x14] sm:$0xff] }
  0x18   : > { %1335 = vmatmul.msk.f32.gmra.mxu2 %vm268_vm0, %v262_v10  ;;  %1330 = vmatmul.msk.f32.gmra.mxu0 %vm268_vm0, %v257_v12  ;;  %v524_v37 = vld [vmem:[%s1522_s10 + $0x1a] sm:$0xff]  ;;  %v525_v40 = vld [vmem:[%s1522_s10 + $0x22] sm:$0xff]  ;;  %v526_v43 = vld [vmem:[%s1522_s10 + $0x2a] sm:$0xff] }
  0x19   : > { %1345 = vmatmul.msk.f32.gmra.mxu3 %vm268_vm0, %v251_v11  ;;  %1340 = vmatmul.msk.f32.gmra.mxu1 %vm268_vm0, %v246_v13  ;;  %v623_v38 = vld [vmem:[%s1522_s10 + $0x1b] sm:$0xff]  ;;  %v624_v41 = vld [vmem:[%s1522_s10 + $0x23] sm:$0xff]  ;;  %v625_v44 = vld [vmem:[%s1522_s10 + $0x2b] sm:$0xff] }
  0x1a   : > { %v1597_v39 = vld [vmem:[%s1522_s10 + $0x1c] sm:$0xff]  ;;  %v1607_v42 = vld [vmem:[%s1522_s10 + $0x24] sm:$0xff]  ;;  %v1617_v45 = vld [vmem:[%s1522_s10 + $0x2c] sm:$0xff] }
  0x1b   : > { %v527_v46 = vld [vmem:[%s1522_s10 + $0x32] sm:$0xff]  ;;  %v528_v49 = vld [vmem:[%s1522_s10 + $0x3a] sm:$0xff]  ;;  %v529_v52 = vld [vmem:[%s1522_s10 + $0x42] sm:$0xff] }
  0x1c   : > { %v626_v47 = vld [vmem:[%s1522_s10 + $0x33] sm:$0xff]  ;;  %v627_v50 = vld [vmem:[%s1522_s10 + $0x3b] sm:$0xff]  ;;  %v628_v53 = vld [vmem:[%s1522_s10 + $0x43] sm:$0xff] }
  0x1d   : > { %v1627_v48 = vld [vmem:[%s1522_s10 + $0x34] sm:$0xff]  ;;  %v1637_v51 = vld [vmem:[%s1522_s10 + $0x3c] sm:$0xff]  ;;  %v1647_v54 = vld [vmem:[%s1522_s10 + $0x44] sm:$0xff] }
  0x1e   : > { %v530_v55 = vld [vmem:[%s1522_s10 + $0x4a] sm:$0xff]  ;;  %v531_v58 = vld [vmem:[%s1522_s10 + $0x52] sm:$0xff]  ;;  %v1116_v63 = vld [vmem:[%s1680_s24] sm:$0xff] }
  0x1f   : > { %v629_v56 = vld [vmem:[%s1522_s10 + $0x4b] sm:$0xff]  ;;  %v630_v59 = vld [vmem:[%s1522_s10 + $0x53] sm:$0xff]  ;;  %v919_v0 = vld [vmem:[%s1522_s10 + $0x1d] sm:$0xff] }
  0x20   : > { %1336 = vmatmul.msk.f32.gmra.mxu2 %vm268_vm0, %v263_v16  ;;  %1331 = vmatmul.msk.f32.gmra.mxu0 %vm268_vm0, %v258_v18  ;;  %v1657_v57 = vld [vmem:[%s1522_s10 + $0x4c] sm:$0xff]  ;;  %v1667_v60 = vld [vmem:[%s1522_s10 + $0x54] sm:$0xff]  ;;  %v1018_v3 = vld [vmem:[%s1522_s10 + $0x1e] sm:$0xff] }
  0x21   : > { %1346 = vmatmul.msk.f32.gmra.mxu3 %vm268_vm0, %v252_v17  ;;  %1341 = vmatmul.msk.f32.gmra.mxu1 %vm268_vm0, %v247_v19  ;;  %v918_v61 = vld [vmem:[%s1522_s10 + $0x15] sm:$0xff]  ;;  %v1117_v4 = vld [vmem:[%s1680_s24 + $0x8] sm:$0xff] }
  0x22   : > { %v1017_v62 = vld [vmem:[%s1522_s10 + $0x16] sm:$0xff]  ;;  %v920_v8 = vld [vmem:[%s1522_s10 + $0x25] sm:$0xff]  ;;  %v921_v17 = vld [vmem:[%s1522_s10 + $0x2d] sm:$0xff] }
  0x23   : > { %v1019_v11 = vld [vmem:[%s1522_s10 + $0x26] sm:$0xff]  ;;  %v1118_v12 = vld [vmem:[%s1680_s24 + $0x10] sm:$0xff]  ;;  %v1119_v21 = vld [vmem:[%s1680_s24 + $0x18] sm:$0xff] }
  0x24   : > { %v1020_v20 = vld [vmem:[%s1522_s10 + $0x2e] sm:$0xff] }
  0x28   : > { %1337 = vmatmul.msk.f32.gmra.mxu2 %vm268_vm0, %v264_v22  ;;  %1332 = vmatmul.msk.f32.gmra.mxu0 %vm268_vm0, %v259_v24 }
  0x29   : > { %1347 = vmatmul.msk.f32.gmra.mxu3 %vm268_vm0, %v253_v23  ;;  %1342 = vmatmul.msk.f32.gmra.mxu1 %vm268_vm0, %v248_v25 }
  0x30   : > { %1338 = vmatmul.msk.f32.gmra.mxu2 %vm268_vm0, %v265_v26  ;;  %1333 = vmatmul.msk.f32.gmra.mxu0 %vm268_vm0, %v260_v28  ;;  %v922_v26 = vld [vmem:[%s1522_s10 + $0x35] sm:$0xff] }
  0x31   : > { %1348 = vmatmul.msk.f32.gmra.mxu3 %vm268_vm0, %v254_v27  ;;  %1343 = vmatmul.msk.f32.gmra.mxu1 %vm268_vm0, %v249_v29  ;;  %v1021_v29 = vld [vmem:[%s1522_s10 + $0x36] sm:$0xff] }
  0x38   : > { %1350 = vmatmul.msk.f32.vlgmr.msrb.gmra.mxu2 %vm268_vm0, %v423_v30  ;;  %1372 = vmatmul.msk.f32.vlgmr.msrb.gmra.mxu0 %vm268_vm0, %v621_v32  ;;  %v1120_v30 = vld [vmem:[%s1680_s24 + $0x20] sm:$0xff] }
  0x39   : > { %1361 = vmatmul.msk.f32.vlgmr.msrb.gmra.mxu3 %vm268_vm0, %v522_v31  ;;  %1383 = vmatmul.msk.f32.vlgmr.msrb.gmra.mxu1 %vm268_vm0, %v720_v33 }
  0x40   : > { %1351 = vmatmul.msk.f32.gmra.mxu2 %vm268_vm0, %v522_v31  ;;  %1373 = vmatmul.msk.f32.gmra.mxu0 %vm268_vm0, %v622_v35  ;;  %v923_v35 = vld [vmem:[%s1522_s10 + $0x3d] sm:$0xff] }
  0x41   : > { %1362 = vmatmul.msk.f32.gmra.mxu3 %vm268_vm0, %v523_v34  ;;  %1384 = vmatmul.msk.f32.gmra.mxu1 %vm268_vm0, %v1587_v36 }
  0x48   : > { %1352 = vmatmul.msk.f32.gmra.mxu2 %vm268_vm0, %v523_v34  ;;  %1374 = vmatmul.msk.f32.gmra.mxu0 %vm268_vm0, %v623_v38  ;;  %v1022_v38 = vld [vmem:[%s1522_s10 + $0x3e] sm:$0xff] }
  0x49   : > { %1363 = vmatmul.msk.f32.gmra.mxu3 %vm268_vm0, %v524_v37  ;;  %1385 = vmatmul.msk.f32.gmra.mxu1 %vm268_vm0, %v1597_v39 }
  0x50   : > { %1353 = vmatmul.msk.f32.gmra.mxu2 %vm268_vm0, %v524_v37  ;;  %1375 = vmatmul.msk.f32.gmra.mxu0 %vm268_vm0, %v624_v41 }
  0x51   : > { %1364 = vmatmul.msk.f32.gmra.mxu3 %vm268_vm0, %v525_v40  ;;  %1386 = vmatmul.msk.f32.gmra.mxu1 %vm268_vm0, %v1607_v42 }
  0x58   : > { %1354 = vmatmul.msk.f32.gmra.mxu2 %vm268_vm0, %v525_v40  ;;  %1376 = vmatmul.msk.f32.gmra.mxu0 %vm268_vm0, %v625_v44  ;;  %v924_v44 = vld [vmem:[%s1522_s10 + $0x45] sm:$0xff] }
  0x59   : > { %1365 = vmatmul.msk.f32.gmra.mxu3 %vm268_vm0, %v526_v43  ;;  %1387 = vmatmul.msk.f32.gmra.mxu1 %vm268_vm0, %v1617_v45 }
  0x60   : > { %1355 = vmatmul.msk.f32.gmra.mxu2 %vm268_vm0, %v526_v43  ;;  %1377 = vmatmul.msk.f32.gmra.mxu0 %vm268_vm0, %v626_v47  ;;  %v1023_v47 = vld [vmem:[%s1522_s10 + $0x46] sm:$0xff] }
  0x61   : > { %1366 = vmatmul.msk.f32.gmra.mxu3 %vm268_vm0, %v527_v46  ;;  %1388 = vmatmul.msk.f32.gmra.mxu1 %vm268_vm0, %v1627_v48 }
  0x68   : > { %1356 = vmatmul.msk.f32.gmra.mxu2 %vm268_vm0, %v527_v46  ;;  %1378 = vmatmul.msk.f32.gmra.mxu0 %vm268_vm0, %v627_v50 }
  0x69   : > { %1367 = vmatmul.msk.f32.gmra.mxu3 %vm268_vm0, %v528_v49  ;;  %1389 = vmatmul.msk.f32.gmra.mxu1 %vm268_vm0, %v1637_v51 }
  0x70   : > { %1357 = vmatmul.msk.f32.gmra.mxu2 %vm268_vm0, %v528_v49  ;;  %1379 = vmatmul.msk.f32.gmra.mxu0 %vm268_vm0, %v628_v53  ;;  %v925_v53 = vld [vmem:[%s1522_s10 + $0x4d] sm:$0xff] }
  0x71   : > { %1368 = vmatmul.msk.f32.gmra.mxu3 %vm268_vm0, %v529_v52  ;;  %1390 = vmatmul.msk.f32.gmra.mxu1 %vm268_vm0, %v1647_v54 }
  0x78   : > { %1358 = vmatmul.msk.f32.gmra.mxu2 %vm268_vm0, %v529_v52  ;;  %1380 = vmatmul.msk.f32.gmra.mxu0 %vm268_vm0, %v629_v56 }
  0x79   : > { %1369 = vmatmul.msk.f32.gmra.mxu3 %vm268_vm0, %v530_v55  ;;  %1391 = vmatmul.msk.f32.gmra.mxu1 %vm268_vm0, %v1657_v57 }
  0x80   : > { %1359 = vmatmul.msk.f32.gmra.mxu2 %vm268_vm0, %v530_v55  ;;  %1381 = vmatmul.msk.f32.gmra.mxu0 %vm268_vm0, %v630_v59  ;;  %v1024_v59 = vld [vmem:[%s1522_s10 + $0x4e] sm:$0xff] }
  0x81   : > { %1370 = vmatmul.msk.f32.gmra.mxu3 %vm268_vm0, %v531_v58  ;;  %1392 = vmatmul.msk.f32.gmra.mxu1 %vm268_vm0, %v1667_v60 }
  0x88   : > { %1394 = vmatmul.msk.f32.vlgmr.msra.gmra.mxu2 %vm268_vm0, %v1587_v36  ;;  %1416 = vmatmul.msk.f32.vlgmr.msra.gmra.mxu0 %vm268_vm0, %v1017_v62 }
  0x89   : > { %1405 = vmatmul.msk.f32.vlgmr.msra.gmra.mxu3 %vm268_vm0, %v918_v61  ;;  %1427 = vmatmul.msk.f32.vlgmr.msra.gmra.mxu1 %vm1127_vm2, %v1116_v63 }
  0x8d   : > { %v1691_v1 = vpop.f32.mrf.mxu0 }
  0x8e   : > { %v1693_v2 = vpop.f32.mrf.mxu1 }
  0x8f   : > { %v394_v49 = vadd.f32 %v1693_v2, %v1691_v1  ;;  %v926_v2 = vld [vmem:[%s1522_s10 + $0x55] sm:$0xff] }
  0x90   : > { %1395 = vmatmul.msk.f32.gmra.mxu2 %vm268_vm0, %v1597_v39  ;;  %1417 = vmatmul.msk.f32.gmra.mxu0 %vm268_vm0, %v1018_v3  ;;  %v1121_v39 = vld [vmem:[%s1680_s24 + $0x28] sm:$0xff] }
  0x91   : > { %1406 = vmatmul.msk.f32.gmra.mxu3 %vm268_vm0, %v919_v0  ;;  %1428 = vmatmul.msk.f32.gmra.mxu1 %vm1127_vm2, %v1117_v4 }
  0x93   : > { %v331_v5 = vpop.f32.mrf.mxu2 }
  0x94   : > { %v408_v6 = vpop.f32.mrf.mxu3 }
  0x95   : > { %v1702_v7 = vadd.f32 %v408_v6, %v331_v5  ;;  %v319_v9 = vpop.f32.mrf.mxu0  ;;  %v1025_v6 = vld [vmem:[%s1522_s10 + $0x56] sm:$0xff] }
  0x96   : > { %v396_v10 = vpop.f32.mrf.mxu1 }
  0x97   : > { %v1707_v13 = vadd.f32 %v396_v10, %v319_v9 }
  0x98   : > { %1396 = vmatmul.msk.f32.gmra.mxu2 %vm268_vm0, %v1607_v42  ;;  %1418 = vmatmul.msk.f32.gmra.mxu0 %vm268_vm0, %v1019_v11 }
  0x99   : > { %1407 = vmatmul.msk.f32.gmra.mxu3 %vm268_vm0, %v920_v8  ;;  %1429 = vmatmul.msk.f32.gmra.mxu1 %vm1127_vm2, %v1118_v12 }
  0x9b   : > { %v334_v14 = vpop.f32.mrf.mxu2 }
  0x9c   : > { %v411_v15 = vpop.f32.mrf.mxu3 }
  0x9d   : > { %v1714_v16 = vadd.f32 %v411_v15, %v334_v14  ;;  %v322_v18 = vpop.f32.mrf.mxu0  ;;  %v927_v14 = vld [vmem:[%s1522_s10 + $0x5d] sm:$0xff] }
  0x9e   : > { %v399_v19 = vpop.f32.mrf.mxu1 }
  0x9f   : > { %v1719_v22 = vadd.f32 %v399_v19, %v322_v18  ;;  %v1026_v19 = vld [vmem:[%s1522_s10 + $0x5e] sm:$0xff] }
  0xa0   : > { %1397 = vmatmul.msk.f32.gmra.mxu2 %vm268_vm0, %v1617_v45  ;;  %1419 = vmatmul.msk.f32.gmra.mxu0 %vm268_vm0, %v1020_v20  ;;  %v1125_v20 = vld [vmem:[%s1680_s24 + $0x48] sm:$0xff] }
  0xa1   : > { %1408 = vmatmul.msk.f32.gmra.mxu3 %vm268_vm0, %v921_v17  ;;  %1430 = vmatmul.msk.f32.gmra.mxu1 %vm1127_vm2, %v1119_v21 }
  0xa3   : > { %v337_v23 = vpop.f32.mrf.mxu2 }
  0xa4   : > { %v414_v24 = vpop.f32.mrf.mxu3 }
  0xa5   : > { %v1726_v25 = vadd.f32 %v414_v24, %v337_v23  ;;  %v325_v27 = vpop.f32.mrf.mxu0 }
  0xa6   : > { %v402_v28 = vpop.f32.mrf.mxu1 }
  0xa7   : > { %v1731_v31 = vadd.f32 %v402_v28, %v325_v27 }
  0xa8   : > { %1398 = vmatmul.msk.f32.gmra.mxu2 %vm268_vm0, %v1627_v48  ;;  %1420 = vmatmul.msk.f32.gmra.mxu0 %vm268_vm0, %v1021_v29  ;;  %v1122_v48 = vld [vmem:[%s1680_s24 + $0x30] sm:$0xff] }
  0xa9   : > { %1409 = vmatmul.msk.f32.gmra.mxu3 %vm268_vm0, %v922_v26  ;;  %1431 = vmatmul.msk.f32.gmra.mxu1 %vm1127_vm2, %v1120_v30 }
  0xab   : > { %v340_v32 = vpop.f32.mrf.mxu2 }
  0xac   : > { %v417_v33 = vpop.f32.mrf.mxu3 }
  0xad   : > { %v1738_v34 = vadd.f32 %v417_v33, %v340_v32  ;;  %v328_v36 = vpop.f32.mrf.mxu0 }
  0xae   : > { %v405_v37 = vpop.f32.mrf.mxu1 }
  0xaf   : > { %v1743_v40 = vadd.f32 %v405_v37, %v328_v36 }
  0xb0   : > { %1399 = vmatmul.msk.f32.gmra.mxu2 %vm268_vm0, %v1637_v51  ;;  %1421 = vmatmul.msk.f32.gmra.mxu0 %vm268_vm0, %v1022_v38 }
  0xb1   : > { %1410 = vmatmul.msk.f32.gmra.mxu3 %vm268_vm0, %v923_v35  ;;  %1432 = vmatmul.msk.f32.gmra.mxu1 %vm1127_vm2, %v1121_v39 }
  0xb3   : > { %v343_v41 = vpop.f32.mrf.mxu2 }
  0xb4   : > { %v420_v42 = vpop.f32.mrf.mxu3 }
  0xb5   : > { %v1750_v43 = vadd.f32 %v420_v42, %v343_v41  ;;  %v680_v45 = vpop.f32.mrf.mxu0 }
  0xb6   : > { %v779_v46 = vpop.f32.mrf.mxu1 }
  0xb8   : > { %1400 = vmatmul.msk.f32.gmra.mxu2 %vm268_vm0, %v1647_v54  ;;  %1422 = vmatmul.msk.f32.gmra.mxu0 %vm268_vm0, %v1023_v47  ;;  %v1123_v54 = vld [vmem:[%s1680_s24 + $0x38] sm:$0xff] }
  0xb9   : > { %1411 = vmatmul.msk.f32.gmra.mxu3 %vm268_vm0, %v924_v44  ;;  %1433 = vmatmul.msk.f32.gmra.mxu1 %vm1127_vm2, %v1122_v48 }
  0xbb   : > { %v482_v50 = vpop.f32.mrf.mxu2 }
  0xbc   : > { %v581_v51 = vpop.f32.mrf.mxu3  ;;  %v512_v52 = vadd.f32 %v482_v50, %v394_v49 }
  0xbd   : > { %v683_v56 = vpop.f32.mrf.mxu0 }
  0xbe   : > { %v611_v55 = vadd.f32 %v581_v51, %v512_v52  ;;  %v782_v58 = vpop.f32.mrf.mxu1 }
  0xc0   : > { %v710_v61 = vadd.f32 %v680_v45, %v611_v55  ;;  %1401 = vmatmul.msk.f32.gmra.mxu2 %vm268_vm0, %v1657_v57  ;;  %1423 = vmatmul.msk.f32.gmra.mxu0 %vm268_vm0, %v1024_v59  ;;  %v1124_v57 = vld [vmem:[%s1680_s24 + $0x40] sm:$0xff] }
  0xc1   : > { %1412 = vmatmul.msk.f32.gmra.mxu3 %vm268_vm0, %v925_v53  ;;  %1434 = vmatmul.msk.f32.gmra.mxu1 %vm1127_vm2, %v1123_v54 }
  0xc2   : > { %v1770_v62 = vadd.f32 %v779_v46, %v710_v61 }
  0xc3   : > { %v485_v63 = vpop.f32.mrf.mxu2 }
  0xc4   : > { %v584_v0 = vpop.f32.mrf.mxu3  ;;  %v513_v1 = vadd.f32 %v485_v63, %v1707_v13  ;;  %v828_v13 = vld [vmem:[%s1522_s10 + $0x5c] sm:$0xff] }
  0xc5   : > { %v686_v4 = vpop.f32.mrf.mxu0 }
  0xc6   : > { %v612_v3 = vadd.f32 %v584_v0, %v513_v1  ;;  %v785_v5 = vpop.f32.mrf.mxu1 }
  0xc8   : > { %v711_v8 = vadd.f32 %v683_v56, %v612_v3  ;;  %1402 = vmatmul.msk.f32.gmra.mxu2 %vm268_vm0, %v1667_v60  ;;  %1424 = vmatmul.msk.f32.gmra.mxu0 %vm268_vm0, %v1025_v6 }
  0xc9   : > { %1413 = vmatmul.msk.f32.gmra.mxu3 %vm268_vm0, %v926_v2  ;;  %1435 = vmatmul.msk.f32.gmra.mxu1 %vm1127_vm2, %v1124_v57 }
  0xca   : > { %v1781_v9 = vadd.f32 %v782_v58, %v711_v8 }
  0xcb   : > { %v488_v10 = vpop.f32.mrf.mxu2 }
  0xcc   : > { %v587_v11 = vpop.f32.mrf.mxu3  ;;  %v514_v12 = vadd.f32 %v488_v10, %v1719_v22 }
  0xcd   : > { %v689_v17 = vpop.f32.mrf.mxu0 }
  0xce   : > { %v613_v15 = vadd.f32 %v587_v11, %v514_v12  ;;  %v788_v18 = vpop.f32.mrf.mxu1 }
  0xd0   : > { %v712_v60 = vadd.f32 %v686_v4, %v613_v15  ;;  %1403 = vmatmul.msk.f32.gmra.mxu2 %vm268_vm0, %v828_v13  ;;  %1425 = vmatmul.msk.f32.gmra.mxu0 %vm268_vm0, %v1026_v19 }
  0xd1   : > { %1414 = vmatmul.msk.f32.gmra.mxu3 %vm268_vm0, %v927_v14  ;;  %1436 = vmatmul.msk.f32.gmra.mxu1 %vm1127_vm2, %v1125_v20 }
  0xd2   : > { %v1792_v21 = vadd.f32 %v785_v5, %v712_v60 }
  0xd3   : > { %v491_v23 = vpop.f32.mrf.mxu2 }
  0xd4   : > { %v590_v22 = vpop.f32.mrf.mxu3  ;;  %v515_v24 = vadd.f32 %v491_v23, %v1731_v31 }
  0xd5   : > { %v692_v27 = vpop.f32.mrf.mxu0 }
  0xd6   : > { %v614_v26 = vadd.f32 %v590_v22, %v515_v24  ;;  %v791_v28 = vpop.f32.mrf.mxu1 }
  0xd8   : > { %v713_v29 = vadd.f32 %v689_v17, %v614_v26  ;;  %v1819_v26 = vld [vmem:[%s1862_s2] ss:$0 sm:$0xff] }
  0xda   : > { %v1795_v30 = vadd.f32 %v788_v18, %v713_v29 }
  0xdb   : > { %v494_v32 = vpop.f32.mrf.mxu2 }
  0xdc   : > { %v593_v33 = vpop.f32.mrf.mxu3  ;;  %v516_v35 = vadd.f32 %v494_v32, %v1743_v40 }
  0xdd   : > { %v695_v37 = vpop.f32.mrf.mxu0 }
  0xde   : > { %v615_v36 = vadd.f32 %v593_v33, %v516_v35  ;;  %v794_v38 = vpop.f32.mrf.mxu1 }
  0xe0   : > { %v714_v39 = vadd.f32 %v692_v27, %v615_v36 }
  0xe2   : > { %v1798_v41 = vadd.f32 %v791_v28, %v714_v39 }
  0xe3   : > { %v497_v42 = vpop.f32.mrf.mxu2 }
  0xe4   : > { %v596_v44 = vpop.f32.mrf.mxu3  ;;  %v517_v31 = vadd.f32 %v497_v42, %v1702_v7 }
  0xe5   : > { %v698_v46 = vpop.f32.mrf.mxu0 }
  0xe6   : > { %v616_v45 = vadd.f32 %v596_v44, %v517_v31  ;;  %v797_v47 = vpop.f32.mrf.mxu1 }
  0xe8   : > { %v715_v48 = vadd.f32 %v695_v37, %v616_v45 }
  0xea   : > { %v1801_v49 = vadd.f32 %v794_v38, %v715_v48 }
  0xeb   : > { %v500_v50 = vpop.f32.mrf.mxu2 }
  0xec   : > { %v599_v51 = vpop.f32.mrf.mxu3  ;;  %v518_v40 = vadd.f32 %v500_v50, %v1714_v16 }
  0xed   : > { %v701_v53 = vpop.f32.mrf.mxu0 }
  0xee   : > { %v617_v52 = vadd.f32 %v599_v51, %v518_v40  ;;  %v800_v55 = vpop.f32.mrf.mxu1 }
  0xf0   : > { %v716_v56 = vadd.f32 %v698_v46, %v617_v52 }
  0xf2   : > { %v1804_v58 = vadd.f32 %v797_v47, %v716_v56 }
  0xf3   : > { %v503_v59 = vpop.f32.mrf.mxu2 }
  0xf4   : > { %v602_v54 = vpop.f32.mrf.mxu3  ;;  %v519_v7 = vadd.f32 %v503_v59, %v1726_v25 }
  0xf5   : > { %v704_v63 = vpop.f32.mrf.mxu0 }
  0xf6   : > { %v618_v61 = vadd.f32 %v602_v54, %v519_v7  ;;  %v803_v0 = vpop.f32.mrf.mxu1 }
  0xf8   : > { %v717_v1 = vadd.f32 %v701_v53, %v618_v61 }
  0xfa   : > { %v1807_v2 = vadd.f32 %v800_v55, %v717_v1 }
  0xfb   : > { %v506_v3 = vpop.f32.mrf.mxu2 }
  0xfc   : > { %v605_v4 = vpop.f32.mrf.mxu3  ;;  %v520_v16 = vadd.f32 %v506_v3, %v1738_v34 }
  0xfd   : > { %v707_v6 = vpop.f32.mrf.mxu0 }
  0xfe   : > { %v619_v5 = vadd.f32 %v605_v4, %v520_v16  ;;  %v806_v57 = vpop.f32.mrf.mxu1 }
 0x100   : > { %v718_v8 = vadd.f32 %v704_v63, %v619_v5 }
 0x102   : > { %v1810_v10 = vadd.f32 %v803_v0, %v718_v8 }
 0x103   : > { %v509_v11 = vpop.f32.mrf.mxu2 }
 0x104   : > { %v608_v12 = vpop.f32.mrf.mxu3  ;;  %v521_v25 = vadd.f32 %v509_v11, %v1750_v43 }
 0x105   : > { %v1076_v14 = vpop.f32.mrf.mxu0 }
 0x106   : > { %v620_v13 = vadd.f32 %v608_v12, %v521_v25  ;;  %v1179_v15 = vpop.f32.mrf.mxu1 }
 0x108   : > { %v719_v17 = vadd.f32 %v707_v6, %v620_v13 }
 0x10a   : > { %v1813_v18 = vadd.f32 %v806_v57, %v719_v17 }
 0x10b   : > { %v878_v19 = vpop.f32.mrf.mxu2 }
 0x10c   : > { %v977_v20 = vpop.f32.mrf.mxu3  ;;  %v908_v34 = vadd.f32 %v878_v19, %v1770_v62 }
 0x10d   : > { %v1079_v23 = vpop.f32.mrf.mxu0 }
 0x10e   : > { %v1007_v60 = vadd.f32 %v977_v20, %v908_v34  ;;  %v1182_v22 = vpop.f32.mrf.mxu1 }
 0x110   : > { %v1106_v24 = vadd.f32 %v1076_v14, %v1007_v60 }
 0x112   : > { %v1209_v43 = vadd.f32 %v1179_v15, %v1106_v24 }
 0x113   : > { %v881_v27 = vpop.f32.mrf.mxu2 }
 0x114   : > { %v980_v28 = vpop.f32.mrf.mxu3  ;;  %v1223_v29 = vadd.f32 %v1819_v26, %v1209_v43  ;;  %v909_v32 = vadd.f32 %v881_v27, %v1781_v9 }
 0x115   : > { %v1082_v35 = vpop.f32.mrf.mxu0 }
 0x116   : > { %v1233_v62 = vmax.f32 %v1223_v29, 0.0  ;;  %v1008_v33 = vadd.f32 %v980_v28, %v909_v32  ;;  %v1185_v36 = vpop.f32.mrf.mxu1 }
 0x118   : > { %1243 = vst [vmem:[%s1828_s29] sm:$0xff] %v1233_v62  ;;  %v1107_v37 = vadd.f32 %v1079_v23, %v1008_v33 }
 0x11a   : > { %v1210_v38 = vadd.f32 %v1182_v22, %v1107_v37 }
 0x11b   : > { %v884_v39 = vpop.f32.mrf.mxu2 }
 0x11c   : > { %v983_v42 = vpop.f32.mrf.mxu3  ;;  %v1224_v44 = vadd.f32 %v1819_v26, %v1210_v38  ;;  %v910_v9 = vadd.f32 %v884_v39, %v1792_v21 }
 0x11d   : > { %v1085_v46 = vpop.f32.mrf.mxu0 }
 0x11e   : > { %v1234_v31 = vmax.f32 %v1224_v44, 0.0  ;;  %v1009_v45 = vadd.f32 %v983_v42, %v910_v9  ;;  %v1188_v47 = vpop.f32.mrf.mxu1 }
 0x120   : > { %1244 = vst [vmem:[%s1828_s29 + $0x8] sm:$0xff] %v1234_v31  ;;  %v1108_v48 = vadd.f32 %v1082_v35, %v1009_v45 }
 0x122   : > { %v1211_v50 = vadd.f32 %v1185_v36, %v1108_v48 }
 0x123   : > { %v887_v51 = vpop.f32.mrf.mxu2 }
 0x124   : > { %v986_v40 = vpop.f32.mrf.mxu3  ;;  %v1225_v52 = vadd.f32 %v1819_v26, %v1211_v50  ;;  %v911_v53 = vadd.f32 %v887_v51, %v1795_v30 }
 0x125   : > { %v1088_v59 = vpop.f32.mrf.mxu0 }
 0x126   : > { %v1235_v55 = vmax.f32 %v1225_v52, 0.0  ;;  %v1010_v56 = vadd.f32 %v986_v40, %v911_v53  ;;  %v1191_v54 = vpop.f32.mrf.mxu1 }
 0x128   : > { %1245 = vst [vmem:[%s1828_s29 + $0x10] sm:$0xff] %v1235_v55  ;;  %v1109_v21 = vadd.f32 %v1085_v46, %v1010_v56 }
 0x12a   : > { %v1212_v7 = vadd.f32 %v1188_v47, %v1109_v21 }
 0x12b   : > { %v890_v61 = vpop.f32.mrf.mxu2 }
 0x12c   : > { %v989_v63 = vpop.f32.mrf.mxu3  ;;  %v1226_v0 = vadd.f32 %v1819_v26, %v1212_v7  ;;  %v912_v1 = vadd.f32 %v890_v61, %v1798_v41 }
 0x12d   : > { %v1091_v16 = vpop.f32.mrf.mxu0 }
 0x12e   : > { %v1236_v3 = vmax.f32 %v1226_v0, 0.0  ;;  %v1011_v4 = vadd.f32 %v989_v63, %v912_v1  ;;  %v1194_v5 = vpop.f32.mrf.mxu1 }
 0x130   : > { %1246 = vst [vmem:[%s1828_s29 + $0x18] sm:$0xff] %v1236_v3  ;;  %v1110_v30 = vadd.f32 %v1088_v59, %v1011_v4 }
 0x132   : > { %v1213_v6 = vadd.f32 %v1191_v54, %v1110_v30 }
 0x133   : > { %v893_v57 = vpop.f32.mrf.mxu2 }
 0x134   : > { %v992_v8 = vpop.f32.mrf.mxu3  ;;  %v1227_v11 = vadd.f32 %v1819_v26, %v1213_v6  ;;  %v913_v12 = vadd.f32 %v893_v57, %v1801_v49 }
 0x135   : > { %v1094_v14 = vpop.f32.mrf.mxu0 }
 0x136   : > { %v1237_v25 = vmax.f32 %v1227_v11, 0.0  ;;  %v1012_v13 = vadd.f32 %v992_v8, %v913_v12  ;;  %v1197_v41 = vpop.f32.mrf.mxu1 }
 0x138   : > { %1247 = vst [vmem:[%s1828_s29 + $0x20] sm:$0xff] %v1237_v25  ;;  %v1111_v15 = vadd.f32 %v1091_v16, %v1012_v13 }
 0x13a   : > { %v1214_v17 = vadd.f32 %v1194_v5, %v1111_v15 }
 0x13b   : > { %v896_v19 = vpop.f32.mrf.mxu2 }
 0x13c   : > { %v995_v20 = vpop.f32.mrf.mxu3  ;;  %v1228_v34 = vadd.f32 %v1819_v26, %v1214_v17  ;;  %v914_v60 = vadd.f32 %v896_v19, %v1804_v58 }
 0x13d   : > { %v1097_v43 = vpop.f32.mrf.mxu0 }
 0x13e   : > { %v1238_v23 = vmax.f32 %v1228_v34, 0.0  ;;  %v1013_v22 = vadd.f32 %v995_v20, %v914_v60  ;;  %v1200_v27 = vpop.f32.mrf.mxu1 }
 0x140   : > { %1248 = vst [vmem:[%s1828_s29 + $0x28] sm:$0xff] %v1238_v23  ;;  %v1112_v24 = vadd.f32 %v1094_v14, %v1013_v22 }
 0x142   : > { %v1215_v49 = vadd.f32 %v1197_v41, %v1112_v24 }
 0x143   : > { %v899_v28 = vpop.f32.mrf.mxu2 }
 0x144   : > { %v998_v29 = vpop.f32.mrf.mxu3  ;;  %v1229_v32 = vadd.f32 %v1819_v26, %v1215_v49  ;;  %v915_v62 = vadd.f32 %v899_v28, %v1807_v2 }
 0x145   : > { %v1100_v58 = vpop.f32.mrf.mxu0 }
 0x146   : > { %v1239_v33 = vmax.f32 %v1229_v32, 0.0  ;;  %v1014_v35 = vadd.f32 %v998_v29, %v915_v62  ;;  %v1203_v9 = vpop.f32.mrf.mxu1 }
 0x148   : > { %1249 = vst [vmem:[%s1828_s29 + $0x30] sm:$0xff] %v1239_v33  ;;  %v1113_v36 = vadd.f32 %v1097_v43, %v1014_v35 }
 0x14a   : > { %v1216_v37 = vadd.f32 %v1200_v27, %v1113_v36 }
 0x14b   : > { %v902_v38 = vpop.f32.mrf.mxu2 }
 0x14c   : > { %v1001_v39 = vpop.f32.mrf.mxu3  ;;  %v1230_v42 = vadd.f32 %v1819_v26, %v1216_v37  ;;  %v916_v44 = vadd.f32 %v902_v38, %v1810_v10 }
 0x14d   : > { %v1103_v40 = vpop.f32.mrf.mxu0 }
 0x14e   : > { %v1240_v31 = vmax.f32 %v1230_v42, 0.0  ;;  %v1015_v45 = vadd.f32 %v1001_v39, %v916_v44  ;;  %v1206_v55 = vpop.f32.mrf.mxu1 }
 0x150   : > { %1250 = vst [vmem:[%s1828_s29 + $0x38] sm:$0xff] %v1240_v31  ;;  %v1114_v46 = vadd.f32 %v1100_v58, %v1015_v45 }
 0x152   : > { %v1217_v2 = vadd.f32 %v1203_v9, %v1114_v46 }
 0x153   : > { %v905_v47 = vpop.f32.mrf.mxu2 }
 0x154   : > { %v1004_v48 = vpop.f32.mrf.mxu3  ;;  %v1231_v50 = vadd.f32 %v1819_v26, %v1217_v2  ;;  %v917_v51 = vadd.f32 %v905_v47, %v1813_v18 }
 0x156   : > { %v1241_v52 = vmax.f32 %v1231_v50, 0.0  ;;  %v1016_v53 = vadd.f32 %v1004_v48, %v917_v51 }
 0x158   : > { %1251 = vst [vmem:[%s1828_s29 + $0x40] sm:$0xff] %v1241_v52  ;;  %v1115_v56 = vadd.f32 %v1103_v40, %v1016_v53 }
 0x15a   : > { %v1218_v10 = vadd.f32 %v1206_v55, %v1115_v56 }
 0x15c   : > { %v1232_v59 = vadd.f32 %v1819_v26, %v1218_v10 }
 0x15e   : > { %v1242_v54 = vmax.f32 %v1232_v59, 0.0 }
 0x160   : > { %1252 = vst [vmem:[%s1828_s29 + $0x48] sm:$0xff] %v1242_v54 }
 0x161 PF: > { %s15_s18 = sadd.s32 1, %s1458_s18  }
 0x162   : > { %p12_p4 = scmp.ge.s32.totalorder %s15_s18, 4  }
 0x164   :  { %14 = sbr.rel (!%p12_p4) target bundleno = 1 (0x1), region = 81 }

// kernel: residual_block18_forward.2
= control target key start
LH: loop header
LB: loop body
LE: loop exit
PB: predicated region body
PF: predicated region fallthrough
CT: control target
= control target key end

     0   :  { %s3450_s12 = smov 0   ;;  %s4389_s0 = inlined_call_operand.vmem [shape: f32[2,342,4], index: 0, kind: input, shape index: {}]   ;;  %s4390_s1 = inlined_call_operand.vmem [shape: f32[9,4,128], index: 1, kind: input, shape index: {}]   ;;  %s4391_s2 = inlined_call_operand.vmem [shape: f32[1,128], index: 2, kind: input, shape index: {}]   ;;  %s4392_s3 = inlined_call_operand.vmem [shape: f32[2,288,128], index: 3, kind: output, shape index: {}]  }
   0x1 LB: > { %s3057_s13 = sadd.s32 4294967295, %s3428_s12   ;;  %p3061_p0 = scmp.ge.s32.totalorder %s3428_s12, 1  ;;  %s3428_s12 = sphi %s3450_s12, %s13_s12  }
   0x2   : > { %p137_p1 = scmp.lt.s32.totalorder %s3428_s12, 3 }
   0x4   : > { %p138_p2 = pnand %p3061_p0, %p137_p1 }
   0x5   : > { %p161_p3 = scmp.lt.s32.totalorder (!%p138_p2), %s3057_s13, 1 }
   0x6   : > { %141 = sbr.rel (%p138_p2) target bundleno = 800 (0x320), region = 32 }
   0xb   : > { %v3064_v0 = vld [vmem:[%s4390_s1 + $0x4] sm:$0xf]  ;;  %vm355_vm0 = vcmask 1043456   ;;  %v3139_v1 = vld [vmem:[%s4390_s1 + $0x8] sm:$0xf]  ;;  %s4394_s13 = smov (!%p161_p3, %s3057_s13), 1 }
   0xc   : > { %3407 = vmatpush.msk.msra.mxu1 %vm355_vm0, %v3064_v0  ;;  %3408 = vmatpush.msk.msra.mxu2 %vm355_vm0, %v3064_v0  ;;  %v3177_v2 = vld [vmem:[%s4390_s1 + $0xc] sm:$0xf]  ;;  %v207_v3 = vld [vmem:[%s4390_s1] sm:$0xf]  ;;  %v3215_v4 = vld [vmem:[%s4390_s1 + $0x10] sm:$0xf] }
   0xd   : > { %3409 = vmatpush.msk.msra.mxu3 %vm355_vm0, %v3064_v0  ;;  %s3410_s24 = smul.u32 344, %s4394_s13  ;;  %3065 = vmatpush.msk.msra.mxu0 %vm355_vm0, %v3064_v0  ;;  %vm246_vm1 = vcmask 31744   ;;  %v3291_v29 = vld [vmem:[%s4390_s1 + $0x18] sm:$0xf]  ;;  %v3329_v30 = vld [vmem:[%s4390_s1 + $0x1c] sm:$0xf] }
   0xe   : > { %3140 = vmatpush.msk.msrb.mxu2 %vm355_vm0, %v3139_v1  ;;  %3102 = vmatpush.msk.msrb.mxu1 %vm355_vm0, %v207_v3  ;;  %v3253_v31 = vld [vmem:[%s4390_s1 + $0x14] sm:$0xf]  ;;  %v3367_v36 = vld [vmem:[%s4390_s1 + $0x20] sm:$0xf]  ;;  %s3411_s11 = smul.u32 288, %s4394_s13 }
   0xf   : > { %3178 = vmatpush.msk.msrb.mxu3 %vm355_vm0, %v3177_v2  ;;  %3216 = vmatpush.msk.msrb.mxu0 %vm355_vm0, %v3215_v4  ;;  %s3487_s27 = scalar_lea.vmem %s4389_s0, %s3410_s24 }
  0x10   : > { %v217_v5 = vld [vmem:[%s3487_s27 + $0x49] sm:$0xff]  ;;  %v226_v6 = vld [vmem:[%s3487_s27 + $0x91] sm:$0xff]  ;;  %v235_v7 = vld [vmem:[%s3487_s27 + $0xd9] sm:$0xff]  ;;  %s4151_s16 = scalar_lea.vmem %s4392_s3, %s3411_s11 }
  0x11   : > { %3075 = vmatmul.msk.f32.vlgmr.msra.gmra.mxu1 %vm246_vm1, %v217_v5  ;;  %3084 = vmatmul.msk.f32.vlgmr.msra.gmra.mxu2 %vm246_vm1, %v226_v6  ;;  %v208_v8 = vld [vmem:[%s3487_s27 + $0x1] sm:$0xff]  ;;  %v218_v9 = vld [vmem:[%s3487_s27 + $0x51] sm:$0xff]  ;;  %v227_v10 = vld [vmem:[%s3487_s27 + $0x99] sm:$0xff] }
  0x12   : > { %3093 = vmatmul.msk.f32.vlgmr.msra.gmra.mxu3 %vm246_vm1, %v235_v7  ;;  %3066 = vmatmul.msk.f32.vlgmr.msra.gmra.mxu0 %vm246_vm1, %v208_v8  ;;  %v236_v11 = vld [vmem:[%s3487_s27 + $0xe1] sm:$0xff]  ;;  %v209_v12 = vld [vmem:[%s3487_s27 + $0x9] sm:$0xff]  ;;  %v219_v13 = vld [vmem:[%s3487_s27 + $0x59] sm:$0xff] }
  0x13   : > { %v228_v14 = vld [vmem:[%s3487_s27 + $0xa1] sm:$0xff]  ;;  %v237_v15 = vld [vmem:[%s3487_s27 + $0xe9] sm:$0xff]  ;;  %v210_v16 = vld [vmem:[%s3487_s27 + $0x11] sm:$0xff]  ;;  %3292 = vmatpush.msk.msra.mxu2 %vm355_vm0, %v3291_v29  ;;  %3330 = vmatpush.msk.msra.mxu3 %vm355_vm0, %v3329_v30 }
  0x14   : > { %v220_v17 = vld [vmem:[%s3487_s27 + $0x61] sm:$0xff]  ;;  %v229_v18 = vld [vmem:[%s3487_s27 + $0xa9] sm:$0xff]  ;;  %v238_v19 = vld [vmem:[%s3487_s27 + $0xf1] sm:$0xff]  ;;  %3254 = vmatpush.msk.msra.mxu1 %vm355_vm0, %v3253_v31  ;;  %3368 = vmatpush.msk.msra.mxu0 %vm355_vm0, %v3367_v36 }
  0x15   : > { %v211_v20 = vld [vmem:[%s3487_s27 + $0x19] sm:$0xff]  ;;  %v221_v21 = vld [vmem:[%s3487_s27 + $0x69] sm:$0xff]  ;;  %v230_v22 = vld [vmem:[%s3487_s27 + $0xb1] sm:$0xff] }
  0x16   : > { %v239_v23 = vld [vmem:[%s3487_s27 + $0xf9] sm:$0xff]  ;;  %v212_v24 = vld [vmem:[%s3487_s27 + $0x21] sm:$0xff]  ;;  %v222_v25 = vld [vmem:[%s3487_s27 + $0x71] sm:$0xff] }
  0x17   : > { %v231_v26 = vld [vmem:[%s3487_s27 + $0xb9] sm:$0xff]  ;;  %v240_v27 = vld [vmem:[%s3487_s27 + $0x101] sm:$0xff]  ;;  %v213_v28 = vld [vmem:[%s3487_s27 + $0x29] sm:$0xff] }
  0x18   : > { %v223_v32 = vld [vmem:[%s3487_s27 + $0x79] sm:$0xff]  ;;  %v232_v33 = vld [vmem:[%s3487_s27 + $0xc1] sm:$0xff]  ;;  %v241_v34 = vld [vmem:[%s3487_s27 + $0x109] sm:$0xff] }
  0x19   : > { %3076 = vmatmul.msk.f32.gmra.mxu1 %vm246_vm1, %v218_v9  ;;  %3085 = vmatmul.msk.f32.gmra.mxu2 %vm246_vm1, %v227_v10  ;;  %v214_v35 = vld [vmem:[%s3487_s27 + $0x31] sm:$0xff]  ;;  %v224_v37 = vld [vmem:[%s3487_s27 + $0x81] sm:$0xff]  ;;  %v233_v38 = vld [vmem:[%s3487_s27 + $0xc9] sm:$0xff] }
  0x1a   : > { %3094 = vmatmul.msk.f32.gmra.mxu3 %vm246_vm1, %v236_v11  ;;  %3067 = vmatmul.msk.f32.gmra.mxu0 %vm246_vm1, %v209_v12  ;;  %v242_v39 = vld [vmem:[%s3487_s27 + $0x111] sm:$0xff]  ;;  %v215_v40 = vld [vmem:[%s3487_s27 + $0x39] sm:$0xff]  ;;  %v225_v41 = vld [vmem:[%s3487_s27 + $0x89] sm:$0xff] }
  0x1b   : > { %v234_v42 = vld [vmem:[%s3487_s27 + $0xd1] sm:$0xff]  ;;  %v243_v43 = vld [vmem:[%s3487_s27 + $0x119] sm:$0xff]  ;;  %v216_v44 = vld [vmem:[%s3487_s27 + $0x41] sm:$0xff] }
  0x1c   : > { %v171_v45 = vld [vmem:[%s3487_s27] sm:$0xff]  ;;  %v1030_v47 = vld [vmem:[%s3487_s27 + $0x12] sm:$0xff]  ;;  %v172_v49 = vld [vmem:[%s3487_s27 + $0x8] sm:$0xff] }
  0x1d   : > { %v720_v46 = vld [vmem:[%s3487_s27 + $0x2] sm:$0xff]  ;;  %v1340_v48 = vld [vmem:[%s3487_s27 + $0x13] sm:$0xff]  ;;  %v721_v50 = vld [vmem:[%s3487_s27 + $0xa] sm:$0xff] }
  0x1e   : > { %v1031_v51 = vld [vmem:[%s3487_s27 + $0x1a] sm:$0xff]  ;;  %v173_v53 = vld [vmem:[%s3487_s27 + $0x10] sm:$0xff]  ;;  %v1032_v54 = vld [vmem:[%s3487_s27 + $0x22] sm:$0xff] }
  0x1f   : > { %v1341_v52 = vld [vmem:[%s3487_s27 + $0x1b] sm:$0xff]  ;;  %v1342_v55 = vld [vmem:[%s3487_s27 + $0x23] sm:$0xff]  ;;  %v1343_v58 = vld [vmem:[%s3487_s27 + $0x2b] sm:$0xff] }
  0x20   : > { %v174_v56 = vld [vmem:[%s3487_s27 + $0x18] sm:$0xff]  ;;  %v1033_v57 = vld [vmem:[%s3487_s27 + $0x2a] sm:$0xff]  ;;  %v175_v59 = vld [vmem:[%s3487_s27 + $0x20] sm:$0xff] }
  0x21   : > { %3077 = vmatmul.msk.f32.gmra.mxu1 %vm246_vm1, %v219_v13  ;;  %3086 = vmatmul.msk.f32.gmra.mxu2 %vm246_vm1, %v228_v14  ;;  %v1034_v60 = vld [vmem:[%s3487_s27 + $0x32] sm:$0xff]  ;;  %v176_v62 = vld [vmem:[%s3487_s27 + $0x28] sm:$0xff]  ;;  %v1035_v63 = vld [vmem:[%s3487_s27 + $0x3a] sm:$0xff] }
  0x22   : > { %3095 = vmatmul.msk.f32.gmra.mxu3 %vm246_vm1, %v237_v15  ;;  %3068 = vmatmul.msk.f32.gmra.mxu0 %vm246_vm1, %v210_v16  ;;  %v1344_v61 = vld [vmem:[%s3487_s27 + $0x33] sm:$0xff]  ;;  %v1345_v0 = vld [vmem:[%s3487_s27 + $0x3b] sm:$0xff]  ;;  %v1346_v3 = vld [vmem:[%s3487_s27 + $0x43] sm:$0xff] }
  0x23   : > { %v177_v1 = vld [vmem:[%s3487_s27 + $0x30] sm:$0xff]  ;;  %v1036_v2 = vld [vmem:[%s3487_s27 + $0x42] sm:$0xff]  ;;  %v178_v5 = vld [vmem:[%s3487_s27 + $0x38] sm:$0xff] }
  0x24   : > { %v1037_v6 = vld [vmem:[%s3487_s27 + $0x4a] sm:$0xff]  ;;  %v179_v12 = vld [vmem:[%s3487_s27 + $0x40] sm:$0xff]  ;;  %v1038_v13 = vld [vmem:[%s3487_s27 + $0x52] sm:$0xff] }
  0x25   : > { %v1347_v8 = vld [vmem:[%s3487_s27 + $0x4b] sm:$0xff]  ;;  %v1348_v15 = vld [vmem:[%s3487_s27 + $0x53] sm:$0xff]  ;;  %v1350_v29 = vld [vmem:[%s3487_s27 + $0x63] sm:$0xff] }
  0x26   : > { %v1351_v36 = vld [vmem:[%s3487_s27 + $0x6b] sm:$0xff] }
  0x29   : > { %3078 = vmatmul.msk.f32.gmra.mxu1 %vm246_vm1, %v220_v17  ;;  %3087 = vmatmul.msk.f32.gmra.mxu2 %vm246_vm1, %v229_v18 }
  0x2a   : > { %3096 = vmatmul.msk.f32.gmra.mxu3 %vm246_vm1, %v238_v19  ;;  %3069 = vmatmul.msk.f32.gmra.mxu0 %vm246_vm1, %v211_v20  ;;  %v180_v19 = vld [vmem:[%s3487_s27 + $0x48] sm:$0xff]  ;;  %v1039_v20 = vld [vmem:[%s3487_s27 + $0x5a] sm:$0xff] }
  0x31   : > { %3079 = vmatmul.msk.f32.gmra.mxu1 %vm246_vm1, %v221_v21  ;;  %3088 = vmatmul.msk.f32.gmra.mxu2 %vm246_vm1, %v230_v22  ;;  %v1349_v22 = vld [vmem:[%s3487_s27 + $0x5b] sm:$0xff] }
  0x32   : > { %3097 = vmatmul.msk.f32.gmra.mxu3 %vm246_vm1, %v239_v23  ;;  %3070 = vmatmul.msk.f32.gmra.mxu0 %vm246_vm1, %v212_v24 }
  0x39   : > { %3080 = vmatmul.msk.f32.gmra.mxu1 %vm246_vm1, %v222_v25  ;;  %3089 = vmatmul.msk.f32.gmra.mxu2 %vm246_vm1, %v231_v26  ;;  %v181_v26 = vld [vmem:[%s3487_s27 + $0x50] sm:$0xff] }
  0x3a   : > { %3098 = vmatmul.msk.f32.gmra.mxu3 %vm246_vm1, %v240_v27  ;;  %3071 = vmatmul.msk.f32.gmra.mxu0 %vm246_vm1, %v213_v28  ;;  %v1040_v27 = vld [vmem:[%s3487_s27 + $0x62] sm:$0xff] }
  0x41   : > { %3081 = vmatmul.msk.f32.gmra.mxu1 %vm246_vm1, %v223_v32  ;;  %3090 = vmatmul.msk.f32.gmra.mxu2 %vm246_vm1, %v232_v33  ;;  %v182_v33 = vld [vmem:[%s3487_s27 + $0x58] sm:$0xff] }
  0x42   : > { %3099 = vmatmul.msk.f32.gmra.mxu3 %vm246_vm1, %v241_v34  ;;  %3072 = vmatmul.msk.f32.gmra.mxu0 %vm246_vm1, %v214_v35  ;;  %v1041_v34 = vld [vmem:[%s3487_s27 + $0x6a] sm:$0xff] }
  0x49   : > { %3082 = vmatmul.msk.f32.gmra.mxu1 %vm246_vm1, %v224_v37  ;;  %3091 = vmatmul.msk.f32.gmra.mxu2 %vm246_vm1, %v233_v38 }
  0x4a   : > { %3100 = vmatmul.msk.f32.gmra.mxu3 %vm246_vm1, %v242_v39  ;;  %3073 = vmatmul.msk.f32.gmra.mxu0 %vm246_vm1, %v215_v40  ;;  %v183_v40 = vld [vmem:[%s3487_s27 + $0x60] sm:$0xff] }
  0x51   : > { %3083 = vmatmul.msk.f32.gmra.mxu1 %vm246_vm1, %v225_v41  ;;  %3092 = vmatmul.msk.f32.gmra.mxu2 %vm246_vm1, %v234_v42  ;;  %v1042_v41 = vld [vmem:[%s3487_s27 + $0x72] sm:$0xff] }
  0x52   : > { %3101 = vmatmul.msk.f32.gmra.mxu3 %vm246_vm1, %v243_v43  ;;  %3074 = vmatmul.msk.f32.gmra.mxu0 %vm246_vm1, %v216_v44  ;;  %v1352_v43 = vld [vmem:[%s3487_s27 + $0x73] sm:$0xff] }
  0x59   : > { %3103 = vmatmul.msk.f32.vlgmr.msrb.gmra.mxu1 %vm246_vm1, %v171_v45  ;;  %3141 = vmatmul.msk.f32.vlgmr.msrb.gmra.mxu2 %vm246_vm1, %v720_v46 }
  0x5a   : > { %3179 = vmatmul.msk.f32.vlgmr.msrb.gmra.mxu3 %vm246_vm1, %v1030_v47  ;;  %3217 = vmatmul.msk.f32.vlgmr.msrb.gmra.mxu0 %vm246_vm1, %v1340_v48  ;;  %v1043_v48 = vld [vmem:[%s3487_s27 + $0x7a] sm:$0xff] }
  0x61   : > { %3104 = vmatmul.msk.f32.gmra.mxu1 %vm246_vm1, %v172_v49  ;;  %3142 = vmatmul.msk.f32.gmra.mxu2 %vm246_vm1, %v721_v50  ;;  %v1353_v50 = vld [vmem:[%s3487_s27 + $0x7b] sm:$0xff] }
  0x62   : > { %3180 = vmatmul.msk.f32.gmra.mxu3 %vm246_vm1, %v1031_v51  ;;  %3218 = vmatmul.msk.f32.gmra.mxu0 %vm246_vm1, %v1341_v52 }
  0x69   : > { %3105 = vmatmul.msk.f32.gmra.mxu1 %vm246_vm1, %v173_v53  ;;  %3143 = vmatmul.msk.f32.gmra.mxu2 %vm246_vm1, %v1030_v47  ;;  %v184_v47 = vld [vmem:[%s3487_s27 + $0x68] sm:$0xff] }
  0x6a   : > { %3181 = vmatmul.msk.f32.gmra.mxu3 %vm246_vm1, %v1032_v54  ;;  %3219 = vmatmul.msk.f32.gmra.mxu0 %vm246_vm1, %v1342_v55  ;;  %v1044_v55 = vld [vmem:[%s3487_s27 + $0x82] sm:$0xff] }
  0x71   : > { %3106 = vmatmul.msk.f32.gmra.mxu1 %vm246_vm1, %v174_v56  ;;  %3144 = vmatmul.msk.f32.gmra.mxu2 %vm246_vm1, %v1031_v51 }
  0x72   : > { %3182 = vmatmul.msk.f32.gmra.mxu3 %vm246_vm1, %v1033_v57  ;;  %3220 = vmatmul.msk.f32.gmra.mxu0 %vm246_vm1, %v1343_v58 }
  0x79   : > { %3107 = vmatmul.msk.f32.gmra.mxu1 %vm246_vm1, %v175_v59  ;;  %3145 = vmatmul.msk.f32.gmra.mxu2 %vm246_vm1, %v1032_v54  ;;  %v185_v54 = vld [vmem:[%s3487_s27 + $0x70] sm:$0xff] }
  0x7a   : > { %3183 = vmatmul.msk.f32.gmra.mxu3 %vm246_vm1, %v1034_v60  ;;  %3221 = vmatmul.msk.f32.gmra.mxu0 %vm246_vm1, %v1344_v61  ;;  %v186_v61 = vld [vmem:[%s3487_s27 + $0x78] sm:$0xff] }
  0x81   : > { %3108 = vmatmul.msk.f32.gmra.mxu1 %vm246_vm1, %v176_v62  ;;  %3146 = vmatmul.msk.f32.gmra.mxu2 %vm246_vm1, %v1033_v57  ;;  %v1354_v57 = vld [vmem:[%s3487_s27 + $0x83] sm:$0xff] }
  0x82   : > { %3184 = vmatmul.msk.f32.gmra.mxu3 %vm246_vm1, %v1035_v63  ;;  %3222 = vmatmul.msk.f32.gmra.mxu0 %vm246_vm1, %v1345_v0  ;;  %v1045_v62 = vld [vmem:[%s3487_s27 + $0x8a] sm:$0xff] }
  0x83   : > { %v1355_v0 = vld [vmem:[%s3487_s27 + $0x8b] sm:$0xff] }
  0x89   : > { %3109 = vmatmul.msk.f32.gmra.mxu1 %vm246_vm1, %v177_v1  ;;  %3147 = vmatmul.msk.f32.gmra.mxu2 %vm246_vm1, %v1034_v60 }
  0x8a   : > { %3185 = vmatmul.msk.f32.gmra.mxu3 %vm246_vm1, %v1036_v2  ;;  %3223 = vmatmul.msk.f32.gmra.mxu0 %vm246_vm1, %v1346_v3 }
  0x8e   : > { %v3628_v4 = vpop.f32.mrf.mxu1 }
  0x8f   : > { %v3632_v7 = vpop.f32.mrf.mxu0 }
  0x91   : > { %3110 = vmatmul.msk.f32.gmra.mxu1 %vm246_vm1, %v178_v5  ;;  %3148 = vmatmul.msk.f32.gmra.mxu2 %vm246_vm1, %v1035_v63  ;;  %v187_v5 = vld [vmem:[%s3487_s27 + $0x80] sm:$0xff] }
  0x92   : > { %3186 = vmatmul.msk.f32.gmra.mxu3 %vm246_vm1, %v1037_v6  ;;  %3224 = vmatmul.msk.f32.gmra.mxu0 %vm246_vm1, %v1347_v8 }
  0x94   : > { %v3639_v9 = vpop.f32.mrf.mxu2 }
  0x95   : > { %v3641_v10 = vpop.f32.mrf.mxu3 }
  0x96   : > { %v3643_v11 = vpop.f32.mrf.mxu1 }
  0x97   : > { %v3647_v14 = vpop.f32.mrf.mxu0 }
  0x99   : > { %3111 = vmatmul.msk.f32.gmra.mxu1 %vm246_vm1, %v179_v12  ;;  %3149 = vmatmul.msk.f32.gmra.mxu2 %vm246_vm1, %v1036_v2  ;;  %v1356_v12 = vld [vmem:[%s3487_s27 + $0x93] sm:$0xff] }
  0x9a   : > { %3187 = vmatmul.msk.f32.gmra.mxu3 %vm246_vm1, %v1038_v13  ;;  %3225 = vmatmul.msk.f32.gmra.mxu0 %vm246_vm1, %v1348_v15 }
  0x9c   : > { %v3654_v16 = vpop.f32.mrf.mxu2 }
  0x9d   : > { %v3656_v17 = vpop.f32.mrf.mxu3 }
  0x9e   : > { %v3658_v18 = vpop.f32.mrf.mxu1 }
  0x9f   : > { %v3662_v21 = vpop.f32.mrf.mxu0 }
  0xa1   : > { %3112 = vmatmul.msk.f32.gmra.mxu1 %vm246_vm1, %v180_v19  ;;  %3150 = vmatmul.msk.f32.gmra.mxu2 %vm246_vm1, %v1037_v6  ;;  %v1046_v6 = vld [vmem:[%s3487_s27 + $0x92] sm:$0xff] }
  0xa2   : > { %3188 = vmatmul.msk.f32.gmra.mxu3 %vm246_vm1, %v1039_v20  ;;  %3226 = vmatmul.msk.f32.gmra.mxu0 %vm246_vm1, %v1349_v22 }
  0xa4   : > { %v3669_v23 = vpop.f32.mrf.mxu2 }
  0xa5   : > { %v3671_v24 = vpop.f32.mrf.mxu3 }
  0xa6   : > { %v3673_v25 = vpop.f32.mrf.mxu1 }
  0xa7   : > { %v3677_v28 = vpop.f32.mrf.mxu0 }
  0xa9   : > { %3113 = vmatmul.msk.f32.gmra.mxu1 %vm246_vm1, %v181_v26  ;;  %3151 = vmatmul.msk.f32.gmra.mxu2 %vm246_vm1, %v1038_v13  ;;  %v188_v26 = vld [vmem:[%s3487_s27 + $0x88] sm:$0xff] }
  0xaa   : > { %3189 = vmatmul.msk.f32.gmra.mxu3 %vm246_vm1, %v1040_v27  ;;  %3227 = vmatmul.msk.f32.gmra.mxu0 %vm246_vm1, %v1350_v29  ;;  %v1047_v29 = vld [vmem:[%s3487_s27 + $0x9a] sm:$0xff] }
  0xac   : > { %v3684_v30 = vpop.f32.mrf.mxu2 }
  0xad   : > { %v3686_v31 = vpop.f32.mrf.mxu3 }
  0xae   : > { %v3688_v32 = vpop.f32.mrf.mxu1 }
  0xaf   : > { %v3692_v35 = vpop.f32.mrf.mxu0 }
  0xb1   : > { %3114 = vmatmul.msk.f32.gmra.mxu1 %vm246_vm1, %v182_v33  ;;  %3152 = vmatmul.msk.f32.gmra.mxu2 %vm246_vm1, %v1039_v20 }
  0xb2   : > { %3190 = vmatmul.msk.f32.gmra.mxu3 %vm246_vm1, %v1041_v34  ;;  %3228 = vmatmul.msk.f32.gmra.mxu0 %vm246_vm1, %v1351_v36 }
  0xb4   : > { %v3699_v37 = vpop.f32.mrf.mxu2 }
  0xb5   : > { %v3701_v38 = vpop.f32.mrf.mxu3 }
  0xb6   : > { %v3703_v39 = vpop.f32.mrf.mxu1 }
  0xb7   : > { %v3707_v42 = vpop.f32.mrf.mxu0 }
  0xb9   : > { %3115 = vmatmul.msk.f32.gmra.mxu1 %vm246_vm1, %v183_v40  ;;  %3153 = vmatmul.msk.f32.gmra.mxu2 %vm246_vm1, %v1040_v27 }
  0xba   : > { %3191 = vmatmul.msk.f32.gmra.mxu3 %vm246_vm1, %v1042_v41  ;;  %3229 = vmatmul.msk.f32.gmra.mxu0 %vm246_vm1, %v1352_v43 }
  0xbc   : > { %v3714_v44 = vpop.f32.mrf.mxu2 }
  0xbd   : > { %v3716_v45 = vpop.f32.mrf.mxu3 }
  0xbe   : > { %v3718_v46 = vpop.f32.mrf.mxu1 }
  0xbf   : > { %v3722_v49 = vpop.f32.mrf.mxu0 }
  0xc1   : > { %3116 = vmatmul.msk.f32.gmra.mxu1 %vm246_vm1, %v184_v47  ;;  %3154 = vmatmul.msk.f32.gmra.mxu2 %vm246_vm1, %v1041_v34  ;;  %v1357_v34 = vld [vmem:[%s3487_s27 + $0x9b] sm:$0xff] }
  0xc2   : > { %3192 = vmatmul.msk.f32.gmra.mxu3 %vm246_vm1, %v1043_v48  ;;  %3230 = vmatmul.msk.f32.gmra.mxu0 %vm246_vm1, %v1353_v50 }
  0xc4   : > { %v3729_v51 = vpop.f32.mrf.mxu2 }
  0xc5   : > { %v3731_v52 = vpop.f32.mrf.mxu3 }
  0xc6   : > { %v3733_v53 = vpop.f32.mrf.mxu1 }
  0xc7   : > { %v3737_v56 = vpop.f32.mrf.mxu0 }
  0xc9   : > { %3117 = vmatmul.msk.f32.gmra.mxu1 %vm246_vm1, %v185_v54  ;;  %3155 = vmatmul.msk.f32.gmra.mxu2 %vm246_vm1, %v1042_v41  ;;  %v1048_v54 = vld [vmem:[%s3487_s27 + $0xa2] sm:$0xff] }
  0xca   : > { %3193 = vmatmul.msk.f32.gmra.mxu3 %vm246_vm1, %v1044_v55  ;;  %3231 = vmatmul.msk.f32.gmra.mxu0 %vm246_vm1, %v1354_v57  ;;  %v1358_v57 = vld [vmem:[%s3487_s27 + $0xa3] sm:$0xff] }
  0xcc   : > { %v3744_v58 = vpop.f32.mrf.mxu2 }
  0xcd   : > { %v3746_v59 = vpop.f32.mrf.mxu3 }
  0xce   : > { %v3748_v60 = vpop.f32.mrf.mxu1 }
  0xcf   : > { %v3752_v63 = vpop.f32.mrf.mxu0 }
  0xd1   : > { %3118 = vmatmul.msk.f32.gmra.mxu1 %vm246_vm1, %v186_v61  ;;  %3156 = vmatmul.msk.f32.gmra.mxu2 %vm246_vm1, %v1043_v48  ;;  %v189_v48 = vld [vmem:[%s3487_s27 + $0x90] sm:$0xff] }
  0xd2   : > { %3194 = vmatmul.msk.f32.gmra.mxu3 %vm246_vm1, %v1045_v62  ;;  %3232 = vmatmul.msk.f32.gmra.mxu0 %vm246_vm1, %v1355_v0 }
  0xd4   : > { %v3759_v1 = vpop.f32.mrf.mxu2 }
  0xd5   : > { %v3761_v2 = vpop.f32.mrf.mxu3 }
  0xd6   : > { %v612_v3 = vpop.f32.mrf.mxu1 }
  0xd7   : > { %v1506_v8 = vpop.f32.mrf.mxu0  ;;  %v613_v13 = vadd.f32 %v612_v3, %v3632_v7 }
  0xd9   : > { %3119 = vmatmul.msk.f32.gmra.mxu1 %vm246_vm1, %v187_v5  ;;  %3157 = vmatmul.msk.f32.gmra.mxu2 %vm246_vm1, %v1044_v55 }
  0xda   : > { %3195 = vmatmul.msk.f32.gmra.mxu3 %vm246_vm1, %v1046_v6  ;;  %3233 = vmatmul.msk.f32.gmra.mxu0 %vm246_vm1, %v1356_v12 }
  0xdc   : > { %v886_v15 = vpop.f32.mrf.mxu2 }
  0xdd   : > { %v994_v19 = vadd.f32 %v886_v15, %v613_v13  ;;  %v1196_v20 = vpop.f32.mrf.mxu3  ;;  %v1049_v13 = vld [vmem:[%s3487_s27 + $0xaa] sm:$0xff] }
  0xde   : > { %v615_v22 = vpop.f32.mrf.mxu1 }
  0xdf   : > { %v1304_v27 = vadd.f32 %v1196_v20, %v994_v19  ;;  %v1509_v33 = vpop.f32.mrf.mxu0  ;;  %v616_v7 = vadd.f32 %v615_v22, %v3647_v14  ;;  %v1359_v19 = vld [vmem:[%s3487_s27 + $0xab] sm:$0xff] }
  0xe1   : > { %v3774_v36 = vadd.f32 %v1506_v8, %v1304_v27  ;;  %3120 = vmatmul.msk.f32.gmra.mxu1 %vm246_vm1, %v188_v26  ;;  %3158 = vmatmul.msk.f32.gmra.mxu2 %vm246_vm1, %v1045_v62  ;;  %v190_v8 = vld [vmem:[%s3487_s27 + $0x98] sm:$0xff] }
  0xe2   : > { %3196 = vmatmul.msk.f32.gmra.mxu3 %vm246_vm1, %v1047_v29  ;;  %3234 = vmatmul.msk.f32.gmra.mxu0 %vm246_vm1, %v1357_v34 }
  0xe4   : > { %v889_v40 = vpop.f32.mrf.mxu2 }
  0xe5   : > { %v995_v41 = vadd.f32 %v889_v40, %v616_v7  ;;  %v1199_v43 = vpop.f32.mrf.mxu3  ;;  %v1050_v7 = vld [vmem:[%s3487_s27 + $0xb2] sm:$0xff] }
  0xe6   : > { %v618_v47 = vpop.f32.mrf.mxu1 }
  0xe7   : > { %v1305_v50 = vadd.f32 %v1199_v43, %v995_v41  ;;  %v1512_v55 = vpop.f32.mrf.mxu0  ;;  %v619_v14 = vadd.f32 %v618_v47, %v3662_v21  ;;  %v1360_v41 = vld [vmem:[%s3487_s27 + $0xb3] sm:$0xff] }
  0xe9   : > { %v3784_v61 = vadd.f32 %v1509_v33, %v1305_v50  ;;  %3121 = vmatmul.msk.f32.gmra.mxu1 %vm246_vm1, %v189_v48  ;;  %3159 = vmatmul.msk.f32.gmra.mxu2 %vm246_vm1, %v1046_v6  ;;  %v191_v33 = vld [vmem:[%s3487_s27 + $0xa0] sm:$0xff] }
  0xea   : > { %3197 = vmatmul.msk.f32.gmra.mxu3 %vm246_vm1, %v1048_v54  ;;  %3235 = vmatmul.msk.f32.gmra.mxu0 %vm246_vm1, %v1358_v57 }
  0xec   : > { %v892_v62 = vpop.f32.mrf.mxu2 }
  0xed   : > { %v996_v0 = vadd.f32 %v892_v62, %v619_v14  ;;  %v1202_v3 = vpop.f32.mrf.mxu3  ;;  %v1051_v14 = vld [vmem:[%s3487_s27 + $0xba] sm:$0xff] }
  0xee   : > { %v621_v5 = vpop.f32.mrf.mxu1 }
  0xef   : > { %v1306_v12 = vadd.f32 %v1202_v3, %v996_v0  ;;  %v1515_v15 = vpop.f32.mrf.mxu0  ;;  %v622_v21 = vadd.f32 %v621_v5, %v3677_v28  ;;  %v1361_v0 = vld [vmem:[%s3487_s27 + $0xbb] sm:$0xff] }
  0xf1   : > { %v3794_v20 = vadd.f32 %v1512_v55, %v1306_v12  ;;  %3122 = vmatmul.msk.f32.gmra.mxu1 %vm246_vm1, %v190_v8  ;;  %3160 = vmatmul.msk.f32.gmra.mxu2 %vm246_vm1, %v1047_v29  ;;  %v192_v55 = vld [vmem:[%s3487_s27 + $0xa8] sm:$0xff] }
  0xf2   : > { %3198 = vmatmul.msk.f32.gmra.mxu3 %vm246_vm1, %v1049_v13  ;;  %3236 = vmatmul.msk.f32.gmra.mxu0 %vm246_vm1, %v1359_v19 }
  0xf4   : > { %v895_v6 = vpop.f32.mrf.mxu2 }
  0xf5   : > { %v997_v22 = vadd.f32 %v895_v6, %v622_v21  ;;  %v1205_v26 = vpop.f32.mrf.mxu3  ;;  %v1052_v21 = vld [vmem:[%s3487_s27 + $0xc2] sm:$0xff] }
  0xf6   : > { %v624_v27 = vpop.f32.mrf.mxu1 }
  0xf7   : > { %v1307_v34 = vadd.f32 %v1205_v26, %v997_v22  ;;  %v1518_v40 = vpop.f32.mrf.mxu0  ;;  %v625_v28 = vadd.f32 %v624_v27, %v3692_v35  ;;  %v1362_v22 = vld [vmem:[%s3487_s27 + $0xc3] sm:$0xff] }
  0xf9   : > { %v3804_v43 = vadd.f32 %v1515_v15, %v1307_v34  ;;  %3123 = vmatmul.msk.f32.gmra.mxu1 %vm246_vm1, %v191_v33  ;;  %3161 = vmatmul.msk.f32.gmra.mxu2 %vm246_vm1, %v1048_v54  ;;  %v193_v15 = vld [vmem:[%s3487_s27 + $0xb0] sm:$0xff] }
  0xfa   : > { %3199 = vmatmul.msk.f32.gmra.mxu3 %vm246_vm1, %v1050_v7  ;;  %3237 = vmatmul.msk.f32.gmra.mxu0 %vm246_vm1, %v1360_v41 }
  0xfc   : > { %v898_v29 = vpop.f32.mrf.mxu2 }
  0xfd   : > { %v998_v47 = vadd.f32 %v898_v29, %v625_v28  ;;  %v1208_v48 = vpop.f32.mrf.mxu3  ;;  %v1053_v28 = vld [vmem:[%s3487_s27 + $0xca] sm:$0xff] }
  0xfe   : > { %v627_v50 = vpop.f32.mrf.mxu1 }
  0xff   : > { %v1308_v57 = vadd.f32 %v1208_v48, %v998_v47  ;;  %v1521_v62 = vpop.f32.mrf.mxu0  ;;  %v628_v35 = vadd.f32 %v627_v50, %v3707_v42  ;;  %v1363_v47 = vld [vmem:[%s3487_s27 + $0xcb] sm:$0xff] }
 0x101   : > { %v3814_v3 = vadd.f32 %v1518_v40, %v1308_v57  ;;  %3124 = vmatmul.msk.f32.gmra.mxu1 %vm246_vm1, %v192_v55  ;;  %3162 = vmatmul.msk.f32.gmra.mxu2 %vm246_vm1, %v1049_v13  ;;  %v194_v40 = vld [vmem:[%s3487_s27 + $0xb8] sm:$0xff] }
 0x102   : > { %3200 = vmatmul.msk.f32.gmra.mxu3 %vm246_vm1, %v1051_v14  ;;  %3238 = vmatmul.msk.f32.gmra.mxu0 %vm246_vm1, %v1361_v0 }
 0x104   : > { %v901_v54 = vpop.f32.mrf.mxu2 }
 0x105   : > { %v999_v5 = vadd.f32 %v901_v54, %v628_v35  ;;  %v1211_v8 = vpop.f32.mrf.mxu3  ;;  %v1054_v35 = vld [vmem:[%s3487_s27 + $0xd2] sm:$0xff] }
 0x106   : > { %v630_v12 = vpop.f32.mrf.mxu1 }
 0x107   : > { %v1309_v19 = vadd.f32 %v1211_v8, %v999_v5  ;;  %v1524_v6 = vpop.f32.mrf.mxu0  ;;  %v631_v42 = vadd.f32 %v630_v12, %v3722_v49  ;;  %v1364_v5 = vld [vmem:[%s3487_s27 + $0xd3] sm:$0xff] }
 0x109   : > { %v3824_v26 = vadd.f32 %v1521_v62, %v1309_v19  ;;  %3125 = vmatmul.msk.f32.gmra.mxu1 %vm246_vm1, %v193_v15  ;;  %3163 = vmatmul.msk.f32.gmra.mxu2 %vm246_vm1, %v1050_v7  ;;  %v195_v62 = vld [vmem:[%s3487_s27 + $0xc0] sm:$0xff] }
 0x10a   : > { %3201 = vmatmul.msk.f32.gmra.mxu3 %vm246_vm1, %v1052_v21  ;;  %3239 = vmatmul.msk.f32.gmra.mxu0 %vm246_vm1, %v1362_v22 }
 0x10c   : > { %v904_v13 = vpop.f32.mrf.mxu2 }
 0x10d   : > { %v1000_v27 = vadd.f32 %v904_v13, %v631_v42  ;;  %v1214_v33 = vpop.f32.mrf.mxu3  ;;  %v1055_v42 = vld [vmem:[%s3487_s27 + $0xda] sm:$0xff] }
 0x10e   : > { %v633_v34 = vpop.f32.mrf.mxu1 }
 0x10f   : > { %v1310_v41 = vadd.f32 %v1214_v33, %v1000_v27  ;;  %v1527_v29 = vpop.f32.mrf.mxu0  ;;  %v634_v49 = vadd.f32 %v633_v34, %v3737_v56  ;;  %v1365_v27 = vld [vmem:[%s3487_s27 + $0xdb] sm:$0xff] }
 0x111   : > { %v3834_v48 = vadd.f32 %v1524_v6, %v1310_v41  ;;  %3126 = vmatmul.msk.f32.gmra.mxu1 %vm246_vm1, %v194_v40  ;;  %3164 = vmatmul.msk.f32.gmra.mxu2 %vm246_vm1, %v1051_v14  ;;  %v196_v6 = vld [vmem:[%s3487_s27 + $0xc8] sm:$0xff] }
 0x112   : > { %3202 = vmatmul.msk.f32.gmra.mxu3 %vm246_vm1, %v1053_v28  ;;  %3240 = vmatmul.msk.f32.gmra.mxu0 %vm246_vm1, %v1363_v47 }
 0x114   : > { %v907_v7 = vpop.f32.mrf.mxu2 }
 0x115   : > { %v1001_v50 = vadd.f32 %v907_v7, %v634_v49  ;;  %v1217_v55 = vpop.f32.mrf.mxu3  ;;  %v1056_v49 = vld [vmem:[%s3487_s27 + $0xe2] sm:$0xff] }
 0x116   : > { %v636_v57 = vpop.f32.mrf.mxu1 }
 0x117   : > { %v1311_v0 = vadd.f32 %v1217_v55, %v1001_v50  ;;  %v1530_v54 = vpop.f32.mrf.mxu0  ;;  %v637_v56 = vadd.f32 %v636_v57, %v3752_v63  ;;  %v1366_v50 = vld [vmem:[%s3487_s27 + $0xe3] sm:$0xff] }
 0x119   : > { %v3844_v8 = vadd.f32 %v1527_v29, %v1311_v0  ;;  %3127 = vmatmul.msk.f32.gmra.mxu1 %vm246_vm1, %v195_v62  ;;  %3165 = vmatmul.msk.f32.gmra.mxu2 %vm246_vm1, %v1052_v21  ;;  %v197_v29 = vld [vmem:[%s3487_s27 + $0xd0] sm:$0xff] }
 0x11a   : > { %3203 = vmatmul.msk.f32.gmra.mxu3 %vm246_vm1, %v1054_v35  ;;  %3241 = vmatmul.msk.f32.gmra.mxu0 %vm246_vm1, %v1364_v5 }
 0x11c   : > { %v910_v14 = vpop.f32.mrf.mxu2 }
 0x11d   : > { %v1002_v12 = vadd.f32 %v910_v14, %v637_v56  ;;  %v1220_v15 = vpop.f32.mrf.mxu3  ;;  %v1057_v56 = vld [vmem:[%s3487_s27 + $0xea] sm:$0xff] }
 0x11e   : > { %v639_v19 = vpop.f32.mrf.mxu1 }
 0x11f   : > { %v1312_v22 = vadd.f32 %v1220_v15, %v1002_v12  ;;  %v1533_v13 = vpop.f32.mrf.mxu0  ;;  %v640_v63 = vadd.f32 %v639_v19, %v3628_v4  ;;  %v1367_v12 = vld [vmem:[%s3487_s27 + $0xeb] sm:$0xff] }
 0x121   : > { %v3854_v33 = vadd.f32 %v1530_v54, %v1312_v22  ;;  %3128 = vmatmul.msk.f32.gmra.mxu1 %vm246_vm1, %v196_v6  ;;  %3166 = vmatmul.msk.f32.gmra.mxu2 %vm246_vm1, %v1053_v28  ;;  %v198_v54 = vld [vmem:[%s3487_s27 + $0xd8] sm:$0xff] }
 0x122   : > { %3204 = vmatmul.msk.f32.gmra.mxu3 %vm246_vm1, %v1055_v42  ;;  %3242 = vmatmul.msk.f32.gmra.mxu0 %vm246_vm1, %v1365_v27 }
 0x124   : > { %v913_v21 = vpop.f32.mrf.mxu2 }
 0x125   : > { %v1003_v34 = vadd.f32 %v913_v21, %v640_v63  ;;  %v1223_v40 = vpop.f32.mrf.mxu3  ;;  %v1058_v63 = vld [vmem:[%s3487_s27 + $0xf2] sm:$0xff] }
 0x126   : > { %v642_v41 = vpop.f32.mrf.mxu1 }
 0x127   : > { %v1313_v47 = vadd.f32 %v1223_v40, %v1003_v34  ;;  %v1536_v7 = vpop.f32.mrf.mxu0  ;;  %v643_v4 = vadd.f32 %v642_v41, %v3643_v11  ;;  %v1368_v34 = vld [vmem:[%s3487_s27 + $0xf3] sm:$0xff] }
 0x129   : > { %v3864_v55 = vadd.f32 %v1533_v13, %v1313_v47  ;;  %3129 = vmatmul.msk.f32.gmra.mxu1 %vm246_vm1, %v197_v29  ;;  %3167 = vmatmul.msk.f32.gmra.mxu2 %vm246_vm1, %v1054_v35  ;;  %v199_v13 = vld [vmem:[%s3487_s27 + $0xe0] sm:$0xff] }
 0x12a   : > { %3205 = vmatmul.msk.f32.gmra.mxu3 %vm246_vm1, %v1056_v49  ;;  %3243 = vmatmul.msk.f32.gmra.mxu0 %vm246_vm1, %v1366_v50 }
 0x12c   : > { %v916_v28 = vpop.f32.mrf.mxu2 }
 0x12d   : > { %v1004_v57 = vadd.f32 %v916_v28, %v643_v4  ;;  %v1226_v62 = vpop.f32.mrf.mxu3  ;;  %v1059_v4 = vld [vmem:[%s3487_s27 + $0xfa] sm:$0xff] }
 0x12e   : > { %v645_v0 = vpop.f32.mrf.mxu1 }
 0x12f   : > { %v1314_v5 = vadd.f32 %v1226_v62, %v1004_v57  ;;  %v1539_v14 = vpop.f32.mrf.mxu0  ;;  %v646_v11 = vadd.f32 %v645_v0, %v3658_v18  ;;  %v1369_v57 = vld [vmem:[%s3487_s27 + $0xfb] sm:$0xff] }
 0x131   : > { %v3874_v15 = vadd.f32 %v1536_v7, %v1314_v5  ;;  %3130 = vmatmul.msk.f32.gmra.mxu1 %vm246_vm1, %v198_v54  ;;  %3168 = vmatmul.msk.f32.gmra.mxu2 %vm246_vm1, %v1055_v42  ;;  %v200_v7 = vld [vmem:[%s3487_s27 + $0xe8] sm:$0xff] }
 0x132   : > { %3206 = vmatmul.msk.f32.gmra.mxu3 %vm246_vm1, %v1057_v56  ;;  %3244 = vmatmul.msk.f32.gmra.mxu0 %vm246_vm1, %v1367_v12 }
 0x134   : > { %v919_v35 = vpop.f32.mrf.mxu2 }
 0x135   : > { %v1005_v19 = vadd.f32 %v919_v35, %v646_v11  ;;  %v1229_v6 = vpop.f32.mrf.mxu3  ;;  %v1060_v11 = vld [vmem:[%s3487_s27 + $0x102] sm:$0xff] }
 0x136   : > { %v648_v22 = vpop.f32.mrf.mxu1 }
 0x137   : > { %v1315_v27 = vadd.f32 %v1229_v6, %v1005_v19  ;;  %v1542_v21 = vpop.f32.mrf.mxu0  ;;  %v649_v18 = vadd.f32 %v648_v22, %v3673_v25  ;;  %v1370_v19 = vld [vmem:[%s3487_s27 + $0x103] sm:$0xff] }
 0x139   : > { %v3884_v40 = vadd.f32 %v1539_v14, %v1315_v27  ;;  %3131 = vmatmul.msk.f32.gmra.mxu1 %vm246_vm1, %v199_v13  ;;  %3169 = vmatmul.msk.f32.gmra.mxu2 %vm246_vm1, %v1056_v49  ;;  %v201_v14 = vld [vmem:[%s3487_s27 + $0xf0] sm:$0xff] }
 0x13a   : > { %3207 = vmatmul.msk.f32.gmra.mxu3 %vm246_vm1, %v1058_v63  ;;  %3245 = vmatmul.msk.f32.gmra.mxu0 %vm246_vm1, %v1368_v34 }
 0x13c   : > { %v922_v42 = vpop.f32.mrf.mxu2 }
 0x13d   : > { %v1006_v41 = vadd.f32 %v922_v42, %v649_v18  ;;  %v1232_v29 = vpop.f32.mrf.mxu3  ;;  %v1061_v18 = vld [vmem:[%s3487_s27 + $0x10a] sm:$0xff] }
 0x13e   : > { %v651_v47 = vpop.f32.mrf.mxu1 }
 0x13f   : > { %v1316_v50 = vadd.f32 %v1232_v29, %v1006_v41  ;;  %v1545_v28 = vpop.f32.mrf.mxu0  ;;  %v652_v25 = vadd.f32 %v651_v47, %v3688_v32  ;;  %v1371_v41 = vld [vmem:[%s3487_s27 + $0x10b] sm:$0xff] }
 0x141   : > { %v3894_v62 = vadd.f32 %v1542_v21, %v1316_v50  ;;  %3132 = vmatmul.msk.f32.gmra.mxu1 %vm246_vm1, %v200_v7  ;;  %3170 = vmatmul.msk.f32.gmra.mxu2 %vm246_vm1, %v1057_v56  ;;  %v202_v21 = vld [vmem:[%s3487_s27 + $0xf8] sm:$0xff] }
 0x142   : > { %3208 = vmatmul.msk.f32.gmra.mxu3 %vm246_vm1, %v1059_v4  ;;  %3246 = vmatmul.msk.f32.gmra.mxu0 %vm246_vm1, %v1369_v57 }
 0x144   : > { %v925_v49 = vpop.f32.mrf.mxu2 }
 0x145   : > { %v1007_v0 = vadd.f32 %v925_v49, %v652_v25  ;;  %v1235_v54 = vpop.f32.mrf.mxu3  ;;  %v1062_v25 = vld [vmem:[%s3487_s27 + $0x112] sm:$0xff] }
 0x146   : > { %v654_v5 = vpop.f32.mrf.mxu1 }
 0x147   : > { %v1317_v12 = vadd.f32 %v1235_v54, %v1007_v0  ;;  %v1548_v35 = vpop.f32.mrf.mxu0  ;;  %v655_v32 = vadd.f32 %v654_v5, %v3703_v39  ;;  %v1372_v0 = vld [vmem:[%s3487_s27 + $0x113] sm:$0xff] }
 0x149   : > { %v3904_v6 = vadd.f32 %v1545_v28, %v1317_v12  ;;  %3133 = vmatmul.msk.f32.gmra.mxu1 %vm246_vm1, %v201_v14  ;;  %3171 = vmatmul.msk.f32.gmra.mxu2 %vm246_vm1, %v1058_v63  ;;  %v203_v28 = vld [vmem:[%s3487_s27 + $0x100] sm:$0xff] }
 0x14a   : > { %3209 = vmatmul.msk.f32.gmra.mxu3 %vm246_vm1, %v1060_v11  ;;  %3247 = vmatmul.msk.f32.gmra.mxu0 %vm246_vm1, %v1370_v19 }
 0x14c   : > { %v928_v56 = vpop.f32.mrf.mxu2 }
 0x14d   : > { %v1008_v22 = vadd.f32 %v928_v56, %v655_v32  ;;  %v1238_v13 = vpop.f32.mrf.mxu3  ;;  %v1063_v32 = vld [vmem:[%s3487_s27 + $0x11a] sm:$0xff] }
 0x14e   : > { %v657_v27 = vpop.f32.mrf.mxu1 }
 0x14f   : > { %v1318_v34 = vadd.f32 %v1238_v13, %v1008_v22  ;;  %v1551_v42 = vpop.f32.mrf.mxu0  ;;  %v658_v39 = vadd.f32 %v657_v27, %v3718_v46  ;;  %v1373_v22 = vld [vmem:[%s3487_s27 + $0x11b] sm:$0xff] }
 0x151   : > { %v3914_v29 = vadd.f32 %v1548_v35, %v1318_v34  ;;  %3134 = vmatmul.msk.f32.gmra.mxu1 %vm246_vm1, %v202_v21  ;;  %3172 = vmatmul.msk.f32.gmra.mxu2 %vm246_vm1, %v1059_v4  ;;  %v204_v35 = vld [vmem:[%s3487_s27 + $0x108] sm:$0xff] }
 0x152   : > { %3210 = vmatmul.msk.f32.gmra.mxu3 %vm246_vm1, %v1061_v18  ;;  %3248 = vmatmul.msk.f32.gmra.mxu0 %vm246_vm1, %v1371_v41 }
 0x154   : > { %v931_v63 = vpop.f32.mrf.mxu2 }
 0x155   : > { %v1009_v47 = vadd.f32 %v931_v63, %v658_v39  ;;  %v1241_v7 = vpop.f32.mrf.mxu3  ;;  %v1064_v39 = vld [vmem:[%s3487_s27 + $0x122] sm:$0xff] }
 0x156   : > { %v660_v50 = vpop.f32.mrf.mxu1 }
 0x157   : > { %v1319_v57 = vadd.f32 %v1241_v7, %v1009_v47  ;;  %v1554_v49 = vpop.f32.mrf.mxu0  ;;  %v661_v46 = vadd.f32 %v660_v50, %v3733_v53  ;;  %v1374_v47 = vld [vmem:[%s3487_s27 + $0x123] sm:$0xff] }
 0x159   : > { %v3924_v54 = vadd.f32 %v1551_v42, %v1319_v57  ;;  %3135 = vmatmul.msk.f32.gmra.mxu1 %vm246_vm1, %v203_v28  ;;  %3173 = vmatmul.msk.f32.gmra.mxu2 %vm246_vm1, %v1060_v11  ;;  %v205_v42 = vld [vmem:[%s3487_s27 + $0x110] sm:$0xff] }
 0x15a   : > { %3211 = vmatmul.msk.f32.gmra.mxu3 %vm246_vm1, %v1062_v25  ;;  %3249 = vmatmul.msk.f32.gmra.mxu0 %vm246_vm1, %v1372_v0 }
 0x15c   : > { %v934_v4 = vpop.f32.mrf.mxu2 }
 0x15d   : > { %v1010_v5 = vadd.f32 %v934_v4, %v661_v46  ;;  %v1244_v14 = vpop.f32.mrf.mxu3  ;;  %v1065_v46 = vld [vmem:[%s3487_s27 + $0x12a] sm:$0xff] }
 0x15e   : > { %v663_v12 = vpop.f32.mrf.mxu1 }
 0x15f   : > { %v1320_v19 = vadd.f32 %v1244_v14, %v1010_v5  ;;  %v1557_v56 = vpop.f32.mrf.mxu0  ;;  %v664_v53 = vadd.f32 %v663_v12, %v3748_v60  ;;  %v1375_v5 = vld [vmem:[%s3487_s27 + $0x12b] sm:$0xff] }
 0x161   : > { %v3934_v13 = vadd.f32 %v1554_v49, %v1320_v19  ;;  %3136 = vmatmul.msk.f32.gmra.mxu1 %vm246_vm1, %v204_v35  ;;  %3174 = vmatmul.msk.f32.gmra.mxu2 %vm246_vm1, %v1061_v18  ;;  %v206_v49 = vld [vmem:[%s3487_s27 + $0x118] sm:$0xff] }
 0x162   : > { %3212 = vmatmul.msk.f32.gmra.mxu3 %vm246_vm1, %v1063_v32  ;;  %3250 = vmatmul.msk.f32.gmra.mxu0 %vm246_vm1, %v1373_v22  ;;  %v1960_v22 = vld [vmem:[%s3487_s27 + $0x24] sm:$0xff] }
 0x164   : > { %v937_v11 = vpop.f32.mrf.mxu2 }
 0x165   : > { %v1011_v27 = vadd.f32 %v937_v11, %v664_v53  ;;  %v1247_v21 = vpop.f32.mrf.mxu3  ;;  %v2270_v11 = vld [vmem:[%s3487_s27 + $0x25] sm:$0xff] }
 0x166   : > { %v666_v34 = vpop.f32.mrf.mxu1 }
 0x167   : > { %v1321_v41 = vadd.f32 %v1247_v21, %v1011_v27  ;;  %v1560_v63 = vpop.f32.mrf.mxu0  ;;  %v667_v60 = vadd.f32 %v666_v34, %v3639_v9  ;;  %v2580_v21 = vld [vmem:[%s3487_s27 + $0x26] sm:$0xff] }
 0x169   : > { %v3944_v7 = vadd.f32 %v1557_v56, %v1321_v41  ;;  %3137 = vmatmul.msk.f32.gmra.mxu1 %vm246_vm1, %v205_v42  ;;  %3175 = vmatmul.msk.f32.gmra.mxu2 %vm246_vm1, %v1062_v25  ;;  %v1650_v56 = vld [vmem:[%s3487_s27 + $0x14] sm:$0xff] }
 0x16a   : > { %3213 = vmatmul.msk.f32.gmra.mxu3 %vm246_vm1, %v1064_v39  ;;  %3251 = vmatmul.msk.f32.gmra.mxu0 %vm246_vm1, %v1374_v47  ;;  %v1961_v47 = vld [vmem:[%s3487_s27 + $0x2c] sm:$0xff] }
 0x16c   : > { %v940_v18 = vpop.f32.mrf.mxu2 }
 0x16d   : > { %v1012_v50 = vadd.f32 %v940_v18, %v667_v60  ;;  %v1250_v28 = vpop.f32.mrf.mxu3  ;;  %v2271_v18 = vld [vmem:[%s3487_s27 + $0x2d] sm:$0xff] }
 0x16e   : > { %v669_v57 = vpop.f32.mrf.mxu1 }
 0x16f   : > { %v1322_v0 = vadd.f32 %v1250_v28, %v1012_v50  ;;  %v1563_v4 = vpop.f32.mrf.mxu0  ;;  %v670_v9 = vadd.f32 %v669_v57, %v3654_v16  ;;  %v2581_v28 = vld [vmem:[%s3487_s27 + $0x2e] sm:$0xff] }
 0x171   : > { %v3954_v25 = vadd.f32 %v1560_v63, %v1322_v0  ;;  %3138 = vmatmul.msk.f32.gmra.mxu1 %vm246_vm1, %v206_v49  ;;  %3176 = vmatmul.msk.f32.gmra.mxu2 %vm246_vm1, %v1063_v32  ;;  %v1651_v63 = vld [vmem:[%s3487_s27 + $0x1c] sm:$0xff] }
 0x172   : > { %3214 = vmatmul.msk.f32.gmra.mxu3 %vm246_vm1, %v1065_v46  ;;  %3252 = vmatmul.msk.f32.gmra.mxu0 %vm246_vm1, %v1375_v5  ;;  %v1962_v5 = vld [vmem:[%s3487_s27 + $0x34] sm:$0xff] }
 0x174   : > { %v943_v14 = vpop.f32.mrf.mxu2 }
 0x175   : > { %v1013_v12 = vadd.f32 %v943_v14, %v670_v9  ;;  %v1253_v35 = vpop.f32.mrf.mxu3  ;;  %v2272_v14 = vld [vmem:[%s3487_s27 + $0x35] sm:$0xff] }
 0x176   : > { %v672_v19 = vpop.f32.mrf.mxu1 }
 0x177   : > { %v1323_v53 = vadd.f32 %v1253_v35, %v1013_v12  ;;  %v1566_v27 = vpop.f32.mrf.mxu0  ;;  %v673_v16 = vadd.f32 %v672_v19, %v3669_v23  ;;  %v2582_v35 = vld [vmem:[%s3487_s27 + $0x36] sm:$0xff] }
 0x179   : > { %v3965_v32 = vadd.f32 %v1563_v4, %v1323_v53  ;;  %3255 = vmatmul.msk.f32.vlgmr.msra.gmra.mxu1 %vm246_vm1, %v1650_v56  ;;  %3293 = vmatmul.msk.f32.vlgmr.msra.gmra.mxu2 %vm246_vm1, %v1960_v22 }
 0x17a   : > { %3331 = vmatmul.msk.f32.vlgmr.msra.gmra.mxu3 %vm246_vm1, %v2270_v11  ;;  %3369 = vmatmul.msk.f32.vlgmr.msra.gmra.mxu0 %vm246_vm1, %v2580_v21  ;;  %v1963_v21 = vld [vmem:[%s3487_s27 + $0x3c] sm:$0xff] }
 0x17c   : > { %v946_v34 = vpop.f32.mrf.mxu2 }
 0x17d   : > { %v1014_v42 = vadd.f32 %v946_v34, %v673_v16  ;;  %v1256_v41 = vpop.f32.mrf.mxu3  ;;  %v2273_v34 = vld [vmem:[%s3487_s27 + $0x3d] sm:$0xff] }
 0x17e   : > { %v675_v39 = vpop.f32.mrf.mxu1 }
 0x17f   : > { %v1324_v60 = vadd.f32 %v1256_v41, %v1014_v42  ;;  %v1569_v50 = vpop.f32.mrf.mxu0  ;;  %v676_v23 = vadd.f32 %v675_v39, %v3684_v30 }
 0x181   : > { %v3976_v57 = vadd.f32 %v1566_v27, %v1324_v60  ;;  %3256 = vmatmul.msk.f32.gmra.mxu1 %vm246_vm1, %v1651_v63  ;;  %3294 = vmatmul.msk.f32.gmra.mxu2 %vm246_vm1, %v1961_v47 }
 0x182   : > { %3332 = vmatmul.msk.f32.gmra.mxu3 %vm246_vm1, %v2271_v18  ;;  %3370 = vmatmul.msk.f32.gmra.mxu0 %vm246_vm1, %v2581_v28 }
 0x184   : > { %v949_v49 = vpop.f32.mrf.mxu2 }
 0x185   : > { %v1015_v0 = vadd.f32 %v949_v49, %v676_v23  ;;  %v1259_v46 = vpop.f32.mrf.mxu3  ;;  %v2274_v23 = vld [vmem:[%s3487_s27 + $0x45] sm:$0xff] }
 0x186   : > { %v678_v4 = vpop.f32.mrf.mxu1 }
 0x187   : > { %v1325_v9 = vadd.f32 %v1259_v46, %v1015_v0  ;;  %v1572_v12 = vpop.f32.mrf.mxu0  ;;  %v679_v30 = vadd.f32 %v678_v4, %v3699_v37 }
 0x189   : > { %v3986_v19 = vadd.f32 %v1569_v50, %v1325_v9  ;;  %3257 = vmatmul.msk.f32.gmra.mxu1 %vm246_vm1, %v1960_v22  ;;  %3295 = vmatmul.msk.f32.gmra.mxu2 %vm246_vm1, %v1962_v5  ;;  %v2583_v22 = vld [vmem:[%s3487_s27 + $0x3e] sm:$0xff] }
 0x18a   : > { %3333 = vmatmul.msk.f32.gmra.mxu3 %vm246_vm1, %v2272_v14  ;;  %3371 = vmatmul.msk.f32.gmra.mxu0 %vm246_vm1, %v2582_v35  ;;  %v1964_v50 = vld [vmem:[%s3487_s27 + $0x44] sm:$0xff] }
 0x18c   : > { %v952_v56 = vpop.f32.mrf.mxu2 }
 0x18d   : > { %v1016_v53 = vadd.f32 %v952_v56, %v679_v30  ;;  %v1262_v11 = vpop.f32.mrf.mxu3  ;;  %v2275_v30 = vld [vmem:[%s3487_s27 + $0x4d] sm:$0xff] }
 0x18e   : > { %v681_v27 = vpop.f32.mrf.mxu1 }
 0x18f   : > { %v1326_v16 = vadd.f32 %v1262_v11, %v1016_v53  ;;  %v1575_v42 = vpop.f32.mrf.mxu0  ;;  %v682_v37 = vadd.f32 %v681_v27, %v3714_v44 }
 0x191   : > { %v3996_v41 = vadd.f32 %v1572_v12, %v1326_v16  ;;  %3258 = vmatmul.msk.f32.gmra.mxu1 %vm246_vm1, %v1961_v47  ;;  %3296 = vmatmul.msk.f32.gmra.mxu2 %vm246_vm1, %v1963_v21  ;;  %v2584_v47 = vld [vmem:[%s3487_s27 + $0x46] sm:$0xff] }
 0x192   : > { %3334 = vmatmul.msk.f32.gmra.mxu3 %vm246_vm1, %v2273_v34  ;;  %3372 = vmatmul.msk.f32.gmra.mxu0 %vm246_vm1, %v2583_v22  ;;  %v1965_v12 = vld [vmem:[%s3487_s27 + $0x4c] sm:$0xff] }
 0x194   : > { %v955_v39 = vpop.f32.mrf.mxu2 }
 0x195   : > { %v1017_v63 = vadd.f32 %v955_v39, %v682_v37  ;;  %v1265_v60 = vpop.f32.mrf.mxu3  ;;  %v2276_v37 = vld [vmem:[%s3487_s27 + $0x55] sm:$0xff] }
 0x196   : > { %v684_v18 = vpop.f32.mrf.mxu1 }
 0x197   : > { %v1327_v28 = vadd.f32 %v1265_v60, %v1017_v63  ;;  %v1578_v49 = vpop.f32.mrf.mxu0  ;;  %v685_v44 = vadd.f32 %v684_v18, %v3729_v51 }
 0x199   : > { %v4006_v0 = vadd.f32 %v1575_v42, %v1327_v28  ;;  %3259 = vmatmul.msk.f32.gmra.mxu1 %vm246_vm1, %v1962_v5  ;;  %3297 = vmatmul.msk.f32.gmra.mxu2 %vm246_vm1, %v1964_v50  ;;  %v2585_v5 = vld [vmem:[%s3487_s27 + $0x4e] sm:$0xff] }
 0x19a   : > { %3335 = vmatmul.msk.f32.gmra.mxu3 %vm246_vm1, %v2274_v23  ;;  %3373 = vmatmul.msk.f32.gmra.mxu0 %vm246_vm1, %v2584_v47  ;;  %v1966_v42 = vld [vmem:[%s3487_s27 + $0x54] sm:$0xff] }
 0x19c   : > { %v958_v46 = vpop.f32.mrf.mxu2 }
 0x19d   : > { %v1018_v4 = vadd.f32 %v958_v46, %v685_v44  ;;  %v1268_v9 = vpop.f32.mrf.mxu3  ;;  %v2277_v44 = vld [vmem:[%s3487_s27 + $0x5d] sm:$0xff] }
 0x19e   : > { %v687_v14 = vpop.f32.mrf.mxu1 }
 0x19f   : > { %v1328_v35 = vadd.f32 %v1268_v9, %v1018_v4  ;;  %v1581_v56 = vpop.f32.mrf.mxu0  ;;  %v688_v51 = vadd.f32 %v687_v14, %v3744_v58 }
 0x1a1   : > { %v4016_v53 = vadd.f32 %v1578_v49, %v1328_v35  ;;  %3260 = vmatmul.msk.f32.gmra.mxu1 %vm246_vm1, %v1963_v21  ;;  %3298 = vmatmul.msk.f32.gmra.mxu2 %vm246_vm1, %v1965_v12  ;;  %v2586_v21 = vld [vmem:[%s3487_s27 + $0x56] sm:$0xff] }
 0x1a2   : > { %3336 = vmatmul.msk.f32.gmra.mxu3 %vm246_vm1, %v2275_v30  ;;  %3374 = vmatmul.msk.f32.gmra.mxu0 %vm246_vm1, %v2585_v5  ;;  %v1967_v49 = vld [vmem:[%s3487_s27 + $0x5c] sm:$0xff] }
 0x1a4   : > { %v961_v11 = vpop.f32.mrf.mxu2 }
 0x1a5   : > { %v1019_v27 = vadd.f32 %v961_v11, %v688_v51  ;;  %v1271_v16 = vpop.f32.mrf.mxu3  ;;  %v2278_v51 = vld [vmem:[%s3487_s27 + $0x65] sm:$0xff] }
 0x1a6   : > { %v690_v34 = vpop.f32.mrf.mxu1 }
 0x1a7   : > { %v1329_v22 = vadd.f32 %v1271_v16, %v1019_v27  ;;  %v1584_v39 = vpop.f32.mrf.mxu0  ;;  %v691_v58 = vadd.f32 %v690_v34, %v3759_v1 }
 0x1a9   : > { %v4026_v63 = vadd.f32 %v1581_v56, %v1329_v22  ;;  %3261 = vmatmul.msk.f32.gmra.mxu1 %vm246_vm1, %v1964_v50  ;;  %3299 = vmatmul.msk.f32.gmra.mxu2 %vm246_vm1, %v1966_v42  ;;  %v2587_v50 = vld [vmem:[%s3487_s27 + $0x5e] sm:$0xff] }
 0x1aa   : > { %3337 = vmatmul.msk.f32.gmra.mxu3 %vm246_vm1, %v2276_v37  ;;  %3375 = vmatmul.msk.f32.gmra.mxu0 %vm246_vm1, %v2586_v21  ;;  %v1968_v56 = vld [vmem:[%s3487_s27 + $0x64] sm:$0xff] }
 0x1ac   : > { %v964_v60 = vpop.f32.mrf.mxu2 }
 0x1ad   : > { %v1020_v18 = vadd.f32 %v964_v60, %v691_v58  ;;  %v1274_v28 = vpop.f32.mrf.mxu3  ;;  %v2279_v58 = vld [vmem:[%s3487_s27 + $0x6d] sm:$0xff] }
 0x1ae   : > { %v693_v23 = vpop.f32.mrf.mxu1 }
 0x1af   : > { %v1330_v47 = vadd.f32 %v1274_v28, %v1020_v18  ;;  %v1587_v46 = vpop.f32.mrf.mxu0  ;;  %v694_v1 = vadd.f32 %v693_v23, %v3641_v10 }
 0x1b1   : > { %v4036_v4 = vadd.f32 %v1584_v39, %v1330_v47  ;;  %3262 = vmatmul.msk.f32.gmra.mxu1 %vm246_vm1, %v1965_v12  ;;  %3300 = vmatmul.msk.f32.gmra.mxu2 %vm246_vm1, %v1967_v49  ;;  %v2588_v12 = vld [vmem:[%s3487_s27 + $0x66] sm:$0xff] }
 0x1b2   : > { %3338 = vmatmul.msk.f32.gmra.mxu3 %vm246_vm1, %v2277_v44  ;;  %3376 = vmatmul.msk.f32.gmra.mxu0 %vm246_vm1, %v2587_v50  ;;  %v1969_v39 = vld [vmem:[%s3487_s27 + $0x6c] sm:$0xff] }
 0x1b4   : > { %v967_v9 = vpop.f32.mrf.mxu2 }
 0x1b5   : > { %v1021_v14 = vadd.f32 %v967_v9, %v694_v1  ;;  %v1277_v35 = vpop.f32.mrf.mxu3  ;;  %v2280_v1 = vld [vmem:[%s3487_s27 + $0x75] sm:$0xff] }
 0x1b6   : > { %v696_v30 = vpop.f32.mrf.mxu1 }
 0x1b7   : > { %v1331_v5 = vadd.f32 %v1277_v35, %v1021_v14  ;;  %v1590_v11 = vpop.f32.mrf.mxu0  ;;  %v697_v10 = vadd.f32 %v696_v30, %v3656_v17 }
 0x1b9   : > { %v4046_v27 = vadd.f32 %v1587_v46, %v1331_v5  ;;  %3263 = vmatmul.msk.f32.gmra.mxu1 %vm246_vm1, %v1966_v42  ;;  %3301 = vmatmul.msk.f32.gmra.mxu2 %vm246_vm1, %v1968_v56  ;;  %v2589_v42 = vld [vmem:[%s3487_s27 + $0x6e] sm:$0xff] }
 0x1ba   : > { %3339 = vmatmul.msk.f32.gmra.mxu3 %vm246_vm1, %v2278_v51  ;;  %3377 = vmatmul.msk.f32.gmra.mxu0 %vm246_vm1, %v2588_v12  ;;  %v1970_v46 = vld [vmem:[%s3487_s27 + $0x74] sm:$0xff] }
 0x1bc   : > { %v970_v16 = vpop.f32.mrf.mxu2 }
 0x1bd   : > { %v1022_v34 = vadd.f32 %v970_v16, %v697_v10  ;;  %v1280_v22 = vpop.f32.mrf.mxu3  ;;  %v2281_v10 = vld [vmem:[%s3487_s27 + $0x7d] sm:$0xff] }
 0x1be   : > { %v699_v37 = vpop.f32.mrf.mxu1 }
 0x1bf   : > { %v1332_v21 = vadd.f32 %v1280_v22, %v1022_v34  ;;  %v1593_v60 = vpop.f32.mrf.mxu0  ;;  %v700_v17 = vadd.f32 %v699_v37, %v3671_v24 }
 0x1c1   : > { %v4056_v18 = vadd.f32 %v1590_v11, %v1332_v21  ;;  %3264 = vmatmul.msk.f32.gmra.mxu1 %vm246_vm1, %v1967_v49  ;;  %3302 = vmatmul.msk.f32.gmra.mxu2 %vm246_vm1, %v1969_v39  ;;  %v2590_v49 = vld [vmem:[%s3487_s27 + $0x76] sm:$0xff] }
 0x1c2   : > { %3340 = vmatmul.msk.f32.gmra.mxu3 %vm246_vm1, %v2279_v58  ;;  %3378 = vmatmul.msk.f32.gmra.mxu0 %vm246_vm1, %v2589_v42  ;;  %v1971_v11 = vld [vmem:[%s3487_s27 + $0x7c] sm:$0xff] }
 0x1c4   : > { %v973_v28 = vpop.f32.mrf.mxu2 }
 0x1c5   : > { %v1023_v23 = vadd.f32 %v973_v28, %v700_v17  ;;  %v1283_v47 = vpop.f32.mrf.mxu3  ;;  %v2282_v17 = vld [vmem:[%s3487_s27 + $0x85] sm:$0xff] }
 0x1c6   : > { %v702_v44 = vpop.f32.mrf.mxu1 }
 0x1c7   : > { %v1333_v50 = vadd.f32 %v1283_v47, %v1023_v23  ;;  %v1596_v9 = vpop.f32.mrf.mxu0  ;;  %v703_v24 = vadd.f32 %v702_v44, %v3686_v31 }
 0x1c9   : > { %v4066_v14 = vadd.f32 %v1593_v60, %v1333_v50  ;;  %3265 = vmatmul.msk.f32.gmra.mxu1 %vm246_vm1, %v1968_v56  ;;  %3303 = vmatmul.msk.f32.gmra.mxu2 %vm246_vm1, %v1970_v46  ;;  %v2591_v56 = vld [vmem:[%s3487_s27 + $0x7e] sm:$0xff] }
 0x1ca   : > { %3341 = vmatmul.msk.f32.gmra.mxu3 %vm246_vm1, %v2280_v1  ;;  %3379 = vmatmul.msk.f32.gmra.mxu0 %vm246_vm1, %v2590_v49  ;;  %v1972_v60 = vld [vmem:[%s3487_s27 + $0x84] sm:$0xff] }
 0x1cc   : > { %v976_v35 = vpop.f32.mrf.mxu2 }
 0x1cd   : > { %v1024_v30 = vadd.f32 %v976_v35, %v703_v24  ;;  %v1286_v5 = vpop.f32.mrf.mxu3  ;;  %v2283_v24 = vld [vmem:[%s3487_s27 + $0x8d] sm:$0xff] }
 0x1ce   : > { %v705_v51 = vpop.f32.mrf.mxu1 }
 0x1cf   : > { %v1334_v12 = vadd.f32 %v1286_v5, %v1024_v30  ;;  %v1599_v16 = vpop.f32.mrf.mxu0  ;;  %v706_v31 = vadd.f32 %v705_v51, %v3701_v38 }
 0x1d1   : > { %v4076_v34 = vadd.f32 %v1596_v9, %v1334_v12  ;;  %3266 = vmatmul.msk.f32.gmra.mxu1 %vm246_vm1, %v1969_v39  ;;  %3304 = vmatmul.msk.f32.gmra.mxu2 %vm246_vm1, %v1971_v11  ;;  %v2592_v39 = vld [vmem:[%s3487_s27 + $0x86] sm:$0xff] }
 0x1d2   : > { %3342 = vmatmul.msk.f32.gmra.mxu3 %vm246_vm1, %v2281_v10  ;;  %3380 = vmatmul.msk.f32.gmra.mxu0 %vm246_vm1, %v2591_v56  ;;  %v1973_v9 = vld [vmem:[%s3487_s27 + $0x8c] sm:$0xff] }
 0x1d4   : > { %v979_v22 = vpop.f32.mrf.mxu2 }
 0x1d5   : > { %v1025_v37 = vadd.f32 %v979_v22, %v706_v31  ;;  %v1289_v21 = vpop.f32.mrf.mxu3  ;;  %v2284_v31 = vld [vmem:[%s3487_s27 + $0x95] sm:$0xff] }
 0x1d6   : > { %v708_v58 = vpop.f32.mrf.mxu1 }
 0x1d7   : > { %v1335_v42 = vadd.f32 %v1289_v21, %v1025_v37  ;;  %v1602_v28 = vpop.f32.mrf.mxu0  ;;  %v709_v38 = vadd.f32 %v708_v58, %v3716_v45 }
 0x1d9   : > { %v4086_v23 = vadd.f32 %v1599_v16, %v1335_v42  ;;  %3267 = vmatmul.msk.f32.gmra.mxu1 %vm246_vm1, %v1970_v46  ;;  %3305 = vmatmul.msk.f32.gmra.mxu2 %vm246_vm1, %v1972_v60  ;;  %v2593_v46 = vld [vmem:[%s3487_s27 + $0x8e] sm:$0xff] }
 0x1da   : > { %3343 = vmatmul.msk.f32.gmra.mxu3 %vm246_vm1, %v2282_v17  ;;  %3381 = vmatmul.msk.f32.gmra.mxu0 %vm246_vm1, %v2592_v39  ;;  %v1974_v16 = vld [vmem:[%s3487_s27 + $0x94] sm:$0xff] }
 0x1dc   : > { %v982_v47 = vpop.f32.mrf.mxu2 }
 0x1dd   : > { %v1026_v44 = vadd.f32 %v982_v47, %v709_v38  ;;  %v1292_v50 = vpop.f32.mrf.mxu3  ;;  %v2285_v38 = vld [vmem:[%s3487_s27 + $0x9d] sm:$0xff] }
 0x1de   : > { %v711_v1 = vpop.f32.mrf.mxu1 }
 0x1df   : > { %v1336_v49 = vadd.f32 %v1292_v50, %v1026_v44  ;;  %v1605_v35 = vpop.f32.mrf.mxu0  ;;  %v712_v45 = vadd.f32 %v711_v1, %v3731_v52 }
 0x1e1   : > { %v4096_v30 = vadd.f32 %v1602_v28, %v1336_v49  ;;  %3268 = vmatmul.msk.f32.gmra.mxu1 %vm246_vm1, %v1971_v11  ;;  %3306 = vmatmul.msk.f32.gmra.mxu2 %vm246_vm1, %v1973_v9  ;;  %v2594_v11 = vld [vmem:[%s3487_s27 + $0x96] sm:$0xff] }
 0x1e2   : > { %3344 = vmatmul.msk.f32.gmra.mxu3 %vm246_vm1, %v2283_v24  ;;  %3382 = vmatmul.msk.f32.gmra.mxu0 %vm246_vm1, %v2593_v46  ;;  %v1975_v28 = vld [vmem:[%s3487_s27 + $0x9c] sm:$0xff] }
 0x1e4   : > { %v985_v5 = vpop.f32.mrf.mxu2 }
 0x1e5   : > { %v1027_v51 = vadd.f32 %v985_v5, %v712_v45  ;;  %v1295_v12 = vpop.f32.mrf.mxu3  ;;  %v2286_v45 = vld [vmem:[%s3487_s27 + $0xa5] sm:$0xff] }
 0x1e6   : > { %v714_v10 = vpop.f32.mrf.mxu1 }
 0x1e7   : > { %v1337_v56 = vadd.f32 %v1295_v12, %v1027_v51  ;;  %v1608_v22 = vpop.f32.mrf.mxu0  ;;  %v715_v52 = vadd.f32 %v714_v10, %v3746_v59  ;;  %v2596_v51 = vld [vmem:[%s3487_s27 + $0xa6] sm:$0xff] }
 0x1e9   : > { %v4106_v37 = vadd.f32 %v1605_v35, %v1337_v56  ;;  %3269 = vmatmul.msk.f32.gmra.mxu1 %vm246_vm1, %v1972_v60  ;;  %3307 = vmatmul.msk.f32.gmra.mxu2 %vm246_vm1, %v1974_v16  ;;  %v2595_v60 = vld [vmem:[%s3487_s27 + $0x9e] sm:$0xff] }
 0x1ea   : > { %3345 = vmatmul.msk.f32.gmra.mxu3 %vm246_vm1, %v2284_v31  ;;  %3383 = vmatmul.msk.f32.gmra.mxu0 %vm246_vm1, %v2594_v11  ;;  %v1976_v35 = vld [vmem:[%s3487_s27 + $0xa4] sm:$0xff] }
 0x1ec   : > { %v988_v21 = vpop.f32.mrf.mxu2 }
 0x1ed   : > { %v1028_v58 = vadd.f32 %v988_v21, %v715_v52  ;;  %v1298_v42 = vpop.f32.mrf.mxu3  ;;  %v4137_v52 = vld [vmem:[%s4391_s2] ss:$0 sm:$0xff] }
 0x1ee   : > { %v717_v17 = vpop.f32.mrf.mxu1 }
 0x1ef   : > { %v1338_v39 = vadd.f32 %v1298_v42, %v1028_v58  ;;  %v1611_v47 = vpop.f32.mrf.mxu0  ;;  %v718_v59 = vadd.f32 %v717_v17, %v3761_v2  ;;  %v2597_v58 = vld [vmem:[%s3487_s27 + $0xae] sm:$0xff] }
 0x1f1   : > { %v4116_v44 = vadd.f32 %v1608_v22, %v1338_v39  ;;  %3270 = vmatmul.msk.f32.gmra.mxu1 %vm246_vm1, %v1973_v9  ;;  %3308 = vmatmul.msk.f32.gmra.mxu2 %vm246_vm1, %v1975_v28  ;;  %v1977_v22 = vld [vmem:[%s3487_s27 + $0xac] sm:$0xff] }
 0x1f2   : > { %3346 = vmatmul.msk.f32.gmra.mxu3 %vm246_vm1, %v2285_v38  ;;  %3384 = vmatmul.msk.f32.gmra.mxu0 %vm246_vm1, %v2595_v60 }
 0x1f4   : > { %v991_v50 = vpop.f32.mrf.mxu2 }
 0x1f5   : > { %v1029_v1 = vadd.f32 %v991_v50, %v718_v59  ;;  %v1301_v49 = vpop.f32.mrf.mxu3  ;;  %v1978_v59 = vld [vmem:[%s3487_s27 + $0xb4] sm:$0xff] }
 0x1f6   : > { %v1816_v24 = vpop.f32.mrf.mxu1 }
 0x1f7   : > { %v1339_v46 = vadd.f32 %v1301_v49, %v1029_v1  ;;  %v2746_v5 = vpop.f32.mrf.mxu0  ;;  %v1924_v2 = vadd.f32 %v1816_v24, %v3774_v36  ;;  %v2288_v1 = vld [vmem:[%s3487_s27 + $0xb5] sm:$0xff] }
 0x1f8   : > { %v2598_v49 = vld [vmem:[%s3487_s27 + $0xb6] sm:$0xff] }
 0x1f9   : > { %v4126_v9 = vadd.f32 %v1611_v47, %v1339_v46  ;;  %3271 = vmatmul.msk.f32.gmra.mxu1 %vm246_vm1, %v1974_v16  ;;  %3309 = vmatmul.msk.f32.gmra.mxu2 %vm246_vm1, %v1976_v35  ;;  %v2287_v16 = vld [vmem:[%s3487_s27 + $0xad] sm:$0xff] }
 0x1fa   : > { %3347 = vmatmul.msk.f32.gmra.mxu3 %vm246_vm1, %v2286_v45  ;;  %3385 = vmatmul.msk.f32.gmra.mxu0 %vm246_vm1, %v2596_v51 }
 0x1fc   : > { %v2126_v12 = vpop.f32.mrf.mxu2 }
 0x1fd   : > { %v2234_v10 = vadd.f32 %v2126_v12, %v1924_v2  ;;  %v2436_v56 = vpop.f32.mrf.mxu3 }
 0x1fe   : > { %v1819_v31 = vpop.f32.mrf.mxu1 }
 0x1ff   : > { %v2544_v11 = vadd.f32 %v2436_v56, %v2234_v10  ;;  %v2749_v21 = vpop.f32.mrf.mxu0  ;;  %v1925_v36 = vadd.f32 %v1819_v31, %v3784_v61  ;;  %v1979_v56 = vld [vmem:[%s3487_s27 + $0xbc] sm:$0xff] }
 0x201   : > { %v2854_v42 = vadd.f32 %v2746_v5, %v2544_v11  ;;  %3272 = vmatmul.msk.f32.gmra.mxu1 %vm246_vm1, %v1975_v28  ;;  %3310 = vmatmul.msk.f32.gmra.mxu2 %vm246_vm1, %v1977_v22 }
 0x202   : > { %3348 = vmatmul.msk.f32.gmra.mxu3 %vm246_vm1, %v2287_v16  ;;  %3386 = vmatmul.msk.f32.gmra.mxu0 %vm246_vm1, %v2597_v58  ;;  %v2599_v16 = vld [vmem:[%s3487_s27 + $0xbe] sm:$0xff] }
 0x203   : > { %v2894_v17 = vadd.f32 %v4137_v52, %v2854_v42 }
 0x204   : > { %v2129_v39 = vpop.f32.mrf.mxu2 }
 0x205   : > { %v2930_v38 = vmax.f32 %v2894_v17, 0.0  ;;  %v2235_v28 = vadd.f32 %v2129_v39, %v1925_v36  ;;  %v2439_v47 = vpop.f32.mrf.mxu3 }
 0x206   : > { %v1822_v60 = vpop.f32.mrf.mxu1 }
 0x207   : > { %2966 = vst [vmem:[%s4151_s16] sm:$0xff] %v2930_v38  ;;  %v2545_v50 = vadd.f32 %v2439_v47, %v2235_v28  ;;  %v2752_v61 = vpop.f32.mrf.mxu0  ;;  %v1926_v46 = vadd.f32 %v1822_v60, %v3794_v20  ;;  %v1980_v28 = vld [vmem:[%s3487_s27 + $0xc4] sm:$0xff] }
 0x209   : > { %v2855_v24 = vadd.f32 %v2749_v21, %v2545_v50  ;;  %3273 = vmatmul.msk.f32.gmra.mxu1 %vm246_vm1, %v1976_v35  ;;  %3311 = vmatmul.msk.f32.gmra.mxu2 %vm246_vm1, %v1978_v59  ;;  %v2289_v35 = vld [vmem:[%s3487_s27 + $0xbd] sm:$0xff]  ;;  %v2600_v50 = vld [vmem:[%s3487_s27 + $0xc6] sm:$0xff] }
 0x20a   : > { %3349 = vmatmul.msk.f32.gmra.mxu3 %vm246_vm1, %v2288_v1  ;;  %3387 = vmatmul.msk.f32.gmra.mxu0 %vm246_vm1, %v2598_v49 }
 0x20b   : > { %v2895_v45 = vadd.f32 %v4137_v52, %v2855_v24 }
 0x20c   : > { %v2132_v5 = vpop.f32.mrf.mxu2 }
 0x20d   : > { %v2931_v51 = vmax.f32 %v2895_v45, 0.0  ;;  %v2236_v2 = vadd.f32 %v2132_v5, %v1926_v46  ;;  %v2442_v12 = vpop.f32.mrf.mxu3 }
 0x20e   : > { %v1825_v10 = vpop.f32.mrf.mxu1 }
 0x20f   : > { %2967 = vst [vmem:[%s4151_s16 + $0x8] sm:$0xff] %v2931_v51  ;;  %v2546_v31 = vadd.f32 %v2442_v12, %v2236_v2  ;;  %v2755_v11 = vpop.f32.mrf.mxu0  ;;  %v1927_v20 = vadd.f32 %v1825_v10, %v3804_v43  ;;  %v1981_v51 = vld [vmem:[%s3487_s27 + $0xcc] sm:$0xff] }
 0x210   : > { %v2601_v10 = vld [vmem:[%s3487_s27 + $0xce] sm:$0xff] }
 0x211   : > { %v2856_v21 = vadd.f32 %v2752_v61, %v2546_v31  ;;  %3274 = vmatmul.msk.f32.gmra.mxu1 %vm246_vm1, %v1977_v22  ;;  %3312 = vmatmul.msk.f32.gmra.mxu2 %vm246_vm1, %v1979_v56  ;;  %v2290_v22 = vld [vmem:[%s3487_s27 + $0xc5] sm:$0xff] }
 0x212   : > { %3350 = vmatmul.msk.f32.gmra.mxu3 %vm246_vm1, %v2289_v35  ;;  %3388 = vmatmul.msk.f32.gmra.mxu0 %vm246_vm1, %v2599_v16 }
 0x213   : > { %v2896_v58 = vadd.f32 %v4137_v52, %v2856_v21 }
 0x214   : > { %v2135_v42 = vpop.f32.mrf.mxu2 }
 0x215   : > { %v2932_v36 = vmax.f32 %v2896_v58, 0.0  ;;  %v2237_v17 = vadd.f32 %v2135_v42, %v1927_v20  ;;  %v2445_v39 = vpop.f32.mrf.mxu3  ;;  %v1982_v42 = vld [vmem:[%s3487_s27 + $0xd4] sm:$0xff] }
 0x216   : > { %v1828_v38 = vpop.f32.mrf.mxu1 }
 0x217   : > { %2968 = vst [vmem:[%s4151_s16 + $0x10] sm:$0xff] %v2932_v36  ;;  %v2547_v47 = vadd.f32 %v2445_v39, %v2237_v17  ;;  %v2758_v60 = vpop.f32.mrf.mxu0  ;;  %v1928_v43 = vadd.f32 %v1828_v38, %v3814_v3  ;;  %v2602_v39 = vld [vmem:[%s3487_s27 + $0xd6] sm:$0xff] }
 0x219   : > { %v2857_v1 = vadd.f32 %v2755_v11, %v2547_v47  ;;  %3275 = vmatmul.msk.f32.gmra.mxu1 %vm246_vm1, %v1978_v59  ;;  %3313 = vmatmul.msk.f32.gmra.mxu2 %vm246_vm1, %v1980_v28  ;;  %v2291_v59 = vld [vmem:[%s3487_s27 + $0xcd] sm:$0xff] }
 0x21a   : > { %3351 = vmatmul.msk.f32.gmra.mxu3 %vm246_vm1, %v2290_v22  ;;  %3389 = vmatmul.msk.f32.gmra.mxu0 %vm246_vm1, %v2600_v50 }
 0x21b   : > { %v2897_v61 = vadd.f32 %v4137_v52, %v2857_v1 }
 0x21c   : > { %v2138_v49 = vpop.f32.mrf.mxu2 }
 0x21d   : > { %v2933_v24 = vmax.f32 %v2897_v61, 0.0  ;;  %v2238_v46 = vadd.f32 %v2138_v49, %v1928_v43  ;;  %v2448_v45 = vpop.f32.mrf.mxu3  ;;  %v1983_v61 = vld [vmem:[%s3487_s27 + $0xdc] sm:$0xff] }
 0x21e   : > { %v1831_v5 = vpop.f32.mrf.mxu1 }
 0x21f   : > { %2969 = vst [vmem:[%s4151_s16 + $0x18] sm:$0xff] %v2933_v24  ;;  %v2548_v2 = vadd.f32 %v2448_v45, %v2238_v46  ;;  %v2761_v12 = vpop.f32.mrf.mxu0  ;;  %v1929_v3 = vadd.f32 %v1831_v5, %v3824_v26  ;;  %v2603_v46 = vld [vmem:[%s3487_s27 + $0xde] sm:$0xff] }
 0x221   : > { %v2858_v31 = vadd.f32 %v2758_v60, %v2548_v2  ;;  %3276 = vmatmul.msk.f32.gmra.mxu1 %vm246_vm1, %v1979_v56  ;;  %3314 = vmatmul.msk.f32.gmra.mxu2 %vm246_vm1, %v1981_v51  ;;  %v2292_v56 = vld [vmem:[%s3487_s27 + $0xd5] sm:$0xff] }
 0x222   : > { %3352 = vmatmul.msk.f32.gmra.mxu3 %vm246_vm1, %v2291_v59  ;;  %3390 = vmatmul.msk.f32.gmra.mxu0 %vm246_vm1, %v2601_v10 }
 0x223   : > { %v2898_v35 = vadd.f32 %v4137_v52, %v2858_v31 }
 0x224   : > { %v2141_v11 = vpop.f32.mrf.mxu2 }
 0x225   : > { %v2934_v16 = vmax.f32 %v2898_v35, 0.0  ;;  %v2239_v21 = vadd.f32 %v2141_v11, %v1929_v3  ;;  %v2451_v20 = vpop.f32.mrf.mxu3  ;;  %v1984_v3 = vld [vmem:[%s3487_s27 + $0xe4] sm:$0xff] }
 0x226   : > { %v1834_v58 = vpop.f32.mrf.mxu1 }
 0x227   : > { %2970 = vst [vmem:[%s4151_s16 + $0x20] sm:$0xff] %v2934_v16  ;;  %v2549_v36 = vadd.f32 %v2451_v20, %v2239_v21  ;;  %v2764_v17 = vpop.f32.mrf.mxu0  ;;  %v1930_v26 = vadd.f32 %v1834_v58, %v3834_v48  ;;  %v2604_v16 = vld [vmem:[%s3487_s27 + $0xe6] sm:$0xff] }
 0x229   : > { %v2859_v38 = vadd.f32 %v2761_v12, %v2549_v36  ;;  %3277 = vmatmul.msk.f32.gmra.mxu1 %vm246_vm1, %v1980_v28  ;;  %3315 = vmatmul.msk.f32.gmra.mxu2 %vm246_vm1, %v1982_v42  ;;  %v2293_v28 = vld [vmem:[%s3487_s27 + $0xdd] sm:$0xff] }
 0x22a   : > { %3353 = vmatmul.msk.f32.gmra.mxu3 %vm246_vm1, %v2292_v56  ;;  %3391 = vmatmul.msk.f32.gmra.mxu0 %vm246_vm1, %v2602_v39 }
 0x22b   : > { %v2899_v47 = vadd.f32 %v4137_v52, %v2859_v38  ;;  %v1985_v38 = vld [vmem:[%s3487_s27 + $0xec] sm:$0xff] }
 0x22c   : > { %v2144_v22 = vpop.f32.mrf.mxu2 }
 0x22d   : > { %v2935_v60 = vmax.f32 %v2899_v47, 0.0  ;;  %v2240_v50 = vadd.f32 %v2144_v22, %v1930_v26  ;;  %v2454_v1 = vpop.f32.mrf.mxu3  ;;  %v2605_v22 = vld [vmem:[%s3487_s27 + $0xee] sm:$0xff] }
 0x22e   : > { %v1837_v43 = vpop.f32.mrf.mxu1 }
 0x22f   : > { %2971 = vst [vmem:[%s4151_s16 + $0x28] sm:$0xff] %v2935_v60  ;;  %v2550_v49 = vadd.f32 %v2454_v1, %v2240_v50  ;;  %v2767_v24 = vpop.f32.mrf.mxu0  ;;  %v1931_v48 = vadd.f32 %v1837_v43, %v3844_v8 }
 0x231   : > { %v2860_v45 = vadd.f32 %v2764_v17, %v2550_v49  ;;  %3278 = vmatmul.msk.f32.gmra.mxu1 %vm246_vm1, %v1981_v51  ;;  %3316 = vmatmul.msk.f32.gmra.mxu2 %vm246_vm1, %v1983_v61  ;;  %v2294_v51 = vld [vmem:[%s3487_s27 + $0xe5] sm:$0xff] }
 0x232   : > { %3354 = vmatmul.msk.f32.gmra.mxu3 %vm246_vm1, %v2293_v28  ;;  %3392 = vmatmul.msk.f32.gmra.mxu0 %vm246_vm1, %v2603_v46  ;;  %v1986_v46 = vld [vmem:[%s3487_s27 + $0xf4] sm:$0xff] }
 0x233   : > { %v2900_v5 = vadd.f32 %v4137_v52, %v2860_v45 }
 0x234   : > { %v2147_v2 = vpop.f32.mrf.mxu2 }
 0x235   : > { %v2936_v59 = vmax.f32 %v2900_v5, 0.0  ;;  %v2241_v12 = vadd.f32 %v2147_v2, %v1931_v48  ;;  %v2457_v10 = vpop.f32.mrf.mxu3  ;;  %v2606_v5 = vld [vmem:[%s3487_s27 + $0xf6] sm:$0xff] }
 0x236   : > { %v1840_v31 = vpop.f32.mrf.mxu1 }
 0x237   : > { %2972 = vst [vmem:[%s4151_s16 + $0x30] sm:$0xff] %v2936_v59  ;;  %v2551_v35 = vadd.f32 %v2457_v10, %v2241_v12  ;;  %v2770_v11 = vpop.f32.mrf.mxu0  ;;  %v1932_v8 = vadd.f32 %v1840_v31, %v3854_v33 }
 0x239   : > { %v2861_v21 = vadd.f32 %v2767_v24, %v2551_v35  ;;  %3279 = vmatmul.msk.f32.gmra.mxu1 %vm246_vm1, %v1982_v42  ;;  %3317 = vmatmul.msk.f32.gmra.mxu2 %vm246_vm1, %v1984_v3  ;;  %v2295_v42 = vld [vmem:[%s3487_s27 + $0xed] sm:$0xff] }
 0x23a   : > { %3355 = vmatmul.msk.f32.gmra.mxu3 %vm246_vm1, %v2294_v51  ;;  %3393 = vmatmul.msk.f32.gmra.mxu0 %vm246_vm1, %v2604_v16 }
 0x23b   : > { %v2901_v20 = vadd.f32 %v4137_v52, %v2861_v21 }
 0x23c   : > { %v2150_v58 = vpop.f32.mrf.mxu2 }
 0x23d   : > { %v2937_v36 = vmax.f32 %v2901_v20, 0.0  ;;  %v2242_v56 = vadd.f32 %v2150_v58, %v1932_v8  ;;  %v2460_v17 = vpop.f32.mrf.mxu3  ;;  %v2607_v8 = vld [vmem:[%s3487_s27 + $0xfe] sm:$0xff] }
 0x23e   : > { %v1843_v39 = vpop.f32.mrf.mxu1 }
 0x23f   : > { %2973 = vst [vmem:[%s4151_s16 + $0x38] sm:$0xff] %v2937_v36  ;;  %v2552_v26 = vadd.f32 %v2460_v17, %v2242_v56  ;;  %v2773_v47 = vpop.f32.mrf.mxu0  ;;  %v1933_v33 = vadd.f32 %v1843_v39, %v3864_v55 }
 0x241   : > { %v2862_v60 = vadd.f32 %v2770_v11, %v2552_v26  ;;  %3280 = vmatmul.msk.f32.gmra.mxu1 %vm246_vm1, %v1983_v61  ;;  %3318 = vmatmul.msk.f32.gmra.mxu2 %vm246_vm1, %v1985_v38  ;;  %v2296_v61 = vld [vmem:[%s3487_s27 + $0xf5] sm:$0xff] }
 0x242   : > { %3356 = vmatmul.msk.f32.gmra.mxu3 %vm246_vm1, %v2295_v42  ;;  %3394 = vmatmul.msk.f32.gmra.mxu0 %vm246_vm1, %v2605_v22  ;;  %v1987_v11 = vld [vmem:[%s3487_s27 + $0xfc] sm:$0xff]  ;;  %v1988_v42 = vld [vmem:[%s3487_s27 + $0x104] sm:$0xff] }
 0x243   : > { %v2902_v50 = vadd.f32 %v4137_v52, %v2862_v60  ;;  %v2608_v60 = vld [vmem:[%s3487_s27 + $0x106] sm:$0xff] }
 0x244   : > { %v2153_v1 = vpop.f32.mrf.mxu2 }
 0x245   : > { %v2938_v43 = vmax.f32 %v2902_v50, 0.0  ;;  %v2243_v49 = vadd.f32 %v2153_v1, %v1933_v33  ;;  %v2463_v28 = vpop.f32.mrf.mxu3 }
 0x246   : > { %v1846_v24 = vpop.f32.mrf.mxu1 }
 0x247   : > { %2974 = vst [vmem:[%s4151_s16 + $0x40] sm:$0xff] %v2938_v43  ;;  %v2553_v45 = vadd.f32 %v2463_v28, %v2243_v49  ;;  %v2776_v48 = vpop.f32.mrf.mxu0  ;;  %v1934_v55 = vadd.f32 %v1846_v24, %v3874_v15 }
 0x249   : > { %v2863_v2 = vadd.f32 %v2773_v47, %v2553_v45  ;;  %3281 = vmatmul.msk.f32.gmra.mxu1 %vm246_vm1, %v1984_v3  ;;  %3319 = vmatmul.msk.f32.gmra.mxu2 %vm246_vm1, %v1986_v46  ;;  %v2297_v3 = vld [vmem:[%s3487_s27 + $0xfd] sm:$0xff]  ;;  %v1989_v45 = vld [vmem:[%s3487_s27 + $0x10c] sm:$0xff] }
 0x24a   : > { %3357 = vmatmul.msk.f32.gmra.mxu3 %vm246_vm1, %v2296_v61  ;;  %3395 = vmatmul.msk.f32.gmra.mxu0 %vm246_vm1, %v2606_v5  ;;  %v2609_v5 = vld [vmem:[%s3487_s27 + $0x10e] sm:$0xff] }
 0x24b   : > { %v2903_v59 = vadd.f32 %v4137_v52, %v2863_v2 }
 0x24c   : > { %v2156_v12 = vpop.f32.mrf.mxu2 }
 0x24d   : > { %v2939_v10 = vmax.f32 %v2903_v59, 0.0  ;;  %v2244_v31 = vadd.f32 %v2156_v12, %v1934_v55  ;;  %v2466_v35 = vpop.f32.mrf.mxu3 }
 0x24e   : > { %v1849_v51 = vpop.f32.mrf.mxu1 }
 0x24f   : > { %2975 = vst [vmem:[%s4151_s16 + $0x48] sm:$0xff] %v2939_v10  ;;  %v2554_v16 = vadd.f32 %v2466_v35, %v2244_v31  ;;  %v2779_v21 = vpop.f32.mrf.mxu0  ;;  %v1935_v15 = vadd.f32 %v1849_v51, %v3884_v40  ;;  %v1990_v51 = vld [vmem:[%s3487_s27 + $0x114] sm:$0xff] }
 0x251   : > { %v2864_v20 = vadd.f32 %v2776_v48, %v2554_v16  ;;  %3282 = vmatmul.msk.f32.gmra.mxu1 %vm246_vm1, %v1985_v38  ;;  %3320 = vmatmul.msk.f32.gmra.mxu2 %vm246_vm1, %v1987_v11  ;;  %v2298_v38 = vld [vmem:[%s3487_s27 + $0x105] sm:$0xff] }
 0x252   : > { %3358 = vmatmul.msk.f32.gmra.mxu3 %vm246_vm1, %v2297_v3  ;;  %3396 = vmatmul.msk.f32.gmra.mxu0 %vm246_vm1, %v2607_v8 }
 0x253   : > { %v2904_v58 = vadd.f32 %v4137_v52, %v2864_v20 }
 0x254   : > { %v2159_v36 = vpop.f32.mrf.mxu2 }
 0x255   : > { %v2940_v56 = vmax.f32 %v2904_v58, 0.0  ;;  %v2245_v17 = vadd.f32 %v2159_v36, %v1935_v15  ;;  %v2469_v39 = vpop.f32.mrf.mxu3 }
 0x256   : > { %v1852_v26 = vpop.f32.mrf.mxu1 }
 0x257   : > { %2976 = vst [vmem:[%s4151_s16 + $0x50] sm:$0xff] %v2940_v56  ;;  %v2555_v47 = vadd.f32 %v2469_v39, %v2245_v17  ;;  %v2782_v22 = vpop.f32.mrf.mxu0  ;;  %v1936_v40 = vadd.f32 %v1852_v26, %v3894_v62  ;;  %v1991_v39 = vld [vmem:[%s3487_s27 + $0x11c] sm:$0xff] }
 0x259   : > { %v2865_v33 = vadd.f32 %v2779_v21, %v2555_v47  ;;  %3283 = vmatmul.msk.f32.gmra.mxu1 %vm246_vm1, %v1986_v46  ;;  %3321 = vmatmul.msk.f32.gmra.mxu2 %vm246_vm1, %v1988_v42  ;;  %v2299_v46 = vld [vmem:[%s3487_s27 + $0x10d] sm:$0xff]  ;;  %v2610_v21 = vld [vmem:[%s3487_s27 + $0x116] sm:$0xff] }
 0x25a   : > { %3359 = vmatmul.msk.f32.gmra.mxu3 %vm246_vm1, %v2298_v38  ;;  %3397 = vmatmul.msk.f32.gmra.mxu0 %vm246_vm1, %v2608_v60  ;;  %v2611_v38 = vld [vmem:[%s3487_s27 + $0x11e] sm:$0xff] }
 0x25b   : > { %v2905_v50 = vadd.f32 %v4137_v52, %v2865_v33 }
 0x25c   : > { %v2162_v1 = vpop.f32.mrf.mxu2 }
 0x25d   : > { %v2941_v43 = vmax.f32 %v2905_v50, 0.0  ;;  %v2246_v49 = vadd.f32 %v2162_v1, %v1936_v40  ;;  %v2472_v28 = vpop.f32.mrf.mxu3 }
 0x25e   : > { %v1855_v24 = vpop.f32.mrf.mxu1 }
 0x25f   : > { %2977 = vst [vmem:[%s4151_s16 + $0x58] sm:$0xff] %v2941_v43  ;;  %v2556_v61 = vadd.f32 %v2472_v28, %v2246_v49  ;;  %v2785_v48 = vpop.f32.mrf.mxu0  ;;  %v1937_v62 = vadd.f32 %v1855_v24, %v3904_v6  ;;  %v1992_v49 = vld [vmem:[%s3487_s27 + $0x124] sm:$0xff] }
 0x260   : > { %v2302_v24 = vld [vmem:[%s3487_s27 + $0x125] sm:$0xff] }
 0x261   : > { %v2866_v2 = vadd.f32 %v2782_v22, %v2556_v61  ;;  %3284 = vmatmul.msk.f32.gmra.mxu1 %vm246_vm1, %v1987_v11  ;;  %3322 = vmatmul.msk.f32.gmra.mxu2 %vm246_vm1, %v1989_v45  ;;  %v2300_v11 = vld [vmem:[%s3487_s27 + $0x115] sm:$0xff]  ;;  %v2612_v61 = vld [vmem:[%s3487_s27 + $0x126] sm:$0xff] }
 0x262   : > { %3360 = vmatmul.msk.f32.gmra.mxu3 %vm246_vm1, %v2299_v46  ;;  %3398 = vmatmul.msk.f32.gmra.mxu0 %vm246_vm1, %v2609_v5 }
 0x263   : > { %v2906_v55 = vadd.f32 %v4137_v52, %v2866_v2 }
 0x264   : > { %v2165_v59 = vpop.f32.mrf.mxu2 }
 0x265   : > { %v2942_v12 = vmax.f32 %v2906_v55, 0.0  ;;  %v2247_v10 = vadd.f32 %v2165_v59, %v1937_v62  ;;  %v2475_v31 = vpop.f32.mrf.mxu3 }
 0x266   : > { %v1858_v35 = vpop.f32.mrf.mxu1 }
 0x267   : > { %2978 = vst [vmem:[%s4151_s16 + $0x60] sm:$0xff] %v2942_v12  ;;  %v2557_v16 = vadd.f32 %v2475_v31, %v2247_v10  ;;  %v2788_v3 = vpop.f32.mrf.mxu0  ;;  %v1938_v6 = vadd.f32 %v1858_v35, %v3914_v29  ;;  %v1993_v12 = vld [vmem:[%s3487_s27 + $0x12c] sm:$0xff] }
 0x268   : > { %v2303_v31 = vld [vmem:[%s3487_s27 + $0x12d] sm:$0xff] }
 0x269   : > { %v2867_v8 = vadd.f32 %v2785_v48, %v2557_v16  ;;  %3285 = vmatmul.msk.f32.gmra.mxu1 %vm246_vm1, %v1988_v42  ;;  %3323 = vmatmul.msk.f32.gmra.mxu2 %vm246_vm1, %v1990_v51  ;;  %v2301_v42 = vld [vmem:[%s3487_s27 + $0x11d] sm:$0xff] }
 0x26a   : > { %3361 = vmatmul.msk.f32.gmra.mxu3 %vm246_vm1, %v2300_v11  ;;  %3399 = vmatmul.msk.f32.gmra.mxu0 %vm246_vm1, %v2610_v21 }
 0x26b   : > { %v2907_v20 = vadd.f32 %v4137_v52, %v2867_v8 }
 0x26c   : > { %v2168_v15 = vpop.f32.mrf.mxu2 }
 0x26d   : > { %v2943_v58 = vmax.f32 %v2907_v20, 0.0  ;;  %v2248_v36 = vadd.f32 %v2168_v15, %v1938_v6  ;;  %v2478_v56 = vpop.f32.mrf.mxu3  ;;  %v1994_v15 = vld [vmem:[%s3487_s27 + $0x134] sm:$0xff] }
 0x26e   : > { %v1861_v17 = vpop.f32.mrf.mxu1 }
 0x26f   : > { %2979 = vst [vmem:[%s4151_s16 + $0x68] sm:$0xff] %v2943_v58  ;;  %v2558_v26 = vadd.f32 %v2478_v56, %v2248_v36  ;;  %v2791_v47 = vpop.f32.mrf.mxu0  ;;  %v1939_v29 = vadd.f32 %v1861_v17, %v3924_v54  ;;  %v2304_v36 = vld [vmem:[%s3487_s27 + $0x135] sm:$0xff] }
 0x270   : > { %v2614_v17 = vld [vmem:[%s3487_s27 + $0x136] sm:$0xff] }
 0x271   : > { %v2868_v22 = vadd.f32 %v2788_v3, %v2558_v26  ;;  %3286 = vmatmul.msk.f32.gmra.mxu1 %vm246_vm1, %v1989_v45  ;;  %3324 = vmatmul.msk.f32.gmra.mxu2 %vm246_vm1, %v1991_v39 }
 0x272   : > { %3362 = vmatmul.msk.f32.gmra.mxu3 %vm246_vm1, %v2301_v42  ;;  %3400 = vmatmul.msk.f32.gmra.mxu0 %vm246_vm1, %v2611_v38 }
 0x273   : > { %v2908_v60 = vadd.f32 %v4137_v52, %v2868_v22 }
 0x274   : > { %v2171_v33 = vpop.f32.mrf.mxu2 }
 0x275   : > { %v2944_v40 = vmax.f32 %v2908_v60, 0.0  ;;  %v2249_v50 = vadd.f32 %v2171_v33, %v1939_v29  ;;  %v2481_v1 = vpop.f32.mrf.mxu3  ;;  %v1995_v60 = vld [vmem:[%s3487_s27 + $0x13c] sm:$0xff] }
 0x276   : > { %v1864_v43 = vpop.f32.mrf.mxu1 }
 0x277   : > { %2980 = vst [vmem:[%s4151_s16 + $0x70] sm:$0xff] %v2944_v40  ;;  %v2559_v28 = vadd.f32 %v2481_v1, %v2249_v50  ;;  %v2794_v45 = vpop.f32.mrf.mxu0  ;;  %v1940_v54 = vadd.f32 %v1864_v43, %v3934_v13  ;;  %v2305_v40 = vld [vmem:[%s3487_s27 + $0x13d] sm:$0xff] }
 0x278   : > { %v2615_v1 = vld [vmem:[%s3487_s27 + $0x13e] sm:$0xff] }
 0x279   : > { %v2869_v46 = vadd.f32 %v2791_v47, %v2559_v28  ;;  %3287 = vmatmul.msk.f32.gmra.mxu1 %vm246_vm1, %v1990_v51  ;;  %3325 = vmatmul.msk.f32.gmra.mxu2 %vm246_vm1, %v1992_v49  ;;  %v2613_v51 = vld [vmem:[%s3487_s27 + $0x12e] sm:$0xff] }
 0x27a   : > { %3363 = vmatmul.msk.f32.gmra.mxu3 %vm246_vm1, %v2302_v24  ;;  %3401 = vmatmul.msk.f32.gmra.mxu0 %vm246_vm1, %v2612_v61 }
 0x27b   : > { %v2909_v48 = vadd.f32 %v4137_v52, %v2869_v46 }
 0x27c   : > { %v2174_v5 = vpop.f32.mrf.mxu2 }
 0x27d   : > { %v2945_v2 = vmax.f32 %v2909_v48, 0.0  ;;  %v2250_v62 = vadd.f32 %v2174_v5, %v1940_v54  ;;  %v2484_v55 = vpop.f32.mrf.mxu3 }
 0x27e   : > { %v1867_v59 = vpop.f32.mrf.mxu1 }
 0x27f   : > { %2981 = vst [vmem:[%s4151_s16 + $0x78] sm:$0xff] %v2945_v2  ;;  %v2560_v10 = vadd.f32 %v2484_v55, %v2250_v62  ;;  %v2797_v35 = vpop.f32.mrf.mxu0  ;;  %v1941_v13 = vadd.f32 %v1867_v59, %v3944_v7 }
 0x281   : > { %v2870_v16 = vadd.f32 %v2794_v45, %v2560_v10  ;;  %3288 = vmatmul.msk.f32.gmra.mxu1 %vm246_vm1, %v1991_v39  ;;  %3326 = vmatmul.msk.f32.gmra.mxu2 %vm246_vm1, %v1993_v12 }
 0x282   : > { %3364 = vmatmul.msk.f32.gmra.mxu3 %vm246_vm1, %v2303_v31  ;;  %3402 = vmatmul.msk.f32.gmra.mxu0 %vm246_vm1, %v2613_v51 }
 0x283   : > { %v2910_v11 = vadd.f32 %v4137_v52, %v2870_v16 }
 0x284   : > { %v2177_v3 = vpop.f32.mrf.mxu2 }
 0x285   : > { %v2946_v21 = vmax.f32 %v2910_v11, 0.0  ;;  %v2251_v8 = vadd.f32 %v2177_v3, %v1941_v13  ;;  %v2487_v6 = vpop.f32.mrf.mxu3 }
 0x286   : > { %v1870_v20 = vpop.f32.mrf.mxu1 }
 0x287   : > { %2982 = vst [vmem:[%s4151_s16 + $0x80] sm:$0xff] %v2946_v21  ;;  %v2561_v58 = vadd.f32 %v2487_v6, %v2251_v8  ;;  %v2800_v56 = vpop.f32.mrf.mxu0  ;;  %v1942_v7 = vadd.f32 %v1870_v20, %v3954_v25 }
 0x289   : > { %v2871_v39 = vadd.f32 %v2797_v35, %v2561_v58  ;;  %3289 = vmatmul.msk.f32.gmra.mxu1 %vm246_vm1, %v1992_v49  ;;  %3327 = vmatmul.msk.f32.gmra.mxu2 %vm246_vm1, %v1994_v15 }
 0x28a   : > { %3365 = vmatmul.msk.f32.gmra.mxu3 %vm246_vm1, %v2304_v36  ;;  %3403 = vmatmul.msk.f32.gmra.mxu0 %vm246_vm1, %v2614_v17 }
 0x28b   : > { %v2911_v26 = vadd.f32 %v4137_v52, %v2871_v39 }
 0x28c   : > { %v2180_v42 = vpop.f32.mrf.mxu2 }
 0x28d   : > { %v2947_v47 = vmax.f32 %v2911_v26, 0.0  ;;  %v2252_v38 = vadd.f32 %v2180_v42, %v1942_v7  ;;  %v2490_v22 = vpop.f32.mrf.mxu3 }
 0x28e   : > { %v1873_v29 = vpop.f32.mrf.mxu1 }
 0x28f   : > { %2983 = vst [vmem:[%s4151_s16 + $0x88] sm:$0xff] %v2947_v47  ;;  %v2562_v33 = vadd.f32 %v2490_v22, %v2252_v38  ;;  %v2803_v50 = vpop.f32.mrf.mxu0  ;;  %v1943_v25 = vadd.f32 %v1873_v29, %v3965_v32 }
 0x291   : > { %v2872_v43 = vadd.f32 %v2800_v56, %v2562_v33  ;;  %3290 = vmatmul.msk.f32.gmra.mxu1 %vm246_vm1, %v1993_v12  ;;  %3328 = vmatmul.msk.f32.gmra.mxu2 %vm246_vm1, %v1995_v60 }
 0x292   : > { %3366 = vmatmul.msk.f32.gmra.mxu3 %vm246_vm1, %v2305_v40  ;;  %3404 = vmatmul.msk.f32.gmra.mxu0 %vm246_vm1, %v2615_v1 }
 0x293   : > { %v2912_v49 = vadd.f32 %v4137_v52, %v2872_v43 }
 0x294   : > { %v2183_v28 = vpop.f32.mrf.mxu2 }
 0x295   : > { %v2948_v24 = vmax.f32 %v2912_v49, 0.0  ;;  %v2253_v45 = vadd.f32 %v2183_v28, %v1943_v25  ;;  %v2493_v61 = vpop.f32.mrf.mxu3 }
 0x296   : > { %v1876_v46 = vpop.f32.mrf.mxu1 }
 0x297   : > { %2984 = vst [vmem:[%s4151_s16 + $0x90] sm:$0xff] %v2948_v24  ;;  %v2563_v54 = vadd.f32 %v2493_v61, %v2253_v45  ;;  %v2806_v48 = vpop.f32.mrf.mxu0  ;;  %v1944_v2 = vadd.f32 %v1876_v46, %v3976_v57 }
 0x299   : > { %v2873_v5 = vadd.f32 %v2803_v50, %v2563_v54 }
 0x29b   : > { %v2913_v62 = vadd.f32 %v4137_v52, %v2873_v5 }
 0x29c   : > { %v2186_v55 = vpop.f32.mrf.mxu2 }
 0x29d   : > { %v2949_v59 = vmax.f32 %v2913_v62, 0.0  ;;  %v2254_v32 = vadd.f32 %v2186_v55, %v1944_v2  ;;  %v2496_v12 = vpop.f32.mrf.mxu3 }
 0x29e   : > { %v1879_v10 = vpop.f32.mrf.mxu1 }
 0x29f   : > { %2985 = vst [vmem:[%s4151_s16 + $0x98] sm:$0xff] %v2949_v59  ;;  %v2564_v31 = vadd.f32 %v2496_v12, %v2254_v32  ;;  %v2809_v35 = vpop.f32.mrf.mxu0  ;;  %v1945_v16 = vadd.f32 %v1879_v10, %v3986_v19 }
 0x2a1   : > { %v2874_v51 = vadd.f32 %v2806_v48, %v2564_v31 }
 0x2a3   : > { %v2914_v13 = vadd.f32 %v4137_v52, %v2874_v51 }
 0x2a4   : > { %v2189_v11 = vpop.f32.mrf.mxu2 }
 0x2a5   : > { %v2950_v3 = vmax.f32 %v2914_v13, 0.0  ;;  %v2255_v57 = vadd.f32 %v2189_v11, %v1945_v16  ;;  %v2499_v21 = vpop.f32.mrf.mxu3 }
 0x2a6   : > { %v1882_v8 = vpop.f32.mrf.mxu1 }
 0x2a7   : > { %2986 = vst [vmem:[%s4151_s16 + $0xa0] sm:$0xff] %v2950_v3  ;;  %v2565_v6 = vadd.f32 %v2499_v21, %v2255_v57  ;;  %v2812_v20 = vpop.f32.mrf.mxu0  ;;  %v1946_v58 = vadd.f32 %v1882_v8, %v3996_v41 }
 0x2a9   : > { %v2875_v15 = vadd.f32 %v2809_v35, %v2565_v6 }
 0x2ab   : > { %v2915_v36 = vadd.f32 %v4137_v52, %v2875_v15 }
 0x2ac   : > { %v2192_v56 = vpop.f32.mrf.mxu2 }
 0x2ad   : > { %v2951_v17 = vmax.f32 %v2915_v36, 0.0  ;;  %v2256_v19 = vadd.f32 %v2192_v56, %v1946_v58  ;;  %v2502_v39 = vpop.f32.mrf.mxu3 }
 0x2ae   : > { %v1885_v7 = vpop.f32.mrf.mxu1 }
 0x2af   : > { %2987 = vst [vmem:[%s4151_s16 + $0xa8] sm:$0xff] %v2951_v17  ;;  %v2566_v26 = vadd.f32 %v2502_v39, %v2256_v19  ;;  %v2815_v42 = vpop.f32.mrf.mxu0  ;;  %v1947_v38 = vadd.f32 %v1885_v7, %v4006_v0 }
 0x2b1   : > { %v2876_v47 = vadd.f32 %v2812_v20, %v2566_v26 }
 0x2b3   : > { %v2916_v22 = vadd.f32 %v4137_v52, %v2876_v47 }
 0x2b4   : > { %v2195_v29 = vpop.f32.mrf.mxu2 }
 0x2b5   : > { %v2952_v60 = vmax.f32 %v2916_v22, 0.0  ;;  %v2257_v41 = vadd.f32 %v2195_v29, %v1947_v38  ;;  %v2505_v33 = vpop.f32.mrf.mxu3 }
 0x2b6   : > { %v1888_v40 = vpop.f32.mrf.mxu1 }
 0x2b7   : > { %2988 = vst [vmem:[%s4151_s16 + $0xb0] sm:$0xff] %v2952_v60  ;;  %v2567_v50 = vadd.f32 %v2505_v33, %v2257_v41  ;;  %v2818_v1 = vpop.f32.mrf.mxu0  ;;  %v1948_v25 = vadd.f32 %v1888_v40, %v4016_v53 }
 0x2b9   : > { %v2877_v43 = vadd.f32 %v2815_v42, %v2567_v50 }
 0x2bb   : > { %v2917_v49 = vadd.f32 %v4137_v52, %v2877_v43 }
 0x2bc   : > { %v2198_v28 = vpop.f32.mrf.mxu2 }
 0x2bd   : > { %v2953_v24 = vmax.f32 %v2917_v49, 0.0  ;;  %v2258_v0 = vadd.f32 %v2198_v28, %v1948_v25  ;;  %v2508_v45 = vpop.f32.mrf.mxu3 }
 0x2be   : > { %v1891_v61 = vpop.f32.mrf.mxu1 }
 0x2bf   : > { %2989 = vst [vmem:[%s4151_s16 + $0xb8] sm:$0xff] %v2953_v24  ;;  %v2568_v46 = vadd.f32 %v2508_v45, %v2258_v0  ;;  %v2821_v54 = vpop.f32.mrf.mxu0  ;;  %v1949_v5 = vadd.f32 %v1891_v61, %v4026_v63 }
 0x2c1   : > { %v2878_v48 = vadd.f32 %v2818_v1, %v2568_v46 }
 0x2c3   : > { %v2918_v2 = vadd.f32 %v4137_v52, %v2878_v48 }
 0x2c4   : > { %v2201_v62 = vpop.f32.mrf.mxu2 }
 0x2c5   : > { %v2954_v55 = vmax.f32 %v2918_v2, 0.0  ;;  %v2259_v53 = vadd.f32 %v2201_v62, %v1949_v5  ;;  %v2511_v59 = vpop.f32.mrf.mxu3 }
 0x2c6   : > { %v1894_v32 = vpop.f32.mrf.mxu1 }
 0x2c7   : > { %2990 = vst [vmem:[%s4151_s16 + $0xc0] sm:$0xff] %v2954_v55  ;;  %v2569_v12 = vadd.f32 %v2511_v59, %v2259_v53  ;;  %v2824_v10 = vpop.f32.mrf.mxu0  ;;  %v1950_v35 = vadd.f32 %v1894_v32, %v4036_v4 }
 0x2c9   : > { %v2879_v31 = vadd.f32 %v2821_v54, %v2569_v12 }
 0x2cb   : > { %v2919_v51 = vadd.f32 %v4137_v52, %v2879_v31 }
 0x2cc   : > { %v2204_v16 = vpop.f32.mrf.mxu2 }
 0x2cd   : > { %v2955_v13 = vmax.f32 %v2919_v51, 0.0  ;;  %v2260_v63 = vadd.f32 %v2204_v16, %v1950_v35  ;;  %v2514_v11 = vpop.f32.mrf.mxu3 }
 0x2ce   : > { %v1897_v3 = vpop.f32.mrf.mxu1 }
 0x2cf   : > { %2991 = vst [vmem:[%s4151_s16 + $0xc8] sm:$0xff] %v2955_v13  ;;  %v2570_v57 = vadd.f32 %v2514_v11, %v2260_v63  ;;  %v2827_v21 = vpop.f32.mrf.mxu0  ;;  %v1951_v6 = vadd.f32 %v1897_v3, %v4046_v27 }
 0x2d1   : > { %v2880_v8 = vadd.f32 %v2824_v10, %v2570_v57 }
 0x2d3   : > { %v2920_v20 = vadd.f32 %v4137_v52, %v2880_v8 }
 0x2d4   : > { %v2207_v15 = vpop.f32.mrf.mxu2 }
 0x2d5   : > { %v2956_v58 = vmax.f32 %v2920_v20, 0.0  ;;  %v2261_v4 = vadd.f32 %v2207_v15, %v1951_v6  ;;  %v2517_v36 = vpop.f32.mrf.mxu3 }
 0x2d6   : > { %v1900_v56 = vpop.f32.mrf.mxu1 }
 0x2d7   : > { %2992 = vst [vmem:[%s4151_s16 + $0xd0] sm:$0xff] %v2956_v58  ;;  %v2571_v17 = vadd.f32 %v2517_v36, %v2261_v4  ;;  %v2830_v19 = vpop.f32.mrf.mxu0  ;;  %v1952_v7 = vadd.f32 %v1900_v56, %v4056_v18 }
 0x2d9   : > { %v2881_v39 = vadd.f32 %v2827_v21, %v2571_v17 }
 0x2db   : > { %v2921_v26 = vadd.f32 %v4137_v52, %v2881_v39 }
 0x2dc   : > { %v2210_v42 = vpop.f32.mrf.mxu2 }
 0x2dd   : > { %v2957_v47 = vmax.f32 %v2921_v26, 0.0  ;;  %v2262_v27 = vadd.f32 %v2210_v42, %v1952_v7  ;;  %v2520_v38 = vpop.f32.mrf.mxu3 }
 0x2de   : > { %v1903_v22 = vpop.f32.mrf.mxu1 }
 0x2df   : > { %2993 = vst [vmem:[%s4151_s16 + $0xd8] sm:$0xff] %v2957_v47  ;;  %v2572_v29 = vadd.f32 %v2520_v38, %v2262_v27  ;;  %v2833_v60 = vpop.f32.mrf.mxu0  ;;  %v1953_v33 = vadd.f32 %v1903_v22, %v4066_v14 }
 0x2e1   : > { %v2882_v41 = vadd.f32 %v2830_v19, %v2572_v29 }
 0x2e3   : > { %v2922_v40 = vadd.f32 %v4137_v52, %v2882_v41 }
 0x2e4   : > { %v2213_v50 = vpop.f32.mrf.mxu2 }
 0x2e5   : > { %v2958_v1 = vmax.f32 %v2922_v40, 0.0  ;;  %v2263_v18 = vadd.f32 %v2213_v50, %v1953_v33  ;;  %v2523_v43 = vpop.f32.mrf.mxu3 }
 0x2e6   : > { %v1906_v25 = vpop.f32.mrf.mxu1 }
 0x2e7   : > { %2994 = vst [vmem:[%s4151_s16 + $0xe0] sm:$0xff] %v2958_v1  ;;  %v2573_v49 = vadd.f32 %v2523_v43, %v2263_v18  ;;  %v2836_v28 = vpop.f32.mrf.mxu0  ;;  %v1954_v0 = vadd.f32 %v1906_v25, %v4076_v34  ;;  %v3421_v25 = vld [vmem:[%s4391_s2] ss:$0 sm:$0xff] }
 0x2e9   : > { %v2883_v24 = vadd.f32 %v2833_v60, %v2573_v49 }
 0x2eb   : > { %v2923_v45 = vadd.f32 %v4137_v52, %v2883_v24 }
 0x2ec   : > { %v2216_v61 = vpop.f32.mrf.mxu2 }
 0x2ed   : > { %v2959_v46 = vmax.f32 %v2923_v45, 0.0  ;;  %v2264_v14 = vadd.f32 %v2216_v61, %v1954_v0  ;;  %v2526_v54 = vpop.f32.mrf.mxu3 }
 0x2ee   : > { %v1909_v48 = vpop.f32.mrf.mxu1 }
 0x2ef   : > { %2995 = vst [vmem:[%s4151_s16 + $0xe8] sm:$0xff] %v2959_v46  ;;  %v2574_v5 = vadd.f32 %v2526_v54, %v2264_v14  ;;  %v2839_v2 = vpop.f32.mrf.mxu0  ;;  %v1955_v55 = vadd.f32 %v1909_v48, %v4086_v23 }
 0x2f1   : > { %v2884_v62 = vadd.f32 %v2836_v28, %v2574_v5 }
 0x2f3   : > { %v2924_v53 = vadd.f32 %v4137_v52, %v2884_v62 }
 0x2f4   : > { %v2219_v59 = vpop.f32.mrf.mxu2 }
 0x2f5   : > { %v2960_v32 = vmax.f32 %v2924_v53, 0.0  ;;  %v2265_v34 = vadd.f32 %v2219_v59, %v1955_v55  ;;  %v2529_v12 = vpop.f32.mrf.mxu3 }
 0x2f6   : > { %v1912_v10 = vpop.f32.mrf.mxu1 }
 0x2f7   : > { %2996 = vst [vmem:[%s4151_s16 + $0xf0] sm:$0xff] %v2960_v32  ;;  %v2575_v31 = vadd.f32 %v2529_v12, %v2265_v34  ;;  %v2842_v35 = vpop.f32.mrf.mxu0  ;;  %v1956_v16 = vadd.f32 %v1912_v10, %v4096_v30 }
 0x2f9   : > { %v2885_v51 = vadd.f32 %v2839_v2, %v2575_v31 }
 0x2fb   : > { %v2925_v13 = vadd.f32 %v4137_v52, %v2885_v51 }
 0x2fc   : > { %v2222_v63 = vpop.f32.mrf.mxu2 }
 0x2fd   : > { %v2961_v11 = vmax.f32 %v2925_v13, 0.0  ;;  %v2266_v23 = vadd.f32 %v2222_v63, %v1956_v16  ;;  %v2532_v3 = vpop.f32.mrf.mxu3 }
 0x2fe   : > { %v1915_v57 = vpop.f32.mrf.mxu1 }
 0x2ff   : > { %2997 = vst [vmem:[%s4151_s16 + $0xf8] sm:$0xff] %v2961_v11  ;;  %v2576_v21 = vadd.f32 %v2532_v3, %v2266_v23  ;;  %v2845_v6 = vpop.f32.mrf.mxu0  ;;  %v1957_v20 = vadd.f32 %v1915_v57, %v4106_v37 }
 0x301   : > { %v2886_v8 = vadd.f32 %v2842_v35, %v2576_v21 }
 0x303   : > { %v2926_v15 = vadd.f32 %v4137_v52, %v2886_v8 }
 0x304   : > { %v2225_v58 = vpop.f32.mrf.mxu2 }
 0x305   : > { %v2962_v4 = vmax.f32 %v2926_v15, 0.0  ;;  %v2267_v30 = vadd.f32 %v2225_v58, %v1957_v20  ;;  %v2535_v36 = vpop.f32.mrf.mxu3 }
 0x306   : > { %v1918_v56 = vpop.f32.mrf.mxu1 }
 0x307   : > { %2998 = vst [vmem:[%s4151_s16 + $0x100] sm:$0xff] %v2962_v4  ;;  %v2577_v17 = vadd.f32 %v2535_v36, %v2267_v30  ;;  %v1958_v39 = vadd.f32 %v1918_v56, %v4116_v44  ;;  %v2848_v42 = vpop.f32.mrf.mxu0 }
 0x309   : > { %v2887_v19 = vadd.f32 %v2845_v6, %v2577_v17 }
 0x30b   : > { %v2927_v7 = vadd.f32 %v4137_v52, %v2887_v19 }
 0x30c   : > { %v2228_v26 = vpop.f32.mrf.mxu2 }
 0x30d   : > { %v2963_v47 = vmax.f32 %v2927_v7, 0.0  ;;  %v2268_v37 = vadd.f32 %v2228_v26, %v1958_v39  ;;  %v2538_v27 = vpop.f32.mrf.mxu3 }
 0x30e   : > { %v1921_v22 = vpop.f32.mrf.mxu1 }
 0x30f   : > { %2999 = vst [vmem:[%s4151_s16 + $0x108] sm:$0xff] %v2963_v47  ;;  %v2578_v38 = vadd.f32 %v2538_v27, %v2268_v37  ;;  %v1959_v60 = vadd.f32 %v1921_v22, %v4126_v9  ;;  %v2851_v1 = vpop.f32.mrf.mxu0 }
 0x311   : > { %v2888_v29 = vadd.f32 %v2848_v42, %v2578_v38 }
 0x313   : > { %v2928_v41 = vadd.f32 %v4137_v52, %v2888_v29 }
 0x314   : > { %v2231_v33 = vpop.f32.mrf.mxu2 }
 0x315   : > { %v2964_v40 = vmax.f32 %v2928_v41, 0.0  ;;  %v2269_v44 = vadd.f32 %v2231_v33, %v1959_v60  ;;  %v2541_v50 = vpop.f32.mrf.mxu3 }
 0x317   : > { %3000 = vst [vmem:[%s4151_s16 + $0x110] sm:$0xff] %v2964_v40  ;;  %v2579_v18 = vadd.f32 %v2541_v50, %v2269_v44 }
 0x319   : > { %v2889_v43 = vadd.f32 %v2851_v1, %v2579_v18 }
 0x31b   : > { %v2929_v49 = vadd.f32 %v3421_v25, %v2889_v43 }
 0x31d   : > { %v2965_v28 = vmax.f32 %v2929_v49, 0.0 }
 0x31f   : > { %3001 = vst [vmem:[%s4151_s16 + $0x118] sm:$0xff] %v2965_v28 }
 0x320 PF: > { %s13_s12 = sadd.s32 1, %s3428_s12  }
 0x321   : > { %p10_p4 = scmp.ge.s32.totalorder %s13_s12, 4  }
 0x323   :  { %12 = sbr.rel (!%p10_p4) target bundleno = 1 (0x1), region = 70 }

</bundles_post_ra>
